<compile_context>
chip_gen: v7x
topology: tpu7x:2x2x1
jax: 0.10.0
libtpu: 0.0.40
codegen_flags: <defaults>
</compile_context>

<pallas_src>
import functools

import jax
import jax.numpy as jnp
from jax.experimental import pallas as pl
from jax.experimental.pallas import tpu as pltpu


def _round_up(x, m):
    return ((x + m - 1) // m) * m


# ---------------------------------------------------------------------------
# Fused kernel: boost+clamp -> 3x3 conv (single K=9*C_PAD im2col dot per chunk)
#               -> bias+ReLU -> masked GAP on the MXU -> FC head.
# One grid step == B_TILE batch elements.
# ---------------------------------------------------------------------------
def _make_fused_kernel(B_TILE, C_PAD, F_PAD, Wp2, SHIFT, M_CHUNK, N_CHUNKS, apply_clamp):
    # flat-row offset of tap (dy, dx) relative to the centre pixel, dy/dx in {0,1,2}
    offsets = [(dy - 1) * Wp2 + (dx - 1) for dy in range(3) for dx in range(3)]

    def kernel(x_ref, d_ref, pw_ref, wc_ref, bc_ref, wf_ref, bf_ref, out_ref,
               xb_ref, pooled_ref, patch_ref):
        wc = wc_ref[...]                 # [9*C_PAD, F_PAD]  (small, keep hot)
        bc = bc_ref[...]                 # [1, F_PAD]

        for b in range(B_TILE):          # static unroll over the images of this step
            # ---- boost + clamp (guard / pad rows are 0 + 0 -> stay 0 == conv zero padding) ----
            xb = x_ref[b] + d_ref[...]   # delta already carries dummy*0
            if apply_clamp:
                xb = jnp.clip(xb, 0.0, 1.0)
            xb_ref[b] = xb               # boosted image stays in VMEM scratch

            pooled = jnp.zeros((1, F_PAD), jnp.float32)
            for c in range(N_CHUNKS):    # static unroll over 128-pixel chunks
                slot = (b * N_CHUNKS + c) % 2          # double-buffered im2col scratch
                base = SHIFT + c * M_CHUNK
                # in-VMEM im2col: 9 sublane-shifted tap slices laid out along lanes
                for i, off in enumerate(offsets):
                    patch_ref[slot, :, i * C_PAD:(i + 1) * C_PAD] = (
                        xb_ref[b, pl.ds(base + off, M_CHUNK), :])
                # one MXU dot per chunk: [M_CHUNK, 9*C_PAD] x [9*C_PAD, F_PAD]
                feat = jnp.dot(patch_ref[slot], wc, preferred_element_type=jnp.float32)
                feat = jnp.maximum(feat + bc, 0.0)     # conv bias + ReLU
                # masked global-avg-pool partial sum, also on the MXU: [1,M_CHUNK] x [M_CHUNK,F_PAD]
                pooled = pooled + jnp.dot(pw_ref[c], feat, preferred_element_type=jnp.float32)

            pooled_ref[pl.ds(b, 1), :] = pooled

        # ---- FC head for the whole tile: one dot, one lane-dense (B_TILE, CLS_PAD) store ----
        out_ref[0] = (jnp.dot(pooled_ref[...], wf_ref[...], preferred_element_type=jnp.float32)
                      + bf_ref[...])

    return kernel


# ---------------------------------------------------------------------------
# BoostedModel forward
# ---------------------------------------------------------------------------
def boosted_model_forward(params, inp_nchw, target, use_boost=True):
    del target  # pass-through only in the PyTorch wrapper

    N, C, H, W = inp_nchw.shape
    F = params["conv_w"].shape[-1]
    num_classes = params["fc_w"].shape[-1]

    C_PAD = max(8, _round_up(C, 8))          # sublane-aligned per-tap contraction chunk
    F_PAD = _round_up(F, 128)                # lane-dense conv output / FC input
    CLS_PAD = _round_up(num_classes, 128)    # lane-dense logits store

    Hp2 = H + 2
    Wp2 = _round_up(W + 2, 8)                # padded width rounded so dy tap offsets are 8-aligned
    PP = Hp2 * Wp2                           # flattened padded pixel count (multiple of 8)
    SHIFT = _round_up(Wp2 + 1, 8)            # guard rows >= max |tap offset|, 8-aligned
    M_CHUNK = 128                            # pixels per MXU dot (keeps live values ~16 vregs)
    N_CHUNKS = -(-PP // M_CHUNK)
    PP_TILES = N_CHUNKS * M_CHUNK
    EXT = PP_TILES + 2 * SHIFT

    # Batch tile: amortize per-grid-step overhead, but keep >= 2 grid steps for v7x's two TCs.
    B_TILE = max(1, min(8, N // 2)) if N >= 2 else 1
    N_PAD = _round_up(N, B_TILE)
    NUM_STEPS = N_PAD // B_TILE

    # ---- host-side layout plumbing (tiny, fuses under jit) ----
    x = jnp.transpose(inp_nchw, (0, 2, 3, 1)).astype(jnp.float32)             # NCHW -> NHWC
    x = jnp.pad(x, ((0, N_PAD - N), (1, 1), (1, Wp2 - W - 1), (0, C_PAD - C)))  # conv/width/channel pad
    x = x.reshape(N_PAD, PP, C_PAD)
    x = jnp.pad(x, ((0, 0), (SHIFT, SHIFT + PP_TILES - PP), (0, 0)))          # guard + chunk overhang

    # fold `inp + dummy * 0` into the additive delta; zero delta on the no-boost path
    if use_boost:
        delta = params["delta"] + params["dummy"] * 0.0
    else:
        delta = jnp.zeros_like(params["delta"]) + params["dummy"] * 0.0
    d = jnp.pad(delta.astype(jnp.float32), ((1, 1), (1, Wp2 - W - 1), (0, C_PAD - C)))
    d = jnp.pad(d.reshape(PP, C_PAD), ((SHIFT, SHIFT + PP_TILES - PP), (0, 0)))  # [EXT, C_PAD]

    # pooling row: 1/(H*W) on interior pixels, 0 on conv-pad / width-pad / overhang pixels.
    r = jnp.arange(PP_TILES)
    hp, wp = r // Wp2, r % Wp2
    interior = (r < PP) & (hp >= 1) & (hp <= H) & (wp >= 1) & (wp <= W)
    pool_w = (interior.astype(jnp.float32) / float(H * W)).reshape(N_CHUNKS, 1, M_CHUNK)

    # conv / fc params, zero-padded to hardware-friendly shapes (padding does not change the math)
    wc = jnp.pad(params["conv_w"].astype(jnp.float32),
                 ((0, 0), (0, 0), (0, C_PAD - C), (0, F_PAD - F))).reshape(9 * C_PAD, F_PAD)
    bc = jnp.pad(params["conv_b"].astype(jnp.float32), (0, F_PAD - F)).reshape(1, F_PAD)
    wf = jnp.pad(params["fc_w"].astype(jnp.float32),
                 ((0, F_PAD - F), (0, CLS_PAD - num_classes)))
    bf = jnp.pad(params["fc_b"].astype(jnp.float32), (0, CLS_PAD - num_classes)).reshape(1, CLS_PAD)

    kernel = _make_fused_kernel(B_TILE, C_PAD, F_PAD, Wp2, SHIFT, M_CHUNK, N_CHUNKS,
                                apply_clamp=use_boost)

    out = pl.pallas_call(
        kernel,
        out_shape=jax.ShapeDtypeStruct((NUM_STEPS, B_TILE, CLS_PAD), jnp.float32),
        grid=(NUM_STEPS,),
        in_specs=[
            pl.BlockSpec((B_TILE, EXT, C_PAD), lambda s: (s, 0, 0)),    # B_TILE images per step
            pl.BlockSpec((EXT, C_PAD), lambda s: (0, 0)),               # delta (resident)
            pl.BlockSpec((N_CHUNKS, 1, M_CHUNK), lambda s: (0, 0, 0)),  # pooling rows (resident)
            pl.BlockSpec((9 * C_PAD, F_PAD), lambda s: (0, 0)),         # conv weights (im2col layout)
            pl.BlockSpec((1, F_PAD), lambda s: (0, 0)),                 # conv bias
            pl.BlockSpec((F_PAD, CLS_PAD), lambda s: (0, 0)),           # fc weights
            pl.BlockSpec((1, CLS_PAD), lambda s: (0, 0)),               # fc bias
        ],
        out_specs=pl.BlockSpec((1, B_TILE, CLS_PAD), lambda s: (s, 0, 0)),
        scratch_shapes=[
            pltpu.VMEM((B_TILE, EXT, C_PAD), jnp.float32),      # boosted images
            pltpu.VMEM((B_TILE, F_PAD), jnp.float32),           # pooled features per image
            pltpu.VMEM((2, M_CHUNK, 9 * C_PAD), jnp.float32),   # double-buffered im2col patches
        ],
        compiler_params=pltpu.CompilerParams(dimension_semantics=("parallel",)),
    )(x, d, pool_w, wc, bc, wf, bf)

    return out.reshape(NUM_STEPS * B_TILE, CLS_PAD)[:N, :num_classes]


# ---------------------------------------------------------------------------
# Pure-JAX reference (for correctness check)
# ---------------------------------------------------------------------------
def reference_forward(params, inp_nchw, use_boost=True):
    x = jnp.transpose(inp_nchw, (0, 2, 3, 1)).astype(jnp.float32)   # NHWC
    x = x + params["dummy"] * 0.0
    if use_boost:
        x = jnp.clip(x + params["delta"], 0.0, 1.0)
    y = jax.lax.conv_general_dilated(
        x, params["conv_w"], window_strides=(1, 1), padding="SAME",
        dimension_numbers=("NHWC", "HWIO", "NHWC"))
    y = jnp.maximum(y + params["conv_b"], 0.0)
    pooled = jnp.mean(y, axis=(1, 2))
    return pooled @ params["fc_w"] + params["fc_b"]


def init_params(key, C=4, H=16, W=16, F=8, num_classes=10):
    k1, k2, k3, _ = jax.random.split(key, 4)
    return {
        "dummy": jnp.ones((), jnp.float32),                                # nn.Parameter(ones(()))
        "delta": 0.01 * jax.random.normal(k1, (H, W, C), jnp.float32),     # booster perturbation
        "conv_w": 0.1 * jax.random.normal(k2, (3, 3, C, F), jnp.float32),  # (kh, kw, Cin, Cout)
        "conv_b": jnp.zeros((F,), jnp.float32),
        "fc_w": 0.1 * jax.random.normal(k3, (F, num_classes), jnp.float32),
        "fc_b": jnp.zeros((num_classes,), jnp.float32),
    }


if __name__ == "__main__":
    key = jax.random.PRNGKey(0)
    kp, kx1, kx2, kt = jax.random.split(key, 4)

    C, H, W, NUM_CLASSES = 4, 16, 16, 10
    params = init_params(kp, C=C, H=H, W=W, num_classes=NUM_CLASSES)
    fwd = jax.jit(functools.partial(boosted_model_forward, use_boost=True))

    # Small-batch case (B_TILE=1, 2 grid steps).
    N1 = 2
    inp1 = jax.random.uniform(kx1, (N1, C, H, W), jnp.float32)
    tgt1 = jax.random.randint(kt, (N1,), 0, NUM_CLASSES)
    logits1 = jax.block_until_ready(fwd(params, inp1, tgt1))
    ref1 = reference_forward(params, inp1, use_boost=True)
    assert logits1.shape == (N1, NUM_CLASSES)
    assert bool(jnp.all(jnp.isfinite(logits1)))
    assert bool(jnp.allclose(logits1, ref1, rtol=2e-2, atol=2e-2)), (
        f"max abs err {float(jnp.max(jnp.abs(logits1 - ref1)))}")

    # Batched case (B_TILE=8, 2 grid steps) to exercise the multi-image-per-step path.
    N2 = 16
    inp2 = jax.random.uniform(kx2, (N2, C, H, W), jnp.float32)
    tgt2 = jax.random.randint(kt, (N2,), 0, NUM_CLASSES)
    logits2 = jax.block_until_ready(fwd(params, inp2, tgt2))
    ref2 = reference_forward(params, inp2, use_boost=True)
    assert logits2.shape == (N2, NUM_CLASSES)
    assert bool(jnp.all(jnp.isfinite(logits2)))
    assert bool(jnp.allclose(logits2, ref2, rtol=2e-2, atol=2e-2)), (
        f"max abs err {float(jnp.max(jnp.abs(logits2 - ref2)))}")

    print("KERNEL_OK")
</pallas_src>

<mosaic_0001>
module attributes {stable_mosaic.version = 11 : i64} {
  func.func @kernel(%arg0: i32, %arg1: memref<1x576x8xf32, #tpu.memory_space<vmem>>, %arg2: memref<576x8xf32, #tpu.memory_space<vmem>>, %arg3: memref<4x1x128xf32, #tpu.memory_space<vmem>>, %arg4: memref<72x128xf32, #tpu.memory_space<vmem>>, %arg5: memref<1x128xf32, #tpu.memory_space<vmem>>, %arg6: memref<128x128xf32, #tpu.memory_space<vmem>>, %arg7: memref<1x128xf32, #tpu.memory_space<vmem>>, %arg8: memref<1x1x128xf32, #tpu.memory_space<vmem>>, %arg9: memref<1x576x8xf32, #tpu.memory_space<vmem>>, %arg10: memref<1x128xf32, #tpu.memory_space<vmem>>, %arg11: memref<2x128x72xf32, #tpu.memory_space<vmem>>) attributes {dimension_semantics = [#tpu.dimension_semantics<parallel>], iteration_bounds = array<i64: 2>, scalar_prefetch = 0 : i64, scratch_operands = 3 : i64, tpu.core_type = #tpu.core_type<tc>, window_params = [{transform_indices = @transform_0, window_bounds = array<i64: 1, 576, 8>}, {pipeline_mode = #tpu.pipeline_mode<synchronous>, transform_indices = @transform_1, window_bounds = array<i64: 576, 8>}, {pipeline_mode = #tpu.pipeline_mode<synchronous>, transform_indices = @transform_2, window_bounds = array<i64: 4, 1, 128>}, {pipeline_mode = #tpu.pipeline_mode<synchronous>, transform_indices = @transform_3, window_bounds = array<i64: 72, 128>}, {pipeline_mode = #tpu.pipeline_mode<synchronous>, transform_indices = @transform_4, window_bounds = array<i64: 1, 128>}, {pipeline_mode = #tpu.pipeline_mode<synchronous>, transform_indices = @transform_5, window_bounds = array<i64: 128, 128>}, {pipeline_mode = #tpu.pipeline_mode<synchronous>, transform_indices = @transform_6, window_bounds = array<i64: 1, 128>}, {transform_indices = @transform_7, window_bounds = array<i64: 1, 1, 128>}]} {
    %c0 = arith.constant 0 : index
    %c0_0 = arith.constant 0 : index
    %0 = vector.load %arg4[%c0, %c0_0] : memref<72x128xf32, #tpu.memory_space<vmem>>, vector<72x128xf32>
    %c0_1 = arith.constant 0 : index
    %c0_2 = arith.constant 0 : index
    %1 = vector.load %arg5[%c0_1, %c0_2] : memref<1x128xf32, #tpu.memory_space<vmem>>, vector<1x128xf32>
    %c0_3 = arith.constant 0 : index
    %c0_4 = arith.constant 0 : index
    %c0_5 = arith.constant 0 : index
    %2 = vector.load %arg1[%c0_3, %c0_4, %c0_5] : memref<1x576x8xf32, #tpu.memory_space<vmem>>, vector<1x576x8xf32>
    %3 = vector.shape_cast %2 : vector<1x576x8xf32> to vector<576x8xf32>
    %c0_6 = arith.constant 0 : index
    %c0_7 = arith.constant 0 : index
    %4 = vector.load %arg2[%c0_6, %c0_7] : memref<576x8xf32, #tpu.memory_space<vmem>>, vector<576x8xf32>
    %5 = arith.addf %3, %4 : vector<576x8xf32>
    %cst = arith.constant 0.000000e+00 : f32
    %cst_8 = arith.constant 1.000000e+00 : f32
    %6 = vector.broadcast %cst : f32 to vector<576x8xf32>
    %7 = arith.maximumf %6, %5 : vector<576x8xf32>
    %8 = vector.broadcast %cst_8 : f32 to vector<576x8xf32>
    %9 = arith.minimumf %8, %7 : vector<576x8xf32>
    %c0_9 = arith.constant 0 : index
    %c0_10 = arith.constant 0 : index
    %c0_11 = arith.constant 0 : index
    %10 = vector.load %arg9[%c0_9, %c0_10, %c0_11] : memref<1x576x8xf32, #tpu.memory_space<vmem>>, vector<1x576x8xf32>
    %11 = vector.shape_cast %10 : vector<1x576x8xf32> to vector<576x8xf32>
    %12 = vector.shape_cast %9 : vector<576x8xf32> to vector<1x576x8xf32>
    tpu.vector_store %arg9[%c0_9, %c0_10, %c0_11], %12 {strides = array<i32>} : memref<1x576x8xf32, #tpu.memory_space<vmem>>, vector<1x576x8xf32>,
    %cst_12 = arith.constant 0.000000e+00 : f32
    %13 = vector.broadcast %cst_12 : f32 to vector<1x128xf32>
    %c0_13 = arith.constant 0 : index
    %c7 = arith.constant 7 : index
    %c0_14 = arith.constant 0 : index
    %14 = vector.load %arg9[%c0_13, %c7, %c0_14] : memref<1x576x8xf32, #tpu.memory_space<vmem>>, vector<1x128x8xf32>
    %15 = vector.shape_cast %14 : vector<1x128x8xf32> to vector<128x8xf32>
    %c0_15 = arith.constant 0 : index
    %c0_16 = arith.constant 0 : index
    %c0_17 = arith.constant 0 : index
    %16 = vector.load %arg11[%c0_15, %c0_16, %c0_17] : memref<2x128x72xf32, #tpu.memory_space<vmem>>, vector<1x128x8xf32>
    %17 = vector.shape_cast %16 : vector<1x128x8xf32> to vector<128x8xf32>
    %18 = vector.shape_cast %15 : vector<128x8xf32> to vector<1x128x8xf32>
    tpu.vector_store %arg11[%c0_15, %c0_16, %c0_17], %18 {strides = array<i32>} : memref<2x128x72xf32, #tpu.memory_space<vmem>>, vector<1x128x8xf32>,
    %c0_18 = arith.constant 0 : index
    %c8 = arith.constant 8 : index
    %c0_19 = arith.constant 0 : index
    %19 = vector.load %arg9[%c0_18, %c8, %c0_19] : memref<1x576x8xf32, #tpu.memory_space<vmem>>, vector<1x128x8xf32>
    %20 = vector.shape_cast %19 : vector<1x128x8xf32> to vector<128x8xf32>
    %c0_20 = arith.constant 0 : index
    %c0_21 = arith.constant 0 : index
    %c8_22 = arith.constant 8 : index
    %21 = vector.load %arg11[%c0_20, %c0_21, %c8_22] : memref<2x128x72xf32, #tpu.memory_space<vmem>>, vector<1x128x8xf32>
    %22 = vector.shape_cast %21 : vector<1x128x8xf32> to vector<128x8xf32>
    %23 = vector.shape_cast %20 : vector<128x8xf32> to vector<1x128x8xf32>
    tpu.vector_store %arg11[%c0_20, %c0_21, %c8_22], %23 {strides = array<i32>} : memref<2x128x72xf32, #tpu.memory_space<vmem>>, vector<1x128x8xf32>,
    %c0_23 = arith.constant 0 : index
    %c9 = arith.constant 9 : index
    %c0_24 = arith.constant 0 : index
    %24 = vector.load %arg9[%c0_23, %c9, %c0_24] : memref<1x576x8xf32, #tpu.memory_space<vmem>>, vector<1x128x8xf32>
    %25 = vector.shape_cast %24 : vector<1x128x8xf32> to vector<128x8xf32>
    %c0_25 = arith.constant 0 : index
    %c0_26 = arith.constant 0 : index
    %c16 = arith.constant 16 : index
    %26 = vector.load %arg11[%c0_25, %c0_26, %c16] : memref<2x128x72xf32, #tpu.memory_space<vmem>>, vector<1x128x8xf32>
    %27 = vector.shape_cast %26 : vector<1x128x8xf32> to vector<128x8xf32>
    %28 = vector.shape_cast %25 : vector<128x8xf32> to vector<1x128x8xf32>
    tpu.vector_store %arg11[%c0_25, %c0_26, %c16], %28 {strides = array<i32>} : memref<2x128x72xf32, #tpu.memory_space<vmem>>, vector<1x128x8xf32>,
    %c0_27 = arith.constant 0 : index
    %c31 = arith.constant 31 : index
    %c0_28 = arith.constant 0 : index
    %29 = vector.load %arg9[%c0_27, %c31, %c0_28] : memref<1x576x8xf32, #tpu.memory_space<vmem>>, vector<1x128x8xf32>
    %30 = vector.shape_cast %29 : vector<1x128x8xf32> to vector<128x8xf32>
    %c0_29 = arith.constant 0 : index
    %c0_30 = arith.constant 0 : index
    %c24 = arith.constant 24 : index
    %31 = vector.load %arg11[%c0_29, %c0_30, %c24] : memref<2x128x72xf32, #tpu.memory_space<vmem>>, vector<1x128x8xf32>
    %32 = vector.shape_cast %31 : vector<1x128x8xf32> to vector<128x8xf32>
    %33 = vector.shape_cast %30 : vector<128x8xf32> to vector<1x128x8xf32>
    tpu.vector_store %arg11[%c0_29, %c0_30, %c24], %33 {strides = array<i32>} : memref<2x128x72xf32, #tpu.memory_space<vmem>>, vector<1x128x8xf32>,
    %c0_31 = arith.constant 0 : index
    %c32 = arith.constant 32 : index
    %c0_32 = arith.constant 0 : index
    %34 = vector.load %arg9[%c0_31, %c32, %c0_32] : memref<1x576x8xf32, #tpu.memory_space<vmem>>, vector<1x128x8xf32>
    %35 = vector.shape_cast %34 : vector<1x128x8xf32> to vector<128x8xf32>
    %c0_33 = arith.constant 0 : index
    %c0_34 = arith.constant 0 : index
    %c32_35 = arith.constant 32 : index
    %36 = vector.load %arg11[%c0_33, %c0_34, %c32_35] : memref<2x128x72xf32, #tpu.memory_space<vmem>>, vector<1x128x8xf32>
    %37 = vector.shape_cast %36 : vector<1x128x8xf32> to vector<128x8xf32>
    %38 = vector.shape_cast %35 : vector<128x8xf32> to vector<1x128x8xf32>
    tpu.vector_store %arg11[%c0_33, %c0_34, %c32_35], %38 {strides = array<i32>} : memref<2x128x72xf32, #tpu.memory_space<vmem>>, vector<1x128x8xf32>,
    %c0_36 = arith.constant 0 : index
    %c33 = arith.constant 33 : index
    %c0_37 = arith.constant 0 : index
    %39 = vector.load %arg9[%c0_36, %c33, %c0_37] : memref<1x576x8xf32, #tpu.memory_space<vmem>>, vector<1x128x8xf32>
    %40 = vector.shape_cast %39 : vector<1x128x8xf32> to vector<128x8xf32>
    %c0_38 = arith.constant 0 : index
    %c0_39 = arith.constant 0 : index
    %c40 = arith.constant 40 : index
    %41 = vector.load %arg11[%c0_38, %c0_39, %c40] : memref<2x128x72xf32, #tpu.memory_space<vmem>>, vector<1x128x8xf32>
    %42 = vector.shape_cast %41 : vector<1x128x8xf32> to vector<128x8xf32>
    %43 = vector.shape_cast %40 : vector<128x8xf32> to vector<1x128x8xf32>
    tpu.vector_store %arg11[%c0_38, %c0_39, %c40], %43 {strides = array<i32>} : memref<2x128x72xf32, #tpu.memory_space<vmem>>, vector<1x128x8xf32>,
    %c0_40 = arith.constant 0 : index
    %c55 = arith.constant 55 : index
    %c0_41 = arith.constant 0 : index
    %44 = vector.load %arg9[%c0_40, %c55, %c0_41] : memref<1x576x8xf32, #tpu.memory_space<vmem>>, vector<1x128x8xf32>
    %45 = vector.shape_cast %44 : vector<1x128x8xf32> to vector<128x8xf32>
    %c0_42 = arith.constant 0 : index
    %c0_43 = arith.constant 0 : index
    %c48 = arith.constant 48 : index
    %46 = vector.load %arg11[%c0_42, %c0_43, %c48] : memref<2x128x72xf32, #tpu.memory_space<vmem>>, vector<1x128x8xf32>
    %47 = vector.shape_cast %46 : vector<1x128x8xf32> to vector<128x8xf32>
    %48 = vector.shape_cast %45 : vector<128x8xf32> to vector<1x128x8xf32>
    tpu.vector_store %arg11[%c0_42, %c0_43, %c48], %48 {strides = array<i32>} : memref<2x128x72xf32, #tpu.memory_space<vmem>>, vector<1x128x8xf32>,
    %c0_44 = arith.constant 0 : index
    %c56 = arith.constant 56 : index
    %c0_45 = arith.constant 0 : index
    %49 = vector.load %arg9[%c0_44, %c56, %c0_45] : memref<1x576x8xf32, #tpu.memory_space<vmem>>, vector<1x128x8xf32>
    %50 = vector.shape_cast %49 : vector<1x128x8xf32> to vector<128x8xf32>
    %c0_46 = arith.constant 0 : index
    %c0_47 = arith.constant 0 : index
    %c56_48 = arith.constant 56 : index
    %51 = vector.load %arg11[%c0_46, %c0_47, %c56_48] : memref<2x128x72xf32, #tpu.memory_space<vmem>>, vector<1x128x8xf32>
    %52 = vector.shape_cast %51 : vector<1x128x8xf32> to vector<128x8xf32>
    %53 = vector.shape_cast %50 : vector<128x8xf32> to vector<1x128x8xf32>
    tpu.vector_store %arg11[%c0_46, %c0_47, %c56_48], %53 {strides = array<i32>} : memref<2x128x72xf32, #tpu.memory_space<vmem>>, vector<1x128x8xf32>,
    %c0_49 = arith.constant 0 : index
    %c57 = arith.constant 57 : index
    %c0_50 = arith.constant 0 : index
    %54 = vector.load %arg9[%c0_49, %c57, %c0_50] : memref<1x576x8xf32, #tpu.memory_space<vmem>>, vector<1x128x8xf32>
    %55 = vector.shape_cast %54 : vector<1x128x8xf32> to vector<128x8xf32>
    %c0_51 = arith.constant 0 : index
    %c0_52 = arith.constant 0 : index
    %c64 = arith.constant 64 : index
    %56 = vector.load %arg11[%c0_51, %c0_52, %c64] : memref<2x128x72xf32, #tpu.memory_space<vmem>>, vector<1x128x8xf32>
    %57 = vector.shape_cast %56 : vector<1x128x8xf32> to vector<128x8xf32>
    %58 = vector.shape_cast %55 : vector<128x8xf32> to vector<1x128x8xf32>
    tpu.vector_store %arg11[%c0_51, %c0_52, %c64], %58 {strides = array<i32>} : memref<2x128x72xf32, #tpu.memory_space<vmem>>, vector<1x128x8xf32>,
    %c0_53 = arith.constant 0 : index
    %c0_54 = arith.constant 0 : index
    %c0_55 = arith.constant 0 : index
    %59 = vector.load %arg11[%c0_53, %c0_54, %c0_55] : memref<2x128x72xf32, #tpu.memory_space<vmem>>, vector<1x128x72xf32>
    %60 = vector.shape_cast %59 : vector<1x128x72xf32> to vector<128x72xf32>
    %cst_56 = arith.constant dense<0.000000e+00> : vector<128x128xf32>
    %61 = tpu.matmul %60, %0, %cst_56 {dimension_numbers = #tpu.dot_dimension_numbers<[1], [0], [0], [1], [0, 0, 1, 1], [], []>} : vector<128x72xf32>, vector<72x128xf32>, vector<128x128xf32> -> vector<128x128xf32>
    %62 = vector.broadcast %1 : vector<1x128xf32> to vector<128x128xf32>
    %63 = arith.addf %61, %62 : vector<128x128xf32>
    %cst_57 = arith.constant 0.000000e+00 : f32
    %64 = vector.broadcast %cst_57 : f32 to vector<128x128xf32>
    %65 = arith.maximumf %63, %64 : vector<128x128xf32>
    %c0_58 = arith.constant 0 : index
    %c0_59 = arith.constant 0 : index
    %c0_60 = arith.constant 0 : index
    %66 = vector.load %arg3[%c0_58, %c0_59, %c0_60] : memref<4x1x128xf32, #tpu.memory_space<vmem>>, vector<1x1x128xf32>
    %67 = vector.shape_cast %66 : vector<1x1x128xf32> to vector<1x128xf32>
    %cst_61 = arith.constant dense<0.000000e+00> : vector<1x128xf32>
    %68 = tpu.matmul %67, %65, %cst_61 {dimension_numbers = #tpu.dot_dimension_numbers<[1], [0], [0], [1], [0, 0, 1, 1], [], []>} : vector<1x128xf32>, vector<128x128xf32>, vector<1x128xf32> -> vector<1x128xf32>
    %69 = arith.addf %13, %68 : vector<1x128xf32>
    %c0_62 = arith.constant 0 : index
    %c135 = arith.constant 135 : index
    %c0_63 = arith.constant 0 : index
    %70 = vector.load %arg9[%c0_62, %c135, %c0_63] : memref<1x576x8xf32, #tpu.memory_space<vmem>>, vector<1x128x8xf32>
    %71 = vector.shape_cast %70 : vector<1x128x8xf32> to vector<128x8xf32>
    %c1 = arith.constant 1 : index
    %c0_64 = arith.constant 0 : index
    %c0_65 = arith.constant 0 : index
    %72 = vector.load %arg11[%c1, %c0_64, %c0_65] : memref<2x128x72xf32, #tpu.memory_space<vmem>>, vector<1x128x8xf32>
    %73 = vector.shape_cast %72 : vector<1x128x8xf32> to vector<128x8xf32>
    %74 = vector.shape_cast %71 : vector<128x8xf32> to vector<1x128x8xf32>
    tpu.vector_store %arg11[%c1, %c0_64, %c0_65], %74 {strides = array<i32>} : memref<2x128x72xf32, #tpu.memory_space<vmem>>, vector<1x128x8xf32>,
    %c0_66 = arith.constant 0 : index
    %c136 = arith.constant 136 : index
    %c0_67 = arith.constant 0 : index
    %75 = vector.load %arg9[%c0_66, %c136, %c0_67] : memref<1x576x8xf32, #tpu.memory_space<vmem>>, vector<1x128x8xf32>
    %76 = vector.shape_cast %75 : vector<1x128x8xf32> to vector<128x8xf32>
    %c1_68 = arith.constant 1 : index
    %c0_69 = arith.constant 0 : index
    %c8_70 = arith.constant 8 : index
    %77 = vector.load %arg11[%c1_68, %c0_69, %c8_70] : memref<2x128x72xf32, #tpu.memory_space<vmem>>, vector<1x128x8xf32>
    %78 = vector.shape_cast %77 : vector<1x128x8xf32> to vector<128x8xf32>
    %79 = vector.shape_cast %76 : vector<128x8xf32> to vector<1x128x8xf32>
    tpu.vector_store %arg11[%c1_68, %c0_69, %c8_70], %79 {strides = array<i32>} : memref<2x128x72xf32, #tpu.memory_space<vmem>>, vector<1x128x8xf32>,
    %c0_71 = arith.constant 0 : index
    %c137 = arith.constant 137 : index
    %c0_72 = arith.constant 0 : index
    %80 = vector.load %arg9[%c0_71, %c137, %c0_72] : memref<1x576x8xf32, #tpu.memory_space<vmem>>, vector<1x128x8xf32>
    %81 = vector.shape_cast %80 : vector<1x128x8xf32> to vector<128x8xf32>
    %c1_73 = arith.constant 1 : index
    %c0_74 = arith.constant 0 : index
    %c16_75 = arith.constant 16 : index
    %82 = vector.load %arg11[%c1_73, %c0_74, %c16_75] : memref<2x128x72xf32, #tpu.memory_space<vmem>>, vector<1x128x8xf32>
    %83 = vector.shape_cast %82 : vector<1x128x8xf32> to vector<128x8xf32>
    %84 = vector.shape_cast %81 : vector<128x8xf32> to vector<1x128x8xf32>
    tpu.vector_store %arg11[%c1_73, %c0_74, %c16_75], %84 {strides = array<i32>} : memref<2x128x72xf32, #tpu.memory_space<vmem>>, vector<1x128x8xf32>,
    %c0_76 = arith.constant 0 : index
    %c159 = arith.constant 159 : index
    %c0_77 = arith.constant 0 : index
    %85 = vector.load %arg9[%c0_76, %c159, %c0_77] : memref<1x576x8xf32, #tpu.memory_space<vmem>>, vector<1x128x8xf32>
    %86 = vector.shape_cast %85 : vector<1x128x8xf32> to vector<128x8xf32>
    %c1_78 = arith.constant 1 : index
    %c0_79 = arith.constant 0 : index
    %c24_80 = arith.constant 24 : index
    %87 = vector.load %arg11[%c1_78, %c0_79, %c24_80] : memref<2x128x72xf32, #tpu.memory_space<vmem>>, vector<1x128x8xf32>
    %88 = vector.shape_cast %87 : vector<1x128x8xf32> to vector<128x8xf32>
    %89 = vector.shape_cast %86 : vector<128x8xf32> to vector<1x128x8xf32>
    tpu.vector_store %arg11[%c1_78, %c0_79, %c24_80], %89 {strides = array<i32>} : memref<2x128x72xf32, #tpu.memory_space<vmem>>, vector<1x128x8xf32>,
    %c0_81 = arith.constant 0 : index
    %c160 = arith.constant 160 : index
    %c0_82 = arith.constant 0 : index
    %90 = vector.load %arg9[%c0_81, %c160, %c0_82] : memref<1x576x8xf32, #tpu.memory_space<vmem>>, vector<1x128x8xf32>
    %91 = vector.shape_cast %90 : vector<1x128x8xf32> to vector<128x8xf32>
    %c1_83 = arith.constant 1 : index
    %c0_84 = arith.constant 0 : index
    %c32_85 = arith.constant 32 : index
    %92 = vector.load %arg11[%c1_83, %c0_84, %c32_85] : memref<2x128x72xf32, #tpu.memory_space<vmem>>, vector<1x128x8xf32>
    %93 = vector.shape_cast %92 : vector<1x128x8xf32> to vector<128x8xf32>
    %94 = vector.shape_cast %91 : vector<128x8xf32> to vector<1x128x8xf32>
    tpu.vector_store %arg11[%c1_83, %c0_84, %c32_85], %94 {strides = array<i32>} : memref<2x128x72xf32, #tpu.memory_space<vmem>>, vector<1x128x8xf32>,
    %c0_86 = arith.constant 0 : index
    %c161 = arith.constant 161 : index
    %c0_87 = arith.constant 0 : index
    %95 = vector.load %arg9[%c0_86, %c161, %c0_87] : memref<1x576x8xf32, #tpu.memory_space<vmem>>, vector<1x128x8xf32>
    %96 = vector.shape_cast %95 : vector<1x128x8xf32> to vector<128x8xf32>
    %c1_88 = arith.constant 1 : index
    %c0_89 = arith.constant 0 : index
    %c40_90 = arith.constant 40 : index
    %97 = vector.load %arg11[%c1_88, %c0_89, %c40_90] : memref<2x128x72xf32, #tpu.memory_space<vmem>>, vector<1x128x8xf32>
    %98 = vector.shape_cast %97 : vector<1x128x8xf32> to vector<128x8xf32>
    %99 = vector.shape_cast %96 : vector<128x8xf32> to vector<1x128x8xf32>
    tpu.vector_store %arg11[%c1_88, %c0_89, %c40_90], %99 {strides = array<i32>} : memref<2x128x72xf32, #tpu.memory_space<vmem>>, vector<1x128x8xf32>,
    %c0_91 = arith.constant 0 : index
    %c183 = arith.constant 183 : index
    %c0_92 = arith.constant 0 : index
    %100 = vector.load %arg9[%c0_91, %c183, %c0_92] : memref<1x576x8xf32, #tpu.memory_space<vmem>>, vector<1x128x8xf32>
    %101 = vector.shape_cast %100 : vector<1x128x8xf32> to vector<128x8xf32>
    %c1_93 = arith.constant 1 : index
    %c0_94 = arith.constant 0 : index
    %c48_95 = arith.constant 48 : index
    %102 = vector.load %arg11[%c1_93, %c0_94, %c48_95] : memref<2x128x72xf32, #tpu.memory_space<vmem>>, vector<1x128x8xf32>
    %103 = vector.shape_cast %102 : vector<1x128x8xf32> to vector<128x8xf32>
    %104 = vector.shape_cast %101 : vector<128x8xf32> to vector<1x128x8xf32>
    tpu.vector_store %arg11[%c1_93, %c0_94, %c48_95], %104 {strides = array<i32>} : memref<2x128x72xf32, #tpu.memory_space<vmem>>, vector<1x128x8xf32>,
    %c0_96 = arith.constant 0 : index
    %c184 = arith.constant 184 : index
    %c0_97 = arith.constant 0 : index
    %105 = vector.load %arg9[%c0_96, %c184, %c0_97] : memref<1x576x8xf32, #tpu.memory_space<vmem>>, vector<1x128x8xf32>
    %106 = vector.shape_cast %105 : vector<1x128x8xf32> to vector<128x8xf32>
    %c1_98 = arith.constant 1 : index
    %c0_99 = arith.constant 0 : index
    %c56_100 = arith.constant 56 : index
    %107 = vector.load %arg11[%c1_98, %c0_99, %c56_100] : memref<2x128x72xf32, #tpu.memory_space<vmem>>, vector<1x128x8xf32>
    %108 = vector.shape_cast %107 : vector<1x128x8xf32> to vector<128x8xf32>
    %109 = vector.shape_cast %106 : vector<128x8xf32> to vector<1x128x8xf32>
    tpu.vector_store %arg11[%c1_98, %c0_99, %c56_100], %109 {strides = array<i32>} : memref<2x128x72xf32, #tpu.memory_space<vmem>>, vector<1x128x8xf32>,
    %c0_101 = arith.constant 0 : index
    %c185 = arith.constant 185 : index
    %c0_102 = arith.constant 0 : index
    %110 = vector.load %arg9[%c0_101, %c185, %c0_102] : memref<1x576x8xf32, #tpu.memory_space<vmem>>, vector<1x128x8xf32>
    %111 = vector.shape_cast %110 : vector<1x128x8xf32> to vector<128x8xf32>
    %c1_103 = arith.constant 1 : index
    %c0_104 = arith.constant 0 : index
    %c64_105 = arith.constant 64 : index
    %112 = vector.load %arg11[%c1_103, %c0_104, %c64_105] : memref<2x128x72xf32, #tpu.memory_space<vmem>>, vector<1x128x8xf32>
    %113 = vector.shape_cast %112 : vector<1x128x8xf32> to vector<128x8xf32>
    %114 = vector.shape_cast %111 : vector<128x8xf32> to vector<1x128x8xf32>
    tpu.vector_store %arg11[%c1_103, %c0_104, %c64_105], %114 {strides = array<i32>} : memref<2x128x72xf32, #tpu.memory_space<vmem>>, vector<1x128x8xf32>,
    %c1_106 = arith.constant 1 : index
    %c0_107 = arith.constant 0 : index
    %c0_108 = arith.constant 0 : index
    %115 = vector.load %arg11[%c1_106, %c0_107, %c0_108] : memref<2x128x72xf32, #tpu.memory_space<vmem>>, vector<1x128x72xf32>
    %116 = vector.shape_cast %115 : vector<1x128x72xf32> to vector<128x72xf32>
    %cst_109 = arith.constant dense<0.000000e+00> : vector<128x128xf32>
    %117 = tpu.matmul %116, %0, %cst_109 {dimension_numbers = #tpu.dot_dimension_numbers<[1], [0], [0], [1], [0, 0, 1, 1], [], []>} : vector<128x72xf32>, vector<72x128xf32>, vector<128x128xf32> -> vector<128x128xf32>
    %118 = vector.broadcast %1 : vector<1x128xf32> to vector<128x128xf32>
    %119 = arith.addf %117, %118 : vector<128x128xf32>
    %cst_110 = arith.constant 0.000000e+00 : f32
    %120 = vector.broadcast %cst_110 : f32 to vector<128x128xf32>
    %121 = arith.maximumf %119, %120 : vector<128x128xf32>
    %c1_111 = arith.constant 1 : index
    %c0_112 = arith.constant 0 : index
    %c0_113 = arith.constant 0 : index
    %122 = vector.load %arg3[%c1_111, %c0_112, %c0_113] : memref<4x1x128xf32, #tpu.memory_space<vmem>>, vector<1x1x128xf32>
    %123 = vector.shape_cast %122 : vector<1x1x128xf32> to vector<1x128xf32>
    %cst_114 = arith.constant dense<0.000000e+00> : vector<1x128xf32>
    %124 = tpu.matmul %123, %121, %cst_114 {dimension_numbers = #tpu.dot_dimension_numbers<[1], [0], [0], [1], [0, 0, 1, 1], [], []>} : vector<1x128xf32>, vector<128x128xf32>, vector<1x128xf32> -> vector<1x128xf32>
    %125 = arith.addf %69, %124 : vector<1x128xf32>
    %c0_115 = arith.constant 0 : index
    %c263 = arith.constant 263 : index
    %c0_116 = arith.constant 0 : index
    %126 = vector.load %arg9[%c0_115, %c263, %c0_116] : memref<1x576x8xf32, #tpu.memory_space<vmem>>, vector<1x128x8xf32>
    %127 = vector.shape_cast %126 : vector<1x128x8xf32> to vector<128x8xf32>
    %c0_117 = arith.constant 0 : index
    %c0_118 = arith.constant 0 : index
    %c0_119 = arith.constant 0 : index
    %128 = vector.load %arg11[%c0_117, %c0_118, %c0_119] : memref<2x128x72xf32, #tpu.memory_space<vmem>>, vector<1x128x8xf32>
    %129 = vector.shape_cast %128 : vector<1x128x8xf32> to vector<128x8xf32>
    %130 = vector.shape_cast %127 : vector<128x8xf32> to vector<1x128x8xf32>
    tpu.vector_store %arg11[%c0_117, %c0_118, %c0_119], %130 {strides = array<i32>} : memref<2x128x72xf32, #tpu.memory_space<vmem>>, vector<1x128x8xf32>,
    %c0_120 = arith.constant 0 : index
    %c264 = arith.constant 264 : index
    %c0_121 = arith.constant 0 : index
    %131 = vector.load %arg9[%c0_120, %c264, %c0_121] : memref<1x576x8xf32, #tpu.memory_space<vmem>>, vector<1x128x8xf32>
    %132 = vector.shape_cast %131 : vector<1x128x8xf32> to vector<128x8xf32>
    %c0_122 = arith.constant 0 : index
    %c0_123 = arith.constant 0 : index
    %c8_124 = arith.constant 8 : index
    %133 = vector.load %arg11[%c0_122, %c0_123, %c8_124] : memref<2x128x72xf32, #tpu.memory_space<vmem>>, vector<1x128x8xf32>
    %134 = vector.shape_cast %133 : vector<1x128x8xf32> to vector<128x8xf32>
    %135 = vector.shape_cast %132 : vector<128x8xf32> to vector<1x128x8xf32>
    tpu.vector_store %arg11[%c0_122, %c0_123, %c8_124], %135 {strides = array<i32>} : memref<2x128x72xf32, #tpu.memory_space<vmem>>, vector<1x128x8xf32>,
    %c0_125 = arith.constant 0 : index
    %c265 = arith.constant 265 : index
    %c0_126 = arith.constant 0 : index
    %136 = vector.load %arg9[%c0_125, %c265, %c0_126] : memref<1x576x8xf32, #tpu.memory_space<vmem>>, vector<1x128x8xf32>
    %137 = vector.shape_cast %136 : vector<1x128x8xf32> to vector<128x8xf32>
    %c0_127 = arith.constant 0 : index
    %c0_128 = arith.constant 0 : index
    %c16_129 = arith.constant 16 : index
    %138 = vector.load %arg11[%c0_127, %c0_128, %c16_129] : memref<2x128x72xf32, #tpu.memory_space<vmem>>, vector<1x128x8xf32>
    %139 = vector.shape_cast %138 : vector<1x128x8xf32> to vector<128x8xf32>
    %140 = vector.shape_cast %137 : vector<128x8xf32> to vector<1x128x8xf32>
    tpu.vector_store %arg11[%c0_127, %c0_128, %c16_129], %140 {strides = array<i32>} : memref<2x128x72xf32, #tpu.memory_space<vmem>>, vector<1x128x8xf32>,
    %c0_130 = arith.constant 0 : index
    %c287 = arith.constant 287 : index
    %c0_131 = arith.constant 0 : index
    %141 = vector.load %arg9[%c0_130, %c287, %c0_131] : memref<1x576x8xf32, #tpu.memory_space<vmem>>, vector<1x128x8xf32>
    %142 = vector.shape_cast %141 : vector<1x128x8xf32> to vector<128x8xf32>
    %c0_132 = arith.constant 0 : index
    %c0_133 = arith.constant 0 : index
    %c24_134 = arith.constant 24 : index
    %143 = vector.load %arg11[%c0_132, %c0_133, %c24_134] : memref<2x128x72xf32, #tpu.memory_space<vmem>>, vector<1x128x8xf32>
    %144 = vector.shape_cast %143 : vector<1x128x8xf32> to vector<128x8xf32>
    %145 = vector.shape_cast %142 : vector<128x8xf32> to vector<1x128x8xf32>
    tpu.vector_store %arg11[%c0_132, %c0_133, %c24_134], %145 {strides = array<i32>} : memref<2x128x72xf32, #tpu.memory_space<vmem>>, vector<1x128x8xf32>,
    %c0_135 = arith.constant 0 : index
    %c288 = arith.constant 288 : index
    %c0_136 = arith.constant 0 : index
    %146 = vector.load %arg9[%c0_135, %c288, %c0_136] : memref<1x576x8xf32, #tpu.memory_space<vmem>>, vector<1x128x8xf32>
    %147 = vector.shape_cast %146 : vector<1x128x8xf32> to vector<128x8xf32>
    %c0_137 = arith.constant 0 : index
    %c0_138 = arith.constant 0 : index
    %c32_139 = arith.constant 32 : index
    %148 = vector.load %arg11[%c0_137, %c0_138, %c32_139] : memref<2x128x72xf32, #tpu.memory_space<vmem>>, vector<1x128x8xf32>
    %149 = vector.shape_cast %148 : vector<1x128x8xf32> to vector<128x8xf32>
    %150 = vector.shape_cast %147 : vector<128x8xf32> to vector<1x128x8xf32>
    tpu.vector_store %arg11[%c0_137, %c0_138, %c32_139], %150 {strides = array<i32>} : memref<2x128x72xf32, #tpu.memory_space<vmem>>, vector<1x128x8xf32>,
    %c0_140 = arith.constant 0 : index
    %c289 = arith.constant 289 : index
    %c0_141 = arith.constant 0 : index
    %151 = vector.load %arg9[%c0_140, %c289, %c0_141] : memref<1x576x8xf32, #tpu.memory_space<vmem>>, vector<1x128x8xf32>
    %152 = vector.shape_cast %151 : vector<1x128x8xf32> to vector<128x8xf32>
    %c0_142 = arith.constant 0 : index
    %c0_143 = arith.constant 0 : index
    %c40_144 = arith.constant 40 : index
    %153 = vector.load %arg11[%c0_142, %c0_143, %c40_144] : memref<2x128x72xf32, #tpu.memory_space<vmem>>, vector<1x128x8xf32>
    %154 = vector.shape_cast %153 : vector<1x128x8xf32> to vector<128x8xf32>
    %155 = vector.shape_cast %152 : vector<128x8xf32> to vector<1x128x8xf32>
    tpu.vector_store %arg11[%c0_142, %c0_143, %c40_144], %155 {strides = array<i32>} : memref<2x128x72xf32, #tpu.memory_space<vmem>>, vector<1x128x8xf32>,
    %c0_145 = arith.constant 0 : index
    %c311 = arith.constant 311 : index
    %c0_146 = arith.constant 0 : index
    %156 = vector.load %arg9[%c0_145, %c311, %c0_146] : memref<1x576x8xf32, #tpu.memory_space<vmem>>, vector<1x128x8xf32>
    %157 = vector.shape_cast %156 : vector<1x128x8xf32> to vector<128x8xf32>
    %c0_147 = arith.constant 0 : index
    %c0_148 = arith.constant 0 : index
    %c48_149 = arith.constant 48 : index
    %158 = vector.load %arg11[%c0_147, %c0_148, %c48_149] : memref<2x128x72xf32, #tpu.memory_space<vmem>>, vector<1x128x8xf32>
    %159 = vector.shape_cast %158 : vector<1x128x8xf32> to vector<128x8xf32>
    %160 = vector.shape_cast %157 : vector<128x8xf32> to vector<1x128x8xf32>
    tpu.vector_store %arg11[%c0_147, %c0_148, %c48_149], %160 {strides = array<i32>} : memref<2x128x72xf32, #tpu.memory_space<vmem>>, vector<1x128x8xf32>,
    %c0_150 = arith.constant 0 : index
    %c312 = arith.constant 312 : index
    %c0_151 = arith.constant 0 : index
    %161 = vector.load %arg9[%c0_150, %c312, %c0_151] : memref<1x576x8xf32, #tpu.memory_space<vmem>>, vector<1x128x8xf32>
    %162 = vector.shape_cast %161 : vector<1x128x8xf32> to vector<128x8xf32>
    %c0_152 = arith.constant 0 : index
    %c0_153 = arith.constant 0 : index
    %c56_154 = arith.constant 56 : index
    %163 = vector.load %arg11[%c0_152, %c0_153, %c56_154] : memref<2x128x72xf32, #tpu.memory_space<vmem>>, vector<1x128x8xf32>
    %164 = vector.shape_cast %163 : vector<1x128x8xf32> to vector<128x8xf32>
    %165 = vector.shape_cast %162 : vector<128x8xf32> to vector<1x128x8xf32>
    tpu.vector_store %arg11[%c0_152, %c0_153, %c56_154], %165 {strides = array<i32>} : memref<2x128x72xf32, #tpu.memory_space<vmem>>, vector<1x128x8xf32>,
    %c0_155 = arith.constant 0 : index
    %c313 = arith.constant 313 : index
    %c0_156 = arith.constant 0 : index
    %166 = vector.load %arg9[%c0_155, %c313, %c0_156] : memref<1x576x8xf32, #tpu.memory_space<vmem>>, vector<1x128x8xf32>
    %167 = vector.shape_cast %166 : vector<1x128x8xf32> to vector<128x8xf32>
    %c0_157 = arith.constant 0 : index
    %c0_158 = arith.constant 0 : index
    %c64_159 = arith.constant 64 : index
    %168 = vector.load %arg11[%c0_157, %c0_158, %c64_159] : memref<2x128x72xf32, #tpu.memory_space<vmem>>, vector<1x128x8xf32>
    %169 = vector.shape_cast %168 : vector<1x128x8xf32> to vector<128x8xf32>
    %170 = vector.shape_cast %167 : vector<128x8xf32> to vector<1x128x8xf32>
    tpu.vector_store %arg11[%c0_157, %c0_158, %c64_159], %170 {strides = array<i32>} : memref<2x128x72xf32, #tpu.memory_space<vmem>>, vector<1x128x8xf32>,
    %c0_160 = arith.constant 0 : index
    %c0_161 = arith.constant 0 : index
    %c0_162 = arith.constant 0 : index
    %171 = vector.load %arg11[%c0_160, %c0_161, %c0_162] : memref<2x128x72xf32, #tpu.memory_space<vmem>>, vector<1x128x72xf32>
    %172 = vector.shape_cast %171 : vector<1x128x72xf32> to vector<128x72xf32>
    %cst_163 = arith.constant dense<0.000000e+00> : vector<128x128xf32>
    %173 = tpu.matmul %172, %0, %cst_163 {dimension_numbers = #tpu.dot_dimension_numbers<[1], [0], [0], [1], [0, 0, 1, 1], [], []>} : vector<128x72xf32>, vector<72x128xf32>, vector<128x128xf32> -> vector<128x128xf32>
    %174 = vector.broadcast %1 : vector<1x128xf32> to vector<128x128xf32>
    %175 = arith.addf %173, %174 : vector<128x128xf32>
    %cst_164 = arith.constant 0.000000e+00 : f32
    %176 = vector.broadcast %cst_164 : f32 to vector<128x128xf32>
    %177 = arith.maximumf %175, %176 : vector<128x128xf32>
    %c2 = arith.constant 2 : index
    %c0_165 = arith.constant 0 : index
    %c0_166 = arith.constant 0 : index
    %178 = vector.load %arg3[%c2, %c0_165, %c0_166] : memref<4x1x128xf32, #tpu.memory_space<vmem>>, vector<1x1x128xf32>
    %179 = vector.shape_cast %178 : vector<1x1x128xf32> to vector<1x128xf32>
    %cst_167 = arith.constant dense<0.000000e+00> : vector<1x128xf32>
    %180 = tpu.matmul %179, %177, %cst_167 {dimension_numbers = #tpu.dot_dimension_numbers<[1], [0], [0], [1], [0, 0, 1, 1], [], []>} : vector<1x128xf32>, vector<128x128xf32>, vector<1x128xf32> -> vector<1x128xf32>
    %181 = arith.addf %125, %180 : vector<1x128xf32>
    %c0_168 = arith.constant 0 : index
    %c391 = arith.constant 391 : index
    %c0_169 = arith.constant 0 : index
    %182 = vector.load %arg9[%c0_168, %c391, %c0_169] : memref<1x576x8xf32, #tpu.memory_space<vmem>>, vector<1x128x8xf32>
    %183 = vector.shape_cast %182 : vector<1x128x8xf32> to vector<128x8xf32>
    %c1_170 = arith.constant 1 : index
    %c0_171 = arith.constant 0 : index
    %c0_172 = arith.constant 0 : index
    %184 = vector.load %arg11[%c1_170, %c0_171, %c0_172] : memref<2x128x72xf32, #tpu.memory_space<vmem>>, vector<1x128x8xf32>
    %185 = vector.shape_cast %184 : vector<1x128x8xf32> to vector<128x8xf32>
    %186 = vector.shape_cast %183 : vector<128x8xf32> to vector<1x128x8xf32>
    tpu.vector_store %arg11[%c1_170, %c0_171, %c0_172], %186 {strides = array<i32>} : memref<2x128x72xf32, #tpu.memory_space<vmem>>, vector<1x128x8xf32>,
    %c0_173 = arith.constant 0 : index
    %c392 = arith.constant 392 : index
    %c0_174 = arith.constant 0 : index
    %187 = vector.load %arg9[%c0_173, %c392, %c0_174] : memref<1x576x8xf32, #tpu.memory_space<vmem>>, vector<1x128x8xf32>
    %188 = vector.shape_cast %187 : vector<1x128x8xf32> to vector<128x8xf32>
    %c1_175 = arith.constant 1 : index
    %c0_176 = arith.constant 0 : index
    %c8_177 = arith.constant 8 : index
    %189 = vector.load %arg11[%c1_175, %c0_176, %c8_177] : memref<2x128x72xf32, #tpu.memory_space<vmem>>, vector<1x128x8xf32>
    %190 = vector.shape_cast %189 : vector<1x128x8xf32> to vector<128x8xf32>
    %191 = vector.shape_cast %188 : vector<128x8xf32> to vector<1x128x8xf32>
    tpu.vector_store %arg11[%c1_175, %c0_176, %c8_177], %191 {strides = array<i32>} : memref<2x128x72xf32, #tpu.memory_space<vmem>>, vector<1x128x8xf32>,
    %c0_178 = arith.constant 0 : index
    %c393 = arith.constant 393 : index
    %c0_179 = arith.constant 0 : index
    %192 = vector.load %arg9[%c0_178, %c393, %c0_179] : memref<1x576x8xf32, #tpu.memory_space<vmem>>, vector<1x128x8xf32>
    %193 = vector.shape_cast %192 : vector<1x128x8xf32> to vector<128x8xf32>
    %c1_180 = arith.constant 1 : index
    %c0_181 = arith.constant 0 : index
    %c16_182 = arith.constant 16 : index
    %194 = vector.load %arg11[%c1_180, %c0_181, %c16_182] : memref<2x128x72xf32, #tpu.memory_space<vmem>>, vector<1x128x8xf32>
    %195 = vector.shape_cast %194 : vector<1x128x8xf32> to vector<128x8xf32>
    %196 = vector.shape_cast %193 : vector<128x8xf32> to vector<1x128x8xf32>
    tpu.vector_store %arg11[%c1_180, %c0_181, %c16_182], %196 {strides = array<i32>} : memref<2x128x72xf32, #tpu.memory_space<vmem>>, vector<1x128x8xf32>,
    %c0_183 = arith.constant 0 : index
    %c415 = arith.constant 415 : index
    %c0_184 = arith.constant 0 : index
    %197 = vector.load %arg9[%c0_183, %c415, %c0_184] : memref<1x576x8xf32, #tpu.memory_space<vmem>>, vector<1x128x8xf32>
    %198 = vector.shape_cast %197 : vector<1x128x8xf32> to vector<128x8xf32>
    %c1_185 = arith.constant 1 : index
    %c0_186 = arith.constant 0 : index
    %c24_187 = arith.constant 24 : index
    %199 = vector.load %arg11[%c1_185, %c0_186, %c24_187] : memref<2x128x72xf32, #tpu.memory_space<vmem>>, vector<1x128x8xf32>
    %200 = vector.shape_cast %199 : vector<1x128x8xf32> to vector<128x8xf32>
    %201 = vector.shape_cast %198 : vector<128x8xf32> to vector<1x128x8xf32>
    tpu.vector_store %arg11[%c1_185, %c0_186, %c24_187], %201 {strides = array<i32>} : memref<2x128x72xf32, #tpu.memory_space<vmem>>, vector<1x128x8xf32>,
    %c0_188 = arith.constant 0 : index
    %c416 = arith.constant 416 : index
    %c0_189 = arith.constant 0 : index
    %202 = vector.load %arg9[%c0_188, %c416, %c0_189] : memref<1x576x8xf32, #tpu.memory_space<vmem>>, vector<1x128x8xf32>
    %203 = vector.shape_cast %202 : vector<1x128x8xf32> to vector<128x8xf32>
    %c1_190 = arith.constant 1 : index
    %c0_191 = arith.constant 0 : index
    %c32_192 = arith.constant 32 : index
    %204 = vector.load %arg11[%c1_190, %c0_191, %c32_192] : memref<2x128x72xf32, #tpu.memory_space<vmem>>, vector<1x128x8xf32>
    %205 = vector.shape_cast %204 : vector<1x128x8xf32> to vector<128x8xf32>
    %206 = vector.shape_cast %203 : vector<128x8xf32> to vector<1x128x8xf32>
    tpu.vector_store %arg11[%c1_190, %c0_191, %c32_192], %206 {strides = array<i32>} : memref<2x128x72xf32, #tpu.memory_space<vmem>>, vector<1x128x8xf32>,
    %c0_193 = arith.constant 0 : index
    %c417 = arith.constant 417 : index
    %c0_194 = arith.constant 0 : index
    %207 = vector.load %arg9[%c0_193, %c417, %c0_194] : memref<1x576x8xf32, #tpu.memory_space<vmem>>, vector<1x128x8xf32>
    %208 = vector.shape_cast %207 : vector<1x128x8xf32> to vector<128x8xf32>
    %c1_195 = arith.constant 1 : index
    %c0_196 = arith.constant 0 : index
    %c40_197 = arith.constant 40 : index
    %209 = vector.load %arg11[%c1_195, %c0_196, %c40_197] : memref<2x128x72xf32, #tpu.memory_space<vmem>>, vector<1x128x8xf32>
    %210 = vector.shape_cast %209 : vector<1x128x8xf32> to vector<128x8xf32>
    %211 = vector.shape_cast %208 : vector<128x8xf32> to vector<1x128x8xf32>
    tpu.vector_store %arg11[%c1_195, %c0_196, %c40_197], %211 {strides = array<i32>} : memref<2x128x72xf32, #tpu.memory_space<vmem>>, vector<1x128x8xf32>,
    %c0_198 = arith.constant 0 : index
    %c439 = arith.constant 439 : index
    %c0_199 = arith.constant 0 : index
    %212 = vector.load %arg9[%c0_198, %c439, %c0_199] : memref<1x576x8xf32, #tpu.memory_space<vmem>>, vector<1x128x8xf32>
    %213 = vector.shape_cast %212 : vector<1x128x8xf32> to vector<128x8xf32>
    %c1_200 = arith.constant 1 : index
    %c0_201 = arith.constant 0 : index
    %c48_202 = arith.constant 48 : index
    %214 = vector.load %arg11[%c1_200, %c0_201, %c48_202] : memref<2x128x72xf32, #tpu.memory_space<vmem>>, vector<1x128x8xf32>
    %215 = vector.shape_cast %214 : vector<1x128x8xf32> to vector<128x8xf32>
    %216 = vector.shape_cast %213 : vector<128x8xf32> to vector<1x128x8xf32>
    tpu.vector_store %arg11[%c1_200, %c0_201, %c48_202], %216 {strides = array<i32>} : memref<2x128x72xf32, #tpu.memory_space<vmem>>, vector<1x128x8xf32>,
    %c0_203 = arith.constant 0 : index
    %c440 = arith.constant 440 : index
    %c0_204 = arith.constant 0 : index
    %217 = vector.load %arg9[%c0_203, %c440, %c0_204] : memref<1x576x8xf32, #tpu.memory_space<vmem>>, vector<1x128x8xf32>
    %218 = vector.shape_cast %217 : vector<1x128x8xf32> to vector<128x8xf32>
    %c1_205 = arith.constant 1 : index
    %c0_206 = arith.constant 0 : index
    %c56_207 = arith.constant 56 : index
    %219 = vector.load %arg11[%c1_205, %c0_206, %c56_207] : memref<2x128x72xf32, #tpu.memory_space<vmem>>, vector<1x128x8xf32>
    %220 = vector.shape_cast %219 : vector<1x128x8xf32> to vector<128x8xf32>
    %221 = vector.shape_cast %218 : vector<128x8xf32> to vector<1x128x8xf32>
    tpu.vector_store %arg11[%c1_205, %c0_206, %c56_207], %221 {strides = array<i32>} : memref<2x128x72xf32, #tpu.memory_space<vmem>>, vector<1x128x8xf32>,
    %c0_208 = arith.constant 0 : index
    %c441 = arith.constant 441 : index
    %c0_209 = arith.constant 0 : index
    %222 = vector.load %arg9[%c0_208, %c441, %c0_209] : memref<1x576x8xf32, #tpu.memory_space<vmem>>, vector<1x128x8xf32>
    %223 = vector.shape_cast %222 : vector<1x128x8xf32> to vector<128x8xf32>
    %c1_210 = arith.constant 1 : index
    %c0_211 = arith.constant 0 : index
    %c64_212 = arith.constant 64 : index
    %224 = vector.load %arg11[%c1_210, %c0_211, %c64_212] : memref<2x128x72xf32, #tpu.memory_space<vmem>>, vector<1x128x8xf32>
    %225 = vector.shape_cast %224 : vector<1x128x8xf32> to vector<128x8xf32>
    %226 = vector.shape_cast %223 : vector<128x8xf32> to vector<1x128x8xf32>
    tpu.vector_store %arg11[%c1_210, %c0_211, %c64_212], %226 {strides = array<i32>} : memref<2x128x72xf32, #tpu.memory_space<vmem>>, vector<1x128x8xf32>,
    %c1_213 = arith.constant 1 : index
    %c0_214 = arith.constant 0 : index
    %c0_215 = arith.constant 0 : index
    %227 = vector.load %arg11[%c1_213, %c0_214, %c0_215] : memref<2x128x72xf32, #tpu.memory_space<vmem>>, vector<1x128x72xf32>
    %228 = vector.shape_cast %227 : vector<1x128x72xf32> to vector<128x72xf32>
    %cst_216 = arith.constant dense<0.000000e+00> : vector<128x128xf32>
    %229 = tpu.matmul %228, %0, %cst_216 {dimension_numbers = #tpu.dot_dimension_numbers<[1], [0], [0], [1], [0, 0, 1, 1], [], []>} : vector<128x72xf32>, vector<72x128xf32>, vector<128x128xf32> -> vector<128x128xf32>
    %230 = vector.broadcast %1 : vector<1x128xf32> to vector<128x128xf32>
    %231 = arith.addf %229, %230 : vector<128x128xf32>
    %cst_217 = arith.constant 0.000000e+00 : f32
    %232 = vector.broadcast %cst_217 : f32 to vector<128x128xf32>
    %233 = arith.maximumf %231, %232 : vector<128x128xf32>
    %c3 = arith.constant 3 : index
    %c0_218 = arith.constant 0 : index
    %c0_219 = arith.constant 0 : index
    %234 = vector.load %arg3[%c3, %c0_218, %c0_219] : memref<4x1x128xf32, #tpu.memory_space<vmem>>, vector<1x1x128xf32>
    %235 = vector.shape_cast %234 : vector<1x1x128xf32> to vector<1x128xf32>
    %cst_220 = arith.constant dense<0.000000e+00> : vector<1x128xf32>
    %236 = tpu.matmul %235, %233, %cst_220 {dimension_numbers = #tpu.dot_dimension_numbers<[1], [0], [0], [1], [0, 0, 1, 1], [], []>} : vector<1x128xf32>, vector<128x128xf32>, vector<1x128xf32> -> vector<1x128xf32>
    %237 = arith.addf %181, %236 : vector<1x128xf32>
    %c0_221 = arith.constant 0 : index
    %c0_222 = arith.constant 0 : index
    %238 = vector.load %arg10[%c0_221, %c0_222] : memref<1x128xf32, #tpu.memory_space<vmem>>, vector<1x128xf32>
    tpu.vector_store %arg10[%c0_221, %c0_222], %237 {strides = array<i32>} : memref<1x128xf32, #tpu.memory_space<vmem>>, vector<1x128xf32>,
    %c0_223 = arith.constant 0 : index
    %c0_224 = arith.constant 0 : index
    %239 = vector.load %arg10[%c0_223, %c0_224] : memref<1x128xf32, #tpu.memory_space<vmem>>, vector<1x128xf32>
    %c0_225 = arith.constant 0 : index
    %c0_226 = arith.constant 0 : index
    %240 = vector.load %arg6[%c0_225, %c0_226] : memref<128x128xf32, #tpu.memory_space<vmem>>, vector<128x128xf32>
    %cst_227 = arith.constant dense<0.000000e+00> : vector<1x128xf32>
    %241 = tpu.matmul %239, %240, %cst_227 {dimension_numbers = #tpu.dot_dimension_numbers<[1], [0], [0], [1], [0, 0, 1, 1], [], []>} : vector<1x128xf32>, vector<128x128xf32>, vector<1x128xf32> -> vector<1x128xf32>
    %c0_228 = arith.constant 0 : index
    %c0_229 = arith.constant 0 : index
    %242 = vector.load %arg7[%c0_228, %c0_229] : memref<1x128xf32, #tpu.memory_space<vmem>>, vector<1x128xf32>
    %243 = arith.addf %241, %242 : vector<1x128xf32>
    %c0_230 = arith.constant 0 : index
    %c0_231 = arith.constant 0 : index
    %c0_232 = arith.constant 0 : index
    %244 = vector.load %arg8[%c0_230, %c0_231, %c0_232] : memref<1x1x128xf32, #tpu.memory_space<vmem>>, vector<1x1x128xf32>
    %245 = vector.shape_cast %244 : vector<1x1x128xf32> to vector<1x128xf32>
    %246 = vector.shape_cast %243 : vector<1x128xf32> to vector<1x1x128xf32>
    tpu.vector_store %arg8[%c0_230, %c0_231, %c0_232], %246 {strides = array<i32>} : memref<1x1x128xf32, #tpu.memory_space<vmem>>, vector<1x1x128xf32>,
    return
  }
  func.func @transform_0(%arg0: i32) -> (i32, i32, i32) {
    %c0_i32 = arith.constant 0 : i32
    %c0_i32_0 = arith.constant 0 : i32
    %c0_i32_1 = arith.constant 0 : i32
    return %arg0, %c0_i32, %c0_i32_0 : i32, i32, i32
  }
  func.func @transform_1(%arg0: i32) -> (i32, i32) {
    %c0_i32 = arith.constant 0 : i32
    %c0_i32_0 = arith.constant 0 : i32
    %c0_i32_1 = arith.constant 0 : i32
    return %c0_i32, %c0_i32_0 : i32, i32
  }
  func.func @transform_2(%arg0: i32) -> (i32, i32, i32) {
    %c0_i32 = arith.constant 0 : i32
    %c0_i32_0 = arith.constant 0 : i32
    %c0_i32_1 = arith.constant 0 : i32
    %c0_i32_2 = arith.constant 0 : i32
    return %c0_i32, %c0_i32_0, %c0_i32_1 : i32, i32, i32
  }
  func.func @transform_3(%arg0: i32) -> (i32, i32) {
    %c0_i32 = arith.constant 0 : i32
    %c0_i32_0 = arith.constant 0 : i32
    %c0_i32_1 = arith.constant 0 : i32
    return %c0_i32, %c0_i32_0 : i32, i32
  }
  func.func @transform_4(%arg0: i32) -> (i32, i32) {
    %c0_i32 = arith.constant 0 : i32
    %c0_i32_0 = arith.constant 0 : i32
    %c0_i32_1 = arith.constant 0 : i32
    return %c0_i32, %c0_i32_0 : i32, i32
  }
  func.func @transform_5(%arg0: i32) -> (i32, i32) {
    %c0_i32 = arith.constant 0 : i32
    %c0_i32_0 = arith.constant 0 : i32
    %c0_i32_1 = arith.constant 0 : i32
    return %c0_i32, %c0_i32_0 : i32, i32
  }
  func.func @transform_6(%arg0: i32) -> (i32, i32) {
    %c0_i32 = arith.constant 0 : i32
    %c0_i32_0 = arith.constant 0 : i32
    %c0_i32_1 = arith.constant 0 : i32
    return %c0_i32, %c0_i32_0 : i32, i32
  }
  func.func @transform_7(%arg0: i32) -> (i32, i32, i32) {
    %c0_i32 = arith.constant 0 : i32
    %c0_i32_0 = arith.constant 0 : i32
    %c0_i32_1 = arith.constant 0 : i32
    return %arg0, %c0_i32, %c0_i32_0 : i32, i32, i32
  }
}

</mosaic_0001>

<bundles_post_ra>
// kernel: boosted_model_forward.1
= control target key start
LH: loop header
LB: loop body
LE: loop exit
PB: predicated region body
PF: predicated region fallthrough
CT: control target
= control target key end

     0   :  { %12 = vsyncpa [#allocation6], 0  ;;  %s8878_s0 = inlined_call_operand.vmem [shape: f32[2,576,8], index: 0, kind: input, shape index: {}]   ;;  %s8879_s1 = inlined_call_operand.vmem [shape: f32[576,8], index: 1, kind: input, shape index: {}]   ;;  %s8880_s2 = inlined_call_operand.vmem [shape: f32[4,1,128], index: 2, kind: input, shape index: {}]   ;;  %s8881_s3 = inlined_call_operand.vmem [shape: f32[72,128], index: 3, kind: input, shape index: {}]   ;;  %s8882_s4 = inlined_call_operand.vmem [shape: f32[1,128], index: 4, kind: input, shape index: {}]   ;;  %s8883_s5 = inlined_call_operand.vmem [shape: f32[128,128], index: 5, kind: input, shape index: {}]   ;;  %s8884_s6 = inlined_call_operand.vmem [shape: f32[1,128], index: 6, kind: input, shape index: {}]   ;;  %s8885_s7 = inlined_call_operand.hbm [shape: f32[2,1,128], index: 7, kind: output, shape index: {}]  }
   0x1   :  { %14 = vsyncpa [#allocation6 + $0x1], 0  ;;  %s6246_s24 = smov 0   ;;  %s6248_s25 = smov 0  }
   0x2   :  { %s6250_s26 = smov 0   ;;  %s6252_s27 = smov 0  }
   0x3 LB: > { %s6267_s28 = sadd.s32 4294967295, %s6192_s27   ;;  %s5282_s29 = sadd.s32 4294967294, %s6192_s27   ;;  %s6192_s27 = sphi %s6252_s27, %s8891_s27   ;;  %s6188_s26 = sphi %s6250_s26, %s8890_s26   ;;  %s6184_s25 = sphi %s6248_s25, %s8889_s25   ;;  %s6180_s24 = sphi %s6246_s24, %s8888_s24  }
   0x4   : > { %s6271_s30 = sadd.s32 1, %s6192_s27   ;;  %s179_s8 = sadd.s32 1, %s6188_s26 }
   0x5   : > { %s176_s9 = ssub.s32 %s6192_s27, %s6271_s30  ;;  %p189_p0 = scmp.ne.s32.totalorder %s6188_s26, %s6184_s25 }
   0x6   : > { %p177_p1 = scmp.eq.s32.totalorder %s176_s9, 0  ;;  %p190_p2 = scmp.eq.s32.totalorder %s6267_s28, 1 }
   0x7   : > { %p195_p3 = scmp.ne.s32.totalorder %s6184_s25, %s6180_s24  ;;  %p196_p4 = scmp.eq.s32.totalorder %s5282_s29, 1 }
   0x8   : > { %s6282_s10 = scalar_select %p177_p1, %s6188_s26, %s179_s8  }
   0x9   : > { %p6284_p5 = por %p190_p2, %p189_p0  ;;  %p6288_p6 = por %p196_p4, %p195_p3 }
   0xa   : > { %p5285_p7 = scmp.ge.s32.totalorder %s6192_s27, 1  ;;  %p240_p8 = scmp.lt.s32.totalorder %s6192_s27, 3 }
   0xc   : > { %p241_p9 = pnand %p5285_p7, %p240_p8 }
   0xd   : > { %p271_p10 = scmp.lt.s32.totalorder (!%p241_p9), %s6267_s28, 1  ;;  %v375_v0 = vld [vmem:[%s8879_s1 + $0x88] sm:$0xff] (!%p241_p9)  ;;  %v376_v1 = vld [vmem:[%s8879_s1 + $0x90] sm:$0xff] (!%p241_p9)  ;;  %v377_v2 = vld [vmem:[%s8879_s1 + $0x98] sm:$0xff] (!%p241_p9)  ;;  %vm646_vm0 = vcmask (!%p241_p9), 64512   ;;  %s6194_s21 = smov (!%p241_p9), 16  }
   0xe   : > { %244 = sbr.rel (%p241_p9) target bundleno = 1858 (0x742), region = 48  ;;  %v378_v3 = vld [vmem:[%s8879_s1 + $0xa0] sm:$0xff] (!%p241_p9)  ;;  %v379_v4 = vld [vmem:[%s8879_s1 + $0xa8] sm:$0xff] (!%p241_p9)  ;;  %v380_v5 = vld [vmem:[%s8879_s1 + $0xb0] sm:$0xff] (!%p241_p9)  ;;  %s6195_s22 = smov (!%p241_p9), 8   ;;  %vm831_vm1 = vcmask (!%p241_p9), 130112  }
   0xf   : > { %v381_v6 = vld [vmem:[%s8879_s1 + $0xb8] sm:$0xff] (!%p241_p9)  ;;  %v382_v7 = vld [vmem:[%s8879_s1 + $0xc0] sm:$0xff] (!%p241_p9)  ;;  %v383_v22 = vld [vmem:[%s8879_s1 + $0xc8] sm:$0xff] (!%p241_p9)  ;;  %s6196_s23 = smov (!%p241_p9), 24   ;;  %s6197_s29 = smov (!%p241_p9), 32   ;;  %vm928_vm2 = vcmask (!%p241_p9), 195712  }
  0x10   : > { %v384_v23 = vld [vmem:[%s8879_s1 + $0xd0] sm:$0xff] (!%p241_p9)  ;;  %v385_v24 = vld [vmem:[%s8879_s1 + $0xd8] sm:$0xff] (!%p241_p9)  ;;  %v386_v30 = vld [vmem:[%s8879_s1 + $0xe0] sm:$0xff] (!%p241_p9)  ;;  %s6198_s15 = smov (!%p241_p9), 40   ;;  %s6199_s8 = smov (!%p241_p9), 48   ;;  %vm1025_vm3 = vcmask (!%p241_p9), 261312  }
  0x11   : > { %v387_v31 = vld [vmem:[%s8879_s1 + $0xe8] sm:$0xff] (!%p241_p9)  ;;  %v374_v32 = vld [vmem:[%s8879_s1 + $0x80] sm:$0xff] (!%p241_p9)  ;;  %v388_v55 = vld [vmem:[%s8879_s1 + $0xf0] sm:$0xff] (!%p241_p9)  ;;  %s6200_s16 = smov (!%p241_p9), 56   ;;  %s6201_s17 = smov (!%p241_p9), 64   ;;  %vm1122_vm4 = vcmask (!%p241_p9), 326912  }
  0x12   : > { %vm1219_vm5 = vcmask (!%p241_p9), 392512   ;;  %vm1316_vm6 = vcmask (!%p241_p9), 458112   ;;  %vm1413_vm7 = vcmask (!%p241_p9), 523712   ;;  %vm1510_vm8 = vcmask (!%p241_p9), 589312   ;;  %s5355_s19 = sshll.u32 (!%p241_p9), %s6267_s28, 4 }
  0x13   : > { %vm1549_vm9 = vcmask (!%p241_p9), 588800   ;;  %vm6203_vm10 = vmmov (!%p241_p9), 0  }
  0x15   : > { %s272_s13 = scalar_select %p271_p10, %s6267_s28, 1 }
  0x16   : > { %s6205_s28 = smov [#allocation5]  }
  0x17   : > { %s6075_s14 = smul.u32 576, %s272_s13 }
  0x19   : > { %s6314_s13 = scalar_lea.vmem %s8878_s0, %s6075_s14  ;;  %s269_s14 = sand.u32 1, %s6184_s25  }
  0x1a   : > { %v303_v8 = vld [vmem:[%s6314_s13 + $0x88] sm:$0xff]  ;;  %v304_v9 = vld [vmem:[%s6314_s13 + $0x90] sm:$0xff]  ;;  %v305_v10 = vld [vmem:[%s6314_s13 + $0x98] sm:$0xff] }
  0x1b   : > { %v447_v11 = vadd.f32 %v375_v0, %v303_v8  ;;  %v448_v12 = vadd.f32 %v376_v1, %v304_v9  ;;  %v449_v13 = vadd.f32 %v377_v2, %v305_v10  ;;  %v306_v14 = vld [vmem:[%s6314_s13 + $0xa0] sm:$0xff]  ;;  %v307_v15 = vld [vmem:[%s6314_s13 + $0xa8] sm:$0xff]  ;;  %v308_v16 = vld [vmem:[%s6314_s13 + $0xb0] sm:$0xff] }
  0x1c   : > { %v450_v17 = vadd.f32 %v378_v3, %v306_v14  ;;  %v451_v18 = vadd.f32 %v379_v4, %v307_v15  ;;  %v309_v19 = vld [vmem:[%s6314_s13 + $0xb8] sm:$0xff]  ;;  %v452_v20 = vadd.f32 %v380_v5, %v308_v16  ;;  %v310_v21 = vld [vmem:[%s6314_s13 + $0xc0] sm:$0xff]  ;;  %v311_v29 = vld [vmem:[%s6314_s13 + $0xc8] sm:$0xff] }
  0x1d   : > { %v519_v25 = vmax.f32 %v447_v11, 0.0  ;;  %v520_v26 = vmax.f32 %v448_v12, 0.0  ;;  %v521_v27 = vmax.f32 %v449_v13, 0.0  ;;  %v453_v28 = vadd.f32 %v381_v6, %v309_v19  ;;  %v312_v37 = vld [vmem:[%s6314_s13 + $0xd0] sm:$0xff]  ;;  %v313_v38 = vld [vmem:[%s6314_s13 + $0xd8] sm:$0xff]  ;;  %v314_v39 = vld [vmem:[%s6314_s13 + $0xe0] sm:$0xff] }
  0x1e   : > { %v522_v33 = vmax.f32 %v450_v17, 0.0  ;;  %v523_v34 = vmax.f32 %v451_v18, 0.0  ;;  %v524_v35 = vmax.f32 %v452_v20, 0.0  ;;  %v454_v36 = vadd.f32 %v382_v7, %v310_v21  ;;  %v315_v44 = vld [vmem:[%s6314_s13 + $0xe8] sm:$0xff]  ;;  %v302_v45 = vld [vmem:[%s6314_s13 + $0x80] sm:$0xff]  ;;  %v316_v54 = vld [vmem:[%s6314_s13 + $0xf0] sm:$0xff] }
  0x1f   : > { %v591_v40 = vmin.f32 %v519_v25, 1.0  ;;  %v592_v41 = vmin.f32 %v520_v26, 1.0  ;;  %v593_v42 = vmin.f32 %v521_v27, 1.0  ;;  %v525_v43 = vmax.f32 %v453_v28, 0.0 }
  0x20   : > { %v594_v46 = vmin.f32 %v522_v33, 1.0  ;;  %v595_v47 = vmin.f32 %v523_v34, 1.0  ;;  %v596_v48 = vmin.f32 %v524_v35, 1.0  ;;  %v526_v49 = vmax.f32 %v454_v36, 0.0  ;;  %v389_v34 = vld [vmem:[%s8879_s1 + $0xf8] sm:$0xff] }
  0x21   : > { %664 = vst.msk [vmem:[#allocation2 + $0x88] sm:$0xff] %vm646_vm0, %v591_v40  ;;  %665 = vst.msk [vmem:[#allocation2 + $0x90] sm:$0xff] %vm646_vm0, %v592_v41  ;;  %v597_v50 = vmin.f32 %v525_v43, 1.0  ;;  %v455_v51 = vadd.f32 %v383_v22, %v311_v29  ;;  %v456_v52 = vadd.f32 %v384_v23, %v312_v37  ;;  %v457_v53 = vadd.f32 %v385_v24, %v313_v38  ;;  %v318_v38 = vld [vmem:[%s6314_s13 + $0x100] sm:$0xff] }
  0x22   : > { %666 = vst.msk [vmem:[#allocation2 + $0x98] sm:$0xff] %vm646_vm0, %v593_v42  ;;  %667 = vst.msk [vmem:[#allocation2 + $0xa0] sm:$0xff] %vm646_vm0, %v594_v46  ;;  %v598_v56 = vmin.f32 %v526_v49, 1.0  ;;  %v458_v57 = vadd.f32 %v386_v30, %v314_v39  ;;  %v459_v58 = vadd.f32 %v387_v31, %v315_v44  ;;  %v446_v59 = vadd.f32 %v374_v32, %v302_v45  ;;  %v317_v31 = vld [vmem:[%s6314_s13 + $0xf8] sm:$0xff]  ;;  %v390_v39 = vld [vmem:[%s8879_s1 + $0x100] sm:$0xff] }
  0x23   : > { %668 = vst.msk [vmem:[#allocation2 + $0xa8] sm:$0xff] %vm646_vm0, %v595_v47  ;;  %669 = vst.msk [vmem:[#allocation2 + $0xb0] sm:$0xff] %vm646_vm0, %v596_v48  ;;  %v527_v60 = vmax.f32 %v455_v51, 0.0  ;;  %v528_v61 = vmax.f32 %v456_v52, 0.0  ;;  %v529_v62 = vmax.f32 %v457_v53, 0.0  ;;  %v460_v2 = vadd.f32 %v388_v55, %v316_v54  ;;  %v276_v44 = vld [vmem:[%s8881_s3] sm:$0xff] }
  0x24   : > { %670 = vst.msk [vmem:[#allocation2 + $0xb8] sm:$0xff] %vm646_vm0, %v597_v50  ;;  %671 = vst.msk [vmem:[#allocation2 + $0xc0] sm:$0xff] %vm646_vm0, %v598_v56  ;;  %v530_v63 = vmax.f32 %v458_v57, 0.0  ;;  %v531_v0 = vmax.f32 %v459_v58, 0.0  ;;  %v518_v1 = vmax.f32 %v446_v59, 0.0  ;;  %v461_v35 = vadd.f32 %v389_v34, %v317_v31  ;;  %v277_v45 = vld [vmem:[%s8881_s3 + $0x8] sm:$0xff] }
  0x25   : > { %v599_v3 = vmin.f32 %v527_v60, 1.0  ;;  %v600_v4 = vmin.f32 %v528_v61, 1.0  ;;  %v601_v5 = vmin.f32 %v529_v62, 1.0  ;;  %v532_v9 = vmax.f32 %v460_v2, 0.0  ;;  %v278_v48 = vld [vmem:[%s8881_s3 + $0x10] sm:$0xff]  ;;  %v279_v49 = vld [vmem:[%s8881_s3 + $0x18] sm:$0xff] }
  0x26   : > { %v602_v6 = vmin.f32 %v530_v63, 1.0  ;;  %v603_v7 = vmin.f32 %v531_v0, 1.0  ;;  %v590_v8 = vmin.f32 %v518_v1, 1.0  ;;  %v533_v36 = vmax.f32 %v461_v35, 0.0  ;;  %v280_v53 = vld [vmem:[%s8881_s3 + $0x20] sm:$0xff]  ;;  %v281_v54 = vld [vmem:[%s8881_s3 + $0x28] sm:$0xff] }
  0x27   : > { %672 = vst.msk [vmem:[#allocation2 + $0xc8] sm:$0xff] %vm646_vm0, %v599_v3  ;;  %673 = vst.msk [vmem:[#allocation2 + $0xd0] sm:$0xff] %vm646_vm0, %v600_v4  ;;  %v604_v12 = vmin.f32 %v532_v9, 1.0  ;;  %v462_v41 = vadd.f32 %v390_v39, %v318_v38  ;;  %v6449_v47 = vpack.c.bf16 %v277_v45, %v276_v44  ;;  %v6468_v51 = vpack.c.bf16 %v279_v49, %v278_v48  ;;  %v319_v58 = vld [vmem:[%s6314_s13 + $0x108] sm:$0xff]  ;;  %v282_v60 = vld [vmem:[%s8881_s3 + $0x30] sm:$0xff] }
  0x28   : > { %674 = vst.msk [vmem:[#allocation2 + $0xd8] sm:$0xff] %vm646_vm0, %v601_v5  ;;  %v1889_v10 = vld [vmem:[#allocation2 + $0x89] sm:$0xff]  ;;  %675 = vst.msk [vmem:[#allocation2 + $0xe0] sm:$0xff] %vm646_vm0, %v602_v6  ;;  %v605_v40 = vmin.f32 %v533_v36, 1.0  ;;  %v6489_v56 = vpack.c.bf16 %v281_v54, %v280_v53  ;;  %v283_v61 = vld [vmem:[%s8881_s3 + $0x38] sm:$0xff] }
  0x29   : > { %v1793_v11 = vld [vmem:[#allocation2 + $0x88] sm:$0xff]  ;;  %676 = vst.msk [vmem:[#allocation2 + $0xe8] sm:$0xff] %vm646_vm0, %v603_v7  ;;  %663 = vst.msk [vmem:[#allocation2 + $0x80] sm:$0xff] %vm646_vm0, %v590_v8  ;;  %1921 = vrot.lane.b32.xlu1 %v1889_v10, %s6194_s21  ;;  %v1985_v14 = vld [vmem:[#allocation2 + $0x9f] sm:$0xff]  ;;  %v534_v42 = vmax.f32 %v462_v41, 0.0  ;;  %5903 = vmatprep.subr.bf16.mxu1 %v6449_v47  ;;  %v6511_v63 = vpack.c.bf16 %v283_v61, %v282_v60 }
  0x2a   : > { %1825 = vrot.lane.b32.xlu0 %v1793_v11, %s6195_s22  ;;  %v1986_v13 = vld [vmem:[#allocation2 + $0xa7] sm:$0xff]  ;;  %v1890_v15 = vld [vmem:[#allocation2 + $0x91] sm:$0xff]  ;;  %677 = vst.msk [vmem:[#allocation2 + $0xf0] sm:$0xff] %vm646_vm0, %v604_v12  ;;  %1780 = vst.msk [vmem:[#allocation4 + $0x98] sm:$0xff] %vm646_vm0, %v1985_v14  ;;  %5887 = vmatprep.subr.bf16.mxu0 %v6449_v47 }
  0x2b   : > { %v1794_v16 = vld [vmem:[#allocation2 + $0x90] sm:$0xff]  ;;  %1781 = vst.msk [vmem:[#allocation4 + $0xa0] sm:$0xff] %vm646_vm0, %v1986_v13  ;;  %v6388_v19 = vld [vmem:[#allocation2 + $0xbf] sm:$0xff]  ;;  %v6426_v33 = vld [vmem:[#allocation2 + $0xa8] sm:$0xff]  ;;  %v606_v46 = vmin.f32 %v534_v42, 1.0  ;;  %5905 = vmatpush3.bf16.msra.mxu1 %v6449_v47  ;;  %5889 = vmatpush3.bf16.msra.mxu0 %v6449_v47 }
  0x2c   : > { %v6380_v17 = vld [vmem:[#allocation2 + $0xb7] sm:$0xff]  ;;  %v6382_v18 = vld [vmem:[#allocation2 + $0xaf] sm:$0xff]  ;;  %1784 = vst.msk [vmem:[#allocation4 + $0xb8] sm:$0xff] %vm646_vm0, %v6388_v19  ;;  %v2081_v25 = vld [vmem:[#allocation2 + $0xa0] sm:$0xff]  ;;  %5907 = vmatprep.subr.bf16.mxu1 %v6468_v51  ;;  %5891 = vmatprep.subr.bf16.mxu0 %v6468_v51 }
  0x2d   : > { %1783 = vst.msk [vmem:[#allocation4 + $0xb0] sm:$0xff] %vm646_vm0, %v6380_v17  ;;  %1923 = vrot.lane.b32.xlu1 %v1890_v15, %s6194_s21  ;;  %1782 = vst.msk [vmem:[#allocation4 + $0xa8] sm:$0xff] %vm646_vm0, %v6382_v18  ;;  %v1795_v24 = vld [vmem:[#allocation2 + $0x98] sm:$0xff]  ;;  %v1761_v27 = vld [vmem:[#allocation2 + $0x8f] sm:$0xff] }
  0x2e   : > { %1827 = vrot.lane.b32.xlu0 %v1794_v16, %s6195_s22  ;;  %v6394_v20 = vld [vmem:[#allocation2 + $0xc7] sm:$0xff]  ;;  %v6396_v21 = vld [vmem:[#allocation2 + $0xcf] sm:$0xff]  ;;  %1778 = vst.msk [vmem:[#allocation4 + $0x88] sm:$0xff] %vm646_vm0, %v1761_v27  ;;  %v1762_v29 = vld [vmem:[#allocation2 + $0x97] sm:$0xff] }
  0x2f   : > { %1785 = vst.msk [vmem:[#allocation4 + $0xc0] sm:$0xff] %vm646_vm0, %v6394_v20  ;;  %1786 = vst.msk [vmem:[#allocation4 + $0xc8] sm:$0xff] %vm646_vm0, %v6396_v21  ;;  %v6404_v22 = vld [vmem:[#allocation2 + $0xd7] sm:$0xff]  ;;  %v6406_v23 = vld [vmem:[#allocation2 + $0xdf] sm:$0xff]  ;;  %5909 = vmatpush3.bf16.msra.mxu1 %v6468_v51  ;;  %5893 = vmatpush3.bf16.msra.mxu0 %v6468_v51 }
  0x30   : > { %1787 = vst.msk [vmem:[#allocation4 + $0xd0] sm:$0xff] %vm646_vm0, %v6404_v22  ;;  %1788 = vst.msk [vmem:[#allocation4 + $0xd8] sm:$0xff] %vm646_vm0, %v6406_v23  ;;  %v1760_v26 = vld [vmem:[#allocation2 + $0x87] sm:$0xff]  ;;  %v1891_v37 = vld [vmem:[#allocation2 + $0x99] sm:$0xff]  ;;  %5911 = vmatprep.subr.bf16.mxu1 %v6489_v56  ;;  %5895 = vmatprep.subr.bf16.mxu0 %v6489_v56 }
  0x31   : > { %2019 = vrot.lane.b32.xlu1 %v1986_v13, %s6196_s23  ;;  %v6412_v28 = vld [vmem:[#allocation2 + $0xe7] sm:$0xff]  ;;  %1777 = vst.msk [vmem:[#allocation4 + $0x80] sm:$0xff] %vm646_vm0, %v1760_v26  ;;  %v6416_v30 = vld [vmem:[#allocation2 + $0xef] sm:$0xff]  ;;  %1779 = vst.msk [vmem:[#allocation4 + $0x90] sm:$0xff] %vm646_vm0, %v1762_v29 }
  0x32   : > { %2017 = vrot.lane.b32.xlu0 %v1985_v14, %s6196_s23  ;;  %1789 = vst.msk [vmem:[#allocation4 + $0xe0] sm:$0xff] %vm646_vm0, %v6412_v28  ;;  %1790 = vst.msk [vmem:[#allocation4 + $0xe8] sm:$0xff] %vm646_vm0, %v6416_v30  ;;  %v2177_v32 = vld [vmem:[#allocation2 + $0xa1] sm:$0xff]  ;;  %v6441_v43 = vld [vmem:[#allocation2 + $0xa9] sm:$0xff] }
  0x33   : > { %678 = vst.msk [vmem:[#allocation2 + $0xf8] sm:$0xff] %vm646_vm0, %v605_v40  ;;  %679 = vst.msk [vmem:[#allocation2 + $0x100] sm:$0xff] %vm646_vm0, %v606_v46  ;;  %v6475_v52 = vld [vmem:[#allocation2 + $0xb8] sm:$0xff]  ;;  %v2083_v57 = vld [vmem:[#allocation2 + $0xb0] sm:$0xff]  ;;  %5913 = vmatpush3.bf16.msra.mxu1 %v6489_v56  ;;  %5897 = vmatpush3.bf16.msra.mxu0 %v6489_v56 }
  0x34   : > { %v391_v59 = vld [vmem:[%s8879_s1 + $0x108] sm:$0xff]  ;;  %v2465_v1 = vld [vmem:[#allocation2 + $0xb9] sm:$0xff]  ;;  %5915 = vmatprep.subr.bf16.mxu1 %v6511_v63  ;;  %5899 = vmatprep.subr.bf16.mxu0 %v6511_v63  ;;  %v2179_v6 = vld [vmem:[#allocation2 + $0xb1] sm:$0xff] }
  0x35   : > { %1829 = vrot.lane.b32.xlu1 %v1795_v24, %s6195_s22  ;;  %v463_v62 = vadd.f32 %v391_v59, %v319_v58  ;;  %v2370_v2 = vld [vmem:[#allocation2 + $0xc0] sm:$0xff]  ;;  %v320_v7 = vld [vmem:[%s6314_s13 + $0x110] sm:$0xff]  ;;  %v2371_v12 = vld [vmem:[#allocation2 + $0xc8] sm:$0xff] }
  0x36   : > { %2113 = vrot.lane.b32.xlu0 %v2081_v25, %s6197_s29  ;;  %v284_v4 = vld [vmem:[%s8881_s3 + $0x40] sm:$0xff]  ;;  %v392_v8 = vld [vmem:[%s8879_s1 + $0x110] sm:$0xff]  ;;  %v321_v13 = vld [vmem:[%s6314_s13 + $0x118] sm:$0xff] }
  0x37   : > { %v535_v0 = vmax.f32 %v463_v62, 0.0  ;;  %5917 = vmatpush3.bf16.msra.mxu1 %v6511_v63  ;;  %5901 = vmatpush3.bf16.msra.mxu0 %v6511_v63  ;;  %v2466_v5 = vld [vmem:[#allocation2 + $0xc1] sm:$0xff]  ;;  %v464_v9 = vadd.f32 %v392_v8, %v320_v7  ;;  %v393_v14 = vld [vmem:[%s8879_s1 + $0x118] sm:$0xff]  ;;  %v396_v38 = vld [vmem:[%s8879_s1 + $0x130] sm:$0xff] }
  0x38   : > { %5601 = vmatprep.subr.mxu1 %v284_v4  ;;  %5559 = vmatprep.subr.mxu0 %v284_v4  ;;  %v465_v15 = vadd.f32 %v393_v14, %v321_v13  ;;  %v322_v24 = vld [vmem:[%s6314_s13 + $0x120] sm:$0xff]  ;;  %v6587_v31 = vld [vmem:[#allocation2 + $0xd8] sm:$0xff]  ;;  %v288_v48 = vld [vmem:[%s6314_s13 + $0x10] sm:$0xff] }
  0x39   : > { %2209 = vrot.lane.b32.xlu1 %v2177_v32, %s6198_s15  ;;  %v607_v3 = vmin.f32 %v535_v0, 1.0  ;;  %v536_v10 = vmax.f32 %v464_v9, 0.0  ;;  %v6603_v36 = vld [vmem:[#allocation2 + $0xe0] sm:$0xff]  ;;  %v397_v44 = vld [vmem:[%s8879_s1 + $0x138] sm:$0xff]  ;;  %v360_v49 = vld [vmem:[%s8879_s1 + $0x10] sm:$0xff] }
  0x3a   : > { %2115 = vrot.lane.b32.xlu0 %v6426_v33, %s6197_s29  ;;  %v6466_v50 = vld [vmem:[#allocation2 + $0xf7] sm:$0xff]  ;;  %v6487_v55 = vld [vmem:[#allocation2 + $0xff] sm:$0xff]  ;;  %v537_v16 = vmax.f32 %v465_v15, 0.0  ;;  %v432_v58 = vadd.f32 %v360_v49, %v288_v48  ;;  %v359_v59 = vld [vmem:[%s8879_s1 + $0x8] sm:$0xff] }
  0x3b   : > { %1791 = vst.msk [vmem:[#allocation4 + $0xf0] sm:$0xff] %vm646_vm0, %v6466_v50  ;;  %1792 = vst.msk [vmem:[#allocation4 + $0xf8] sm:$0xff] %vm646_vm0, %v6487_v55  ;;  %5602 = vmatpush3.msra.mxu1 %v284_v4  ;;  %5560 = vmatpush3.msra.mxu0 %v284_v4  ;;  %v608_v11 = vmin.f32 %v536_v10, 1.0  ;;  %v6618_v42 = vld [vmem:[#allocation2 + $0xe1] sm:$0xff]  ;;  %v289_v0 = vld [vmem:[%s6314_s13 + $0x18] sm:$0xff] }
  0x3c   : > { %680 = vst.msk [vmem:[#allocation2 + $0x108] sm:$0xff] %vm646_vm0, %v607_v3  ;;  %v504_v61 = vmax.f32 %v432_v58, 0.0  ;;  %v290_v8 = vld [vmem:[%s6314_s13 + $0x20] sm:$0xff]  ;;  %v291_v9 = vld [vmem:[%s6314_s13 + $0x28] sm:$0xff] }
  0x3d   : > { %1925 = vrot.lane.b32.xlu1 %v1891_v37, %s6194_s21  ;;  %681 = vst.msk [vmem:[#allocation2 + $0x110] sm:$0xff] %vm646_vm0, %v608_v11  ;;  %v324_v37 = vld [vmem:[%s6314_s13 + $0x130] sm:$0xff]  ;;  %v362_v10 = vld [vmem:[%s8879_s1 + $0x20] sm:$0xff]  ;;  %v363_v14 = vld [vmem:[%s8879_s1 + $0x28] sm:$0xff] }
  0x3e   : > { %1831 = vrot.lane.b32.xlu0 %v2081_v25, %s6195_s22  ;;  %v394_v25 = vld [vmem:[%s8879_s1 + $0x120] sm:$0xff]  ;;  %v468_v40 = vadd.f32 %v396_v38, %v324_v37  ;;  %v576_v4 = vmin.f32 %v504_v61, 1.0  ;;  %v434_v15 = vadd.f32 %v362_v10, %v290_v8  ;;  %v292_v37 = vld [vmem:[%s6314_s13 + $0x30] sm:$0xff]  ;;  %v293_v38 = vld [vmem:[%s6314_s13 + $0x38] sm:$0xff] }
  0x3f   : > { %v466_v26 = vadd.f32 %v394_v25, %v322_v24 }
  0x40   : > { %649 = vst.msk [vmem:[#allocation2 + $0x10] sm:$0xff] %vm646_vm0, %v576_v4  ;;  %v6759_v4 = vld [vmem:[#allocation2 + $0xf8] sm:$0xff] }
  0x41   : > { %2305 = vrot.lane.b32.xlu1 %v6380_v17, %s6199_s8  ;;  %v538_v27 = vmax.f32 %v466_v26, 0.0 }
  0x42   : > { %2211 = vrot.lane.b32.xlu0 %v6441_v43, %s6198_s15 }
  0x43   : > { %v610_v29 = vmin.f32 %v538_v27, 1.0 }
  0x45   : > { %2021 = vrot.lane.b32.xlu1 %v6382_v18, %s6196_s23  ;;  %v6558_v18 = vld [vmem:[#allocation2 + $0xd0] sm:$0xff]  ;;  %683 = vst.msk [vmem:[#allocation2 + $0x120] sm:$0xff] %vm646_vm0, %v610_v29 }
  0x46   : > { %1927 = vrot.lane.b32.xlu0 %v2177_v32, %s6194_s21  ;;  %v323_v32 = vld [vmem:[%s6314_s13 + $0x128] sm:$0xff] }
  0x47   : > { %v6686_v29 = vld [vmem:[#allocation2 + $0xe9] sm:$0xff] }
  0x49   : > { %2401 = vrot.lane.b32.xlu1 %v6475_v52, %s6200_s16 }
  0x4a   : > { %2307 = vrot.lane.b32.xlu0 %v6388_v19, %s6199_s8 }
  0x4d   : > { %2117 = vrot.lane.b32.xlu1 %v2083_v57, %s6197_s29 }
  0x4e   : > { %2023 = vrot.lane.b32.xlu0 %v6380_v17, %s6196_s23  ;;  %v6556_v17 = vld [vmem:[#allocation2 + $0xc9] sm:$0xff] }
  0x51   : > { %2497 = vrot.lane.b32.xlu1 %v2465_v1, %s6201_s17 }
  0x52   : > { %2403 = vrot.lane.b32.xlu0 %v2370_v2, %s6200_s16 }
  0x55   : > { %2119 = vrot.lane.b32.xlu1 %v6475_v52, %s6197_s29 }
  0x56   : > { %1833 = vrot.lane.b32.xlu0 %v6426_v33, %s6195_s22  ;;  %v395_v33 = vld [vmem:[%s8879_s1 + $0x128] sm:$0xff] }
  0x57   : > { %v467_v34 = vadd.f32 %v395_v33, %v323_v32  ;;  %v6688_v32 = vld [vmem:[#allocation2 + $0xf0] sm:$0xff] }
  0x59   : > { %2499 = vrot.lane.b32.xlu1 %v2466_v5, %s6201_s17  ;;  %v539_v35 = vmax.f32 %v467_v34, 0.0 }
  0x5a   : > { %2213 = vrot.lane.b32.xlu0 %v2179_v6, %s6198_s15 }
  0x5b   : > { %v611_v39 = vmin.f32 %v539_v35, 1.0 }
  0x5d   : > { %1929 = vrot.lane.b32.xlu1 %v6441_v43, %s6194_s21  ;;  %684 = vst.msk [vmem:[#allocation2 + $0x128] sm:$0xff] %vm646_vm0, %v611_v39  ;;  %v325_v43 = vld [vmem:[%s6314_s13 + $0x138] sm:$0xff]  ;;  %v364_v39 = vld [vmem:[%s8879_s1 + $0x30] sm:$0xff] }
  0x5e   : > { %1835 = vrot.lane.b32.xlu0 %v2083_v57, %s6195_s22  ;;  %v469_v45 = vadd.f32 %v397_v44, %v325_v43  ;;  %v436_v43 = vadd.f32 %v364_v39, %v292_v37 }
  0x60   : > { %v541_v46 = vmax.f32 %v469_v45, 0.0  ;;  %v508_v45 = vmax.f32 %v436_v43, 0.0  ;;  %v2379_v43 = vld [vmem:[#allocation2 + $0x108] sm:$0xff] }
  0x61   : > { %2309 = vrot.lane.b32.xlu1 %v6394_v20, %s6199_s8 }
  0x62   : > { %2215 = vrot.lane.b32.xlu0 %v2465_v1, %s6198_s15  ;;  %v613_v57 = vmin.f32 %v541_v46, 1.0  ;;  %v6718_v46 = vld [vmem:[#allocation2 + $0xf1] sm:$0xff] }
  0x64   : > { %686 = vst.msk [vmem:[#allocation2 + $0x138] sm:$0xff] %vm646_vm0, %v613_v57  ;;  %v366_v57 = vld [vmem:[%s8879_s1 + $0x40] sm:$0xff] }
  0x65   : > { %2025 = vrot.lane.b32.xlu1 %v6388_v19, %s6196_s23  ;;  %v609_v19 = vmin.f32 %v537_v16, 1.0  ;;  %v435_v16 = vadd.f32 %v363_v14, %v291_v9  ;;  %v6784_v14 = vld [vmem:[#allocation2 + $0x100] sm:$0xff] }
  0x66   : > { %1931 = vrot.lane.b32.xlu0 %v2179_v6, %s6194_s21 }
  0x67   : > { %682 = vst.msk [vmem:[#allocation2 + $0x118] sm:$0xff] %vm646_vm0, %v609_v19  ;;  %v507_v19 = vmax.f32 %v435_v16, 0.0 }
  0x69   : > { %2405 = vrot.lane.b32.xlu1 %v2371_v12, %s6200_s16  ;;  %v579_v27 = vmin.f32 %v507_v19, 1.0 }
  0x6a   : > { %2311 = vrot.lane.b32.xlu0 %v6396_v21, %s6199_s8 }
  0x6b   : > { %652 = vst.msk [vmem:[#allocation2 + $0x28] sm:$0xff] %vm646_vm0, %v579_v27 }
  0x6d   : > { %2121 = vrot.lane.b32.xlu1 %v2370_v2, %s6197_s29 }
  0x6e   : > { %2027 = vrot.lane.b32.xlu0 %v6394_v20, %s6196_s23  ;;  %v6568_v20 = vld [vmem:[#allocation2 + $0xd1] sm:$0xff] }
  0x71   : > { %2501 = vrot.lane.b32.xlu1 %v6556_v17, %s6201_s17 }
  0x72   : > { %2407 = vrot.lane.b32.xlu0 %v6558_v18, %s6200_s16 }
  0x75   : > { %2123 = vrot.lane.b32.xlu1 %v2371_v12, %s6197_s29 }
  0x76   : > { %1837 = vrot.lane.b32.xlu0 %v6475_v52, %s6195_s22  ;;  %v287_v52 = vld [vmem:[%s6314_s13 + $0x8] sm:$0xff] }
  0x77   : > { %v431_v60 = vadd.f32 %v359_v59, %v287_v52 }
  0x79   : > { %2503 = vrot.lane.b32.xlu1 %v6568_v20, %s6201_s17  ;;  %v503_v62 = vmax.f32 %v431_v60, 0.0 }
  0x7a   : > { %2217 = vrot.lane.b32.xlu0 %v2466_v5, %s6198_s15 }
  0x7b   : > { %v575_v6 = vmin.f32 %v503_v62, 1.0 }
  0x7d   : > { %1933 = vrot.lane.b32.xlu1 %v2465_v1, %s6194_s21  ;;  %v361_v1 = vld [vmem:[%s8879_s1 + $0x18] sm:$0xff]  ;;  %648 = vst.msk [vmem:[#allocation2 + $0x8] sm:$0xff] %vm646_vm0, %v575_v6 }
  0x7e   : > { %1839 = vrot.lane.b32.xlu0 %v2370_v2, %s6195_s22 }
  0x81   : > { %2313 = vrot.lane.b32.xlu1 %v6404_v22, %s6199_s8 }
  0x82   : > { %2219 = vrot.lane.b32.xlu0 %v6556_v17, %s6198_s15 }
  0x85   : > { %2029 = vrot.lane.b32.xlu1 %v6396_v21, %s6196_s23  ;;  %v6601_v21 = vld [vmem:[#allocation2 + $0xd9] sm:$0xff] }
  0x86   : > { %1935 = vrot.lane.b32.xlu0 %v2466_v5, %s6194_s21  ;;  %v433_v5 = vadd.f32 %v361_v1, %v289_v0 }
  0x88   : > { %v505_v7 = vmax.f32 %v433_v5, 0.0 }
  0x89   : > { %2409 = vrot.lane.b32.xlu1 %v6587_v31, %s6200_s16 }
  0x8a   : > { %2315 = vrot.lane.b32.xlu0 %v6406_v23, %s6199_s8  ;;  %v577_v13 = vmin.f32 %v505_v7, 1.0 }
  0x8c   : > { %650 = vst.msk [vmem:[#allocation2 + $0x18] sm:$0xff] %vm646_vm0, %v577_v13  ;;  %v6782_v13 = vld [vmem:[#allocation2 + $0xf9] sm:$0xff] }
  0x8d   : > { %2125 = vrot.lane.b32.xlu1 %v6558_v18, %s6197_s29 }
  0x8e   : > { %2031 = vrot.lane.b32.xlu0 %v6404_v22, %s6196_s23  ;;  %v540_v22 = vmax.f32 %v468_v40, 0.0 }
  0x90   : > { %v612_v41 = vmin.f32 %v540_v22, 1.0 }
  0x91   : > { %2505 = vrot.lane.b32.xlu1 %v6601_v21, %s6201_s17 }
  0x92   : > { %2411 = vrot.lane.b32.xlu0 %v6603_v36, %s6200_s16  ;;  %685 = vst.msk [vmem:[#allocation2 + $0x130] sm:$0xff] %vm646_vm0, %v612_v41  ;;  %v365_v41 = vld [vmem:[%s8879_s1 + $0x38] sm:$0xff] }
  0x93   : > { %v437_v44 = vadd.f32 %v365_v41, %v293_v38  ;;  %v2283_v38 = vld [vmem:[#allocation2 + $0x107] sm:$0xff] }
  0x95   : > { %2127 = vrot.lane.b32.xlu1 %v6587_v31, %s6197_s29  ;;  %v509_v48 = vmax.f32 %v437_v44, 0.0  ;;  %v6834_v44 = vld [vmem:[#allocation2 + $0x10f] sm:$0xff] }
  0x96   : > { %1841 = vrot.lane.b32.xlu0 %v2371_v12, %s6195_s22 }
  0x99   : > { %2507 = vrot.lane.b32.xlu1 %v6618_v42, %s6201_s17 }
  0x9a   : > { %2221 = vrot.lane.b32.xlu0 %v6568_v20, %s6198_s15 }
  0x9b   : > { %v1922_v53 = vpop.permute.xlu1 %1921 }
  0x9c   : > { %v1826_v54 = vpop.permute.xlu0 %1825 }
  0x9d   : > { %1873 = vst.msk [vmem:[#allocation4 + $0x80] sm:$0xff] %vm831_vm1, %v1826_v54  ;;  %1937 = vrot.lane.b32.xlu1 %v6556_v17, %s6194_s21  ;;  %v506_v17 = vmax.f32 %v434_v15, 0.0  ;;  %v581_v54 = vmin.f32 %v509_v48, 1.0 }
  0x9e   : > { %1843 = vrot.lane.b32.xlu0 %v6558_v18, %s6195_s22  ;;  %1969 = vst.msk [vmem:[#allocation4 + $0x80] sm:$0xff] %vm928_vm2, %v1922_v53  ;;  %v6670_v18 = vld [vmem:[#allocation2 + $0xe8] sm:$0xff]  ;;  %v580_v53 = vmin.f32 %v508_v45, 1.0 }
  0x9f   : > { %v1924_v2 = vpop.permute.xlu1 %1923  ;;  %v578_v26 = vmin.f32 %v506_v17, 1.0  ;;  %654 = vst.msk [vmem:[#allocation2 + $0x38] sm:$0xff] %vm646_vm0, %v581_v54 }
  0xa0   : > { %v1828_v3 = vpop.permute.xlu0 %1827  ;;  %653 = vst.msk [vmem:[#allocation2 + $0x30] sm:$0xff] %vm646_vm0, %v580_v53 }
  0xa1   : > { %1874 = vst.msk [vmem:[#allocation4 + $0x88] sm:$0xff] %vm831_vm1, %v1828_v3  ;;  %2317 = vrot.lane.b32.xlu1 %v6412_v28, %s6199_s8 }
  0xa2   : > { %2223 = vrot.lane.b32.xlu0 %v6601_v21, %s6198_s15  ;;  %1970 = vst.msk [vmem:[#allocation4 + $0x88] sm:$0xff] %vm928_vm2, %v1924_v2 }
  0xa3   : > { %v2020_v11 = vpop.permute.xlu1 %2019  ;;  %651 = vst.msk [vmem:[#allocation2 + $0x20] sm:$0xff] %vm646_vm0, %v578_v26 }
  0xa4   : > { %v2018_v12 = vpop.permute.xlu0 %2017  ;;  %2066 = vst.msk [vmem:[#allocation4 + $0x88] sm:$0xff] %vm1025_vm3, %v2020_v11 }
  0xa5   : > { %2065 = vst.msk [vmem:[#allocation4 + $0x80] sm:$0xff] %vm1025_vm3, %v2018_v12  ;;  %2033 = vrot.lane.b32.xlu1 %v6406_v23, %s6196_s23 }
  0xa6   : > { %1939 = vrot.lane.b32.xlu0 %v6568_v20, %s6194_s21 }
  0xa7   : > { %v1830_v24 = vpop.permute.xlu1 %1829  ;;  %v6744_v2 = vld [vmem:[#allocation2 + $0x37] sm:$0xff]  ;;  %v6751_v3 = vld [vmem:[#allocation2 + $0x2f] sm:$0xff] }
  0xa8   : > { %v2114_v25 = vpop.permute.xlu0 %2113  ;;  %1875 = vst.msk [vmem:[#allocation4 + $0x90] sm:$0xff] %vm831_vm1, %v1830_v24 }
  0xa9   : > { %2161 = vst.msk [vmem:[#allocation4 + $0x80] sm:$0xff] %vm1122_vm4, %v2114_v25  ;;  %2413 = vrot.lane.b32.xlu1 %v6670_v18, %s6200_s16  ;;  %v6800_v25 = vld [vmem:[#allocation2 + $0x101] sm:$0xff] }
  0xaa   : > { %2319 = vrot.lane.b32.xlu0 %v6416_v30, %s6199_s8  ;;  %v6692_v35 = vld [vmem:[#allocation2 + $0x1f] sm:$0xff]  ;;  %741 = vst.msk [vmem:[#allocation4 + $0x30] sm:$0xff] %vm646_vm0, %v6744_v2  ;;  %740 = vst.msk [vmem:[#allocation4 + $0x28] sm:$0xff] %vm646_vm0, %v6751_v3 }
  0xab   : > { %v2210_v23 = vpop.permute.xlu1 %2209  ;;  %738 = vst.msk [vmem:[#allocation4 + $0x18] sm:$0xff] %vm646_vm0, %v6692_v35 }
  0xac   : > { %v2116_v20 = vpop.permute.xlu0 %2115  ;;  %2257 = vst.msk [vmem:[#allocation4 + $0x80] sm:$0xff] %vm1219_vm5, %v2210_v23  ;;  %v296_v23 = vld [vmem:[%s6314_s13 + $0x50] sm:$0xff] }
  0xad   : > { %2162 = vst.msk [vmem:[#allocation4 + $0x88] sm:$0xff] %vm1122_vm4, %v2116_v20  ;;  %2129 = vrot.lane.b32.xlu1 %v6603_v36, %s6197_s29  ;;  %v368_v20 = vld [vmem:[%s8879_s1 + $0x50] sm:$0xff] }
  0xae   : > { %2035 = vrot.lane.b32.xlu0 %v6412_v28, %s6196_s23  ;;  %v6698_v28 = vld [vmem:[#allocation2 + $0x27] sm:$0xff] }
  0xaf   : > { %v1926_v33 = vpop.permute.xlu1 %1925  ;;  %739 = vst.msk [vmem:[#allocation4 + $0x20] sm:$0xff] %vm646_vm0, %v6698_v28 }
  0xb0   : > { %v1832_v34 = vpop.permute.xlu0 %1831  ;;  %1971 = vst.msk [vmem:[#allocation4 + $0x90] sm:$0xff] %vm928_vm2, %v1926_v33 }
  0xb1   : > { %1876 = vst.msk [vmem:[#allocation4 + $0x98] sm:$0xff] %vm831_vm1, %v1832_v34  ;;  %2509 = vrot.lane.b32.xlu1 %v6686_v29, %s6201_s17  ;;  %v440_v34 = vadd.f32 %v368_v20, %v296_v23  ;;  %v299_v23 = vld [vmem:[%s6314_s13 + $0x68] sm:$0xff] }
  0xb2   : > { %2415 = vrot.lane.b32.xlu0 %v6688_v32, %s6200_s16 }
  0xb3   : > { %v2306_v40 = vpop.permute.xlu1 %2305  ;;  %v512_v37 = vmax.f32 %v440_v34, 0.0 }
  0xb4   : > { %v2212_v22 = vpop.permute.xlu0 %2211  ;;  %2353 = vst.msk [vmem:[#allocation4 + $0x80] sm:$0xff] %vm1316_vm6, %v2306_v40 }
  0xb5   : > { %2258 = vst.msk [vmem:[#allocation4 + $0x88] sm:$0xff] %vm1219_vm5, %v2212_v22  ;;  %2131 = vrot.lane.b32.xlu1 %v6670_v18, %s6197_s29  ;;  %v584_v22 = vmin.f32 %v512_v37, 1.0  ;;  %v358_v37 = vld [vmem:[%s8879_s1] sm:$0xff] }
  0xb6   : > { %1845 = vrot.lane.b32.xlu0 %v6587_v31, %s6195_s22  ;;  %v294_v31 = vld [vmem:[%s6314_s13 + $0x40] sm:$0xff] }
  0xb7   : > { %v2022_v49 = vpop.permute.xlu1 %2021  ;;  %v438_v60 = vadd.f32 %v366_v57, %v294_v31  ;;  %657 = vst.msk [vmem:[#allocation2 + $0x50] sm:$0xff] %vm646_vm0, %v584_v22  ;;  %v2477_v22 = vld [vmem:[#allocation2 + $0x119] sm:$0xff] }
  0xb8   : > { %v1928_v52 = vpop.permute.xlu0 %1927  ;;  %2067 = vst.msk [vmem:[#allocation4 + $0x90] sm:$0xff] %vm1025_vm3, %v2022_v49 }
  0xb9   : > { %1972 = vst.msk [vmem:[#allocation4 + $0x98] sm:$0xff] %vm928_vm2, %v1928_v52  ;;  %2511 = vrot.lane.b32.xlu1 %v6718_v46, %s6201_s17  ;;  %v510_v61 = vmax.f32 %v438_v60, 0.0 }
  0xba   : > { %2225 = vrot.lane.b32.xlu0 %v6618_v42, %s6198_s15 }
  0xbb   : > { %v2402_v58 = vpop.permute.xlu1 %2401  ;;  %v582_v1 = vmin.f32 %v510_v61, 1.0 }
  0xbc   : > { %v2308_v59 = vpop.permute.xlu0 %2307  ;;  %2449 = vst.msk [vmem:[#allocation4 + $0x80] sm:$0xff] %vm1413_vm7, %v2402_v58  ;;  %v2475_v58 = vld [vmem:[#allocation2 + $0x109] sm:$0xff] }
  0xbd   : > { %2354 = vst.msk [vmem:[#allocation4 + $0x88] sm:$0xff] %vm1316_vm6, %v2308_v59  ;;  %1941 = vrot.lane.b32.xlu1 %v6601_v21, %s6194_s21  ;;  %v6855_v59 = vld [vmem:[#allocation2 + $0x110] sm:$0xff] }
  0xbe   : > { %1847 = vrot.lane.b32.xlu0 %v6603_v36, %s6195_s22  ;;  %655 = vst.msk [vmem:[#allocation2 + $0x40] sm:$0xff] %vm646_vm0, %v582_v1 }
  0xbf   : > { %v2118_v62 = vpop.permute.xlu1 %2117 }
  0xc0   : > { %v2024_v0 = vpop.permute.xlu0 %2023  ;;  %2163 = vst.msk [vmem:[#allocation4 + $0x90] sm:$0xff] %vm1122_vm4, %v2118_v62 }
  0xc1   : > { %2068 = vst.msk [vmem:[#allocation4 + $0x98] sm:$0xff] %vm1025_vm3, %v2024_v0  ;;  %2321 = vrot.lane.b32.xlu1 %v6466_v50, %s6199_s8 }
  0xc2   : > { %2227 = vrot.lane.b32.xlu0 %v6686_v29, %s6198_s15 }
  0xc3   : > { %v2498_v21 = vpop.permute.xlu1 %2497 }
  0xc4   : > { %v2404_v36 = vpop.permute.xlu0 %2403  ;;  %2545 = vst.msk [vmem:[#allocation4 + $0x80] sm:$0xff] %vm1510_vm8, %v2498_v21 }
  0xc5   : > { %2450 = vst.msk [vmem:[#allocation4 + $0x88] sm:$0xff] %vm1413_vm7, %v2404_v36  ;;  %2037 = vrot.lane.b32.xlu1 %v6416_v30, %s6196_s23  ;;  %v6763_v7 = vld [vmem:[#allocation2 + $0x3f] sm:$0xff]  ;;  %v295_v30 = vld [vmem:[%s6314_s13 + $0x48] sm:$0xff]  ;;  %v6869_v36 = vld [vmem:[#allocation2 + $0x111] sm:$0xff] }
  0xc6   : > { %1943 = vrot.lane.b32.xlu0 %v6618_v42, %s6194_s21  ;;  %742 = vst.msk [vmem:[#allocation4 + $0x38] sm:$0xff] %vm646_vm0, %v6763_v7  ;;  %v367_v42 = vld [vmem:[%s8879_s1 + $0x48] sm:$0xff] }
  0xc7   : > { %v2120_v5 = vpop.permute.xlu1 %2119  ;;  %v439_v11 = vadd.f32 %v367_v42, %v295_v30  ;;  %v298_v30 = vld [vmem:[%s6314_s13 + $0x60] sm:$0xff] }
  0xc8   : > { %v1834_v6 = vpop.permute.xlu0 %1833  ;;  %2164 = vst.msk [vmem:[#allocation4 + $0x98] sm:$0xff] %vm1122_vm4, %v2120_v5  ;;  %v370_v42 = vld [vmem:[%s8879_s1 + $0x60] sm:$0xff] }
  0xc9   : > { %1877 = vst.msk [vmem:[#allocation4 + $0xa0] sm:$0xff] %vm831_vm1, %v1834_v6  ;;  %2417 = vrot.lane.b32.xlu1 %v6759_v4, %s6200_s16  ;;  %v511_v12 = vmax.f32 %v439_v11, 0.0  ;;  %v2285_v11 = vld [vmem:[#allocation2 + $0x117] sm:$0xff] }
  0xca   : > { %2323 = vrot.lane.b32.xlu0 %v6487_v55, %s6199_s8 }
  0xcb   : > { %v2500_v8 = vpop.permute.xlu1 %2499  ;;  %v2561_v10 = vld [vmem:[#allocation4 + $0x80] sm:$0xff]  ;;  %v583_v17 = vmin.f32 %v511_v12, 1.0 }
  0xcc   : > { %v2214_v9 = vpop.permute.xlu0 %2213  ;;  %2546 = vst.msk [vmem:[#allocation4 + $0x88] sm:$0xff] %vm1510_vm8, %v2500_v8  ;;  %5603 = vmatprep.mubr.msk.f32.mxu1 %vm1549_vm9, %v2561_v10 }
  0xcd   : > { %2259 = vst.msk [vmem:[#allocation4 + $0x90] sm:$0xff] %vm1219_vm5, %v2214_v9  ;;  %2133 = vrot.lane.b32.xlu1 %v6688_v32, %s6197_s29  ;;  %v442_v9 = vadd.f32 %v370_v42, %v298_v30 }
  0xce   : > { %2039 = vrot.lane.b32.xlu0 %v6466_v50, %s6196_s23  ;;  %656 = vst.msk [vmem:[#allocation2 + $0x48] sm:$0xff] %vm646_vm0, %v583_v17 }
  0xcf   : > { %v1930_v15 = vpop.permute.xlu1 %1929  ;;  %v514_v10 = vmax.f32 %v442_v9, 0.0  ;;  %v2480_v9 = vld [vmem:[#allocation2 + $0x131] sm:$0xff] }
  0xd0   : > { %v1836_v16 = vpop.permute.xlu0 %1835  ;;  %1973 = vst.msk [vmem:[#allocation4 + $0xa0] sm:$0xff] %vm928_vm2, %v1930_v15 }
  0xd1   : > { %1878 = vst.msk [vmem:[#allocation4 + $0xa8] sm:$0xff] %vm831_vm1, %v1836_v16  ;;  %2513 = vrot.lane.b32.xlu1 %v6782_v13, %s6201_s17  ;;  %v586_v16 = vmin.f32 %v514_v10, 1.0  ;;  %v2479_v10 = vld [vmem:[#allocation2 + $0x129] sm:$0xff] }
  0xd2   : > { %2419 = vrot.lane.b32.xlu0 %v6784_v14, %s6200_s16 }
  0xd3   : > { %v2310_v50 = vpop.permute.xlu1 %2309  ;;  %v2562_v24 = vld [vmem:[#allocation4 + $0x88] sm:$0xff]  ;;  %659 = vst.msk [vmem:[#allocation2 + $0x60] sm:$0xff] %vm646_vm0, %v586_v16 }
  0xd4   : > { %v2216_v19 = vpop.permute.xlu0 %2215  ;;  %2355 = vst.msk [vmem:[#allocation4 + $0x90] sm:$0xff] %vm1316_vm6, %v2310_v50  ;;  %5604 = vmatmul.mubr.msk.f32.vlgmr.msra.gmra.mrb[0].mxu1 %vm1549_vm9, %v2562_v24  ;;  %v2381_v50 = vld [vmem:[#allocation2 + $0x118] sm:$0xff]  ;;  %v751_v16 = vld [vmem:[#allocation2 + $0x8] sm:$0xff] }
  0xd5   : > { %2260 = vst.msk [vmem:[#allocation4 + $0x98] sm:$0xff] %vm1219_vm5, %v2216_v19  ;;  %2135 = vrot.lane.b32.xlu1 %v6759_v4, %s6197_s29  ;;  %v6820_v41 = vld [vmem:[#allocation2 + $0x47] sm:$0xff]  ;;  %v6838_v49 = vld [vmem:[#allocation2 + $0x4f] sm:$0xff]  ;;  %v2286_v19 = vld [vmem:[#allocation2 + $0x11f] sm:$0xff] }
  0xd6   : > { %1849 = vrot.lane.b32.xlu0 %v6670_v18, %s6195_s22  ;;  %743 = vst.msk [vmem:[#allocation4 + $0x40] sm:$0xff] %vm646_vm0, %v6820_v41  ;;  %744 = vst.msk [vmem:[#allocation4 + $0x48] sm:$0xff] %vm646_vm0, %v6838_v49 }
  0xd7   : > { %v2026_v26 = vpop.permute.xlu1 %2025 }
  0xd8   : > { %v1932_v27 = vpop.permute.xlu0 %1931  ;;  %2069 = vst.msk [vmem:[#allocation4 + $0xa0] sm:$0xff] %vm1025_vm3, %v2026_v26 }
  0xd9   : > { %1974 = vst.msk [vmem:[#allocation4 + $0xa8] sm:$0xff] %vm928_vm2, %v1932_v27  ;;  %2515 = vrot.lane.b32.xlu1 %v6800_v25, %s6201_s17 }
  0xda   : > { %2229 = vrot.lane.b32.xlu0 %v6718_v46, %s6198_s15 }
  0xdb   : > { %v2406_v18 = vpop.permute.xlu1 %2405 }
  0xdc   : > { %v2312_v33 = vpop.permute.xlu0 %2311  ;;  %2451 = vst.msk [vmem:[#allocation4 + $0x90] sm:$0xff] %vm1413_vm7, %v2406_v18 }
  0xdd   : > { %2356 = vst.msk [vmem:[#allocation4 + $0x98] sm:$0xff] %vm1316_vm6, %v2312_v33  ;;  %1945 = vrot.lane.b32.xlu1 %v6686_v29, %s6194_s21 }
  0xde   : > { %1851 = vrot.lane.b32.xlu0 %v6688_v32, %s6195_s22 }
  0xdf   : > { %v2122_v39 = vpop.permute.xlu1 %2121 }
  0xe0   : > { %v2028_v40 = vpop.permute.xlu0 %2027  ;;  %2165 = vst.msk [vmem:[#allocation4 + $0xa0] sm:$0xff] %vm1122_vm4, %v2122_v39 }
  0xe1   : > { %2070 = vst.msk [vmem:[#allocation4 + $0xa8] sm:$0xff] %vm1025_vm3, %v2028_v40  ;;  %2325 = vrot.lane.b32.xlu1 %v2283_v38, %s6199_s8 }
  0xe2   : > { %2231 = vrot.lane.b32.xlu0 %v6782_v13, %s6198_s15 }
  0xe3   : > { %v2502_v29 = vpop.permute.xlu1 %2501 }
  0xe4   : > { %v2408_v32 = vpop.permute.xlu0 %2407  ;;  %2547 = vst.msk [vmem:[#allocation4 + $0x90] sm:$0xff] %vm1510_vm8, %v2502_v29  ;;  %v2382_v29 = vld [vmem:[#allocation2 + $0x120] sm:$0xff] }
  0xe5   : > { %2452 = vst.msk [vmem:[#allocation4 + $0x98] sm:$0xff] %vm1413_vm7, %v2408_v32  ;;  %2041 = vrot.lane.b32.xlu1 %v6487_v55, %s6196_s23  ;;  %v297_v55 = vld [vmem:[%s6314_s13 + $0x58] sm:$0xff] }
  0xe6   : > { %1947 = vrot.lane.b32.xlu0 %v6718_v46, %s6194_s21  ;;  %v369_v46 = vld [vmem:[%s8879_s1 + $0x58] sm:$0xff] }
  0xe7   : > { %v2124_v45 = vpop.permute.xlu1 %2123  ;;  %v441_v31 = vadd.f32 %v369_v46, %v297_v55 }
  0xe8   : > { %v1838_v48 = vpop.permute.xlu0 %1837  ;;  %2166 = vst.msk [vmem:[#allocation4 + $0xa8] sm:$0xff] %vm1122_vm4, %v2124_v45 }
  0xe9   : > { %1879 = vst.msk [vmem:[#allocation4 + $0xb0] sm:$0xff] %vm831_vm1, %v1838_v48  ;;  %2421 = vrot.lane.b32.xlu1 %v2379_v43, %s6200_s16  ;;  %v513_v57 = vmax.f32 %v441_v31, 0.0 }
  0xea   : > { %2327 = vrot.lane.b32.xlu0 %v6834_v44, %s6199_s8 }
  0xeb   : > { %v2504_v52 = vpop.permute.xlu1 %2503  ;;  %v2563_v54 = vld [vmem:[#allocation4 + $0x90] sm:$0xff]  ;;  %v585_v62 = vmin.f32 %v513_v57, 1.0 }
  0xec   : > { %v2218_v53 = vpop.permute.xlu0 %2217  ;;  %2548 = vst.msk [vmem:[#allocation4 + $0x98] sm:$0xff] %vm1510_vm8, %v2504_v52  ;;  %5606 = vmatprep.mubr.msk.f32.mxu1 %vm1549_vm9, %v2563_v54  ;;  %v2288_v57 = vld [vmem:[#allocation2 + $0x12f] sm:$0xff] }
  0xed   : > { %2261 = vst.msk [vmem:[#allocation4 + $0xa0] sm:$0xff] %vm1219_vm5, %v2218_v53  ;;  %2137 = vrot.lane.b32.xlu1 %v6784_v14, %s6197_s29  ;;  %v2478_v53 = vld [vmem:[#allocation2 + $0x121] sm:$0xff] }
  0xee   : > { %2043 = vrot.lane.b32.xlu0 %v2283_v38, %s6196_s23  ;;  %658 = vst.msk [vmem:[#allocation2 + $0x58] sm:$0xff] %vm646_vm0, %v585_v62  ;;  %v286_v38 = vld [vmem:[%s6314_s13] sm:$0xff]  ;;  %v720_v62 = vld [vmem:[#allocation2 + $0xf] sm:$0xff] }
  0xef   : > { %v1934_v60 = vpop.permute.xlu1 %1933  ;;  %v430_v40 = vadd.f32 %v358_v37, %v286_v38  ;;  %736 = vst.msk [vmem:[#allocation4 + $0x8] sm:$0xff] %vm646_vm0, %v720_v62 }
  0xf0   : > { %v1840_v61 = vpop.permute.xlu0 %1839  ;;  %1975 = vst.msk [vmem:[#allocation4 + $0xb0] sm:$0xff] %vm928_vm2, %v1934_v60 }
  0xf1   : > { %1880 = vst.msk [vmem:[#allocation4 + $0xb8] sm:$0xff] %vm831_vm1, %v1840_v61  ;;  %2517 = vrot.lane.b32.xlu1 %v2475_v58, %s6201_s17  ;;  %v502_v45 = vmax.f32 %v430_v40, 0.0  ;;  %v6202_v40 = vmov 0.0|0.0  }
  0xf2   : > { %2423 = vrot.lane.b32.xlu0 %v6855_v59, %s6200_s16  ;;  %5918 = vmatprep.subr.bf16.mxu1 %v6202_v40 }
  0xf3   : > { %v2314_v0 = vpop.permute.xlu1 %2313  ;;  %v2564_v21 = vld [vmem:[#allocation4 + $0x98] sm:$0xff]  ;;  %v574_v48 = vmin.f32 %v502_v45, 1.0  ;;  %5942 = vmatprep.subr.bf16.mxu0 %v6202_v40 }
  0xf4   : > { %v2220_v1 = vpop.permute.xlu0 %2219  ;;  %2357 = vst.msk [vmem:[#allocation4 + $0xa0] sm:$0xff] %vm1316_vm6, %v2314_v0  ;;  %5607 = vmatmul.mubr.msk.f32.gmra.mrb[2].mxu1 %vm1549_vm9, %v2564_v21  ;;  %v300_v0 = vld [vmem:[%s6314_s13 + $0x70] sm:$0xff] }
  0xf5   : > { %2262 = vst.msk [vmem:[#allocation4 + $0xa8] sm:$0xff] %vm1219_vm5, %v2220_v1  ;;  %2139 = vrot.lane.b32.xlu1 %v2379_v43, %s6197_s29  ;;  %v6889_v17 = vld [vmem:[#allocation2 + $0x57] sm:$0xff]  ;;  %v6904_v27 = vld [vmem:[#allocation2 + $0x5f] sm:$0xff] }
  0xf6   : > { %1853 = vrot.lane.b32.xlu0 %v6759_v4, %s6195_s22  ;;  %745 = vst.msk [vmem:[#allocation4 + $0x50] sm:$0xff] %vm646_vm0, %v6889_v17  ;;  %746 = vst.msk [vmem:[#allocation4 + $0x58] sm:$0xff] %vm646_vm0, %v6904_v27  ;;  %v372_v1 = vld [vmem:[%s8879_s1 + $0x70] sm:$0xff] }
  0xf7   : > { %v2030_v5 = vpop.permute.xlu1 %2029  ;;  %647 = vst.msk [vmem:[#allocation2] sm:$0xff] %vm646_vm0, %v574_v48  ;;  %v444_v21 = vadd.f32 %v372_v1, %v300_v0  ;;  %v1043_v48 = vld [vmem:[#allocation2 + $0x28] sm:$0xff] }
  0xf8   : > { %v1936_v6 = vpop.permute.xlu0 %1935  ;;  %2071 = vst.msk [vmem:[#allocation4 + $0xb0] sm:$0xff] %vm1025_vm3, %v2030_v5  ;;  %v2383_v5 = vld [vmem:[#allocation2 + $0x128] sm:$0xff] }
  0xf9   : > { %1976 = vst.msk [vmem:[#allocation4 + $0xb8] sm:$0xff] %vm928_vm2, %v1936_v6  ;;  %2519 = vrot.lane.b32.xlu1 %v6869_v36, %s6201_s17  ;;  %v516_v6 = vmax.f32 %v444_v21, 0.0  ;;  %v1044_v21 = vld [vmem:[#allocation2 + $0x30] sm:$0xff] }
  0xfa   : > { %2233 = vrot.lane.b32.xlu0 %v6800_v25, %s6198_s15 }
  0xfb   : > { %v2410_v4 = vpop.permute.xlu1 %2409 }
  0xfc   : > { %v2316_v8 = vpop.permute.xlu0 %2315  ;;  %2453 = vst.msk [vmem:[#allocation4 + $0xa0] sm:$0xff] %vm1413_vm7, %v2410_v4 }
  0xfd   : > { %2358 = vst.msk [vmem:[#allocation4 + $0xa8] sm:$0xff] %vm1316_vm6, %v2316_v8  ;;  %1949 = vrot.lane.b32.xlu1 %v6782_v13, %s6194_s21  ;;  %v588_v8 = vmin.f32 %v516_v6, 1.0  ;;  %v7035_v6 = vld [vmem:[#allocation2 + $0x39] sm:$0xff] }
  0xfe   : > { %1855 = vrot.lane.b32.xlu0 %v6784_v14, %s6195_s22 }
  0xff   : > { %v2126_v12 = vpop.permute.xlu1 %2125  ;;  %661 = vst.msk [vmem:[#allocation2 + $0x70] sm:$0xff] %vm646_vm0, %v588_v8 }
 0x100   : > { %v2032_v15 = vpop.permute.xlu0 %2031  ;;  %2167 = vst.msk [vmem:[#allocation4 + $0xb0] sm:$0xff] %vm1122_vm4, %v2126_v12 }
 0x101   : > { %2072 = vst.msk [vmem:[#allocation4 + $0xb8] sm:$0xff] %vm1025_vm3, %v2032_v15  ;;  %2329 = vrot.lane.b32.xlu1 %v2285_v11, %s6199_s8  ;;  %v752_v15 = vld [vmem:[#allocation2 + $0x10] sm:$0xff] }
 0x102   : > { %2235 = vrot.lane.b32.xlu0 %v2475_v58, %s6198_s15  ;;  %v2287_v58 = vld [vmem:[#allocation2 + $0x127] sm:$0xff] }
 0x103   : > { %v2506_v13 = vpop.permute.xlu1 %2505 }
 0x104   : > { %v2412_v14 = vpop.permute.xlu0 %2411  ;;  %2549 = vst.msk [vmem:[#allocation4 + $0xa0] sm:$0xff] %vm1510_vm8, %v2506_v13 }
 0x105   : > { %2454 = vst.msk [vmem:[#allocation4 + $0xa8] sm:$0xff] %vm1413_vm7, %v2412_v14  ;;  %2045 = vrot.lane.b32.xlu1 %v6834_v44, %s6196_s23 }
 0x106   : > { %1951 = vrot.lane.b32.xlu0 %v6800_v25, %s6194_s21  ;;  %v371_v25 = vld [vmem:[%s8879_s1 + $0x68] sm:$0xff] }
 0x107   : > { %v2128_v24 = vpop.permute.xlu1 %2127  ;;  %v443_v34 = vadd.f32 %v371_v25, %v299_v23 }
 0x108   : > { %v1842_v26 = vpop.permute.xlu0 %1841  ;;  %2168 = vst.msk [vmem:[#allocation4 + $0xb8] sm:$0xff] %vm1122_vm4, %v2128_v24  ;;  %v849_v24 = vld [vmem:[#allocation2 + $0x11] sm:$0xff] }
 0x109   : > { %1881 = vst.msk [vmem:[#allocation4 + $0xc0] sm:$0xff] %vm831_vm1, %v1842_v26  ;;  %2425 = vrot.lane.b32.xlu1 %v2381_v50, %s6200_s16  ;;  %v515_v39 = vmax.f32 %v443_v34, 0.0  ;;  %v848_v26 = vld [vmem:[#allocation2 + $0x9] sm:$0xff] }
 0x10a   : > { %2331 = vrot.lane.b32.xlu0 %v2286_v19, %s6199_s8 }
 0x10b   : > { %v2508_v20 = vpop.permute.xlu1 %2507  ;;  %v2565_v33 = vld [vmem:[#allocation4 + $0xa0] sm:$0xff]  ;;  %v587_v44 = vmin.f32 %v515_v39, 1.0 }
 0x10c   : > { %v2222_v18 = vpop.permute.xlu0 %2221  ;;  %2550 = vst.msk [vmem:[#allocation4 + $0xa8] sm:$0xff] %vm1510_vm8, %v2508_v20  ;;  %5609 = vmatprep.mubr.msk.f32.mxu1 %vm1549_vm9, %v2565_v33  ;;  %v373_v33 = vld [vmem:[%s8879_s1 + $0x78] sm:$0xff] }
 0x10d   : > { %2263 = vst.msk [vmem:[#allocation4 + $0xb0] sm:$0xff] %vm1219_vm5, %v2222_v18  ;;  %2141 = vrot.lane.b32.xlu1 %v6855_v59, %s6197_s29  ;;  %v719_v59 = vld [vmem:[#allocation2 + $0x7] sm:$0xff]  ;;  %v301_v18 = vld [vmem:[%s6314_s13 + $0x78] sm:$0xff] }
 0x10e   : > { %2047 = vrot.lane.b32.xlu0 %v2285_v11, %s6196_s23  ;;  %660 = vst.msk [vmem:[#allocation2 + $0x68] sm:$0xff] %vm646_vm0, %v587_v44  ;;  %735 = vst.msk [vmem:[#allocation4] sm:$0xff] %vm646_vm0, %v719_v59  ;;  %v445_v34 = vadd.f32 %v373_v33, %v301_v18 }
 0x10f   : > { %v1938_v32 = vpop.permute.xlu1 %1937 }
 0x110   : > { %v1844_v43 = vpop.permute.xlu0 %1843  ;;  %1977 = vst.msk [vmem:[#allocation4 + $0xc0] sm:$0xff] %vm928_vm2, %v1938_v32  ;;  %v517_v37 = vmax.f32 %v445_v34, 0.0  ;;  %v1042_v32 = vld [vmem:[#allocation2 + $0x20] sm:$0xff] }
 0x111   : > { %1882 = vst.msk [vmem:[#allocation4 + $0xc8] sm:$0xff] %vm831_vm1, %v1844_v43  ;;  %2521 = vrot.lane.b32.xlu1 %v2477_v22, %s6201_s17 }
 0x112   : > { %2427 = vrot.lane.b32.xlu0 %v2382_v29, %s6200_s16  ;;  %v753_v29 = vld [vmem:[#allocation2 + $0x18] sm:$0xff] }
 0x113   : > { %v2318_v55 = vpop.permute.xlu1 %2317  ;;  %v2566_v52 = vld [vmem:[#allocation4 + $0xa8] sm:$0xff] }
 0x114   : > { %v2224_v46 = vpop.permute.xlu0 %2223  ;;  %2359 = vst.msk [vmem:[#allocation4 + $0xb0] sm:$0xff] %vm1316_vm6, %v2318_v55  ;;  %5610 = vmatmul.mubr.msk.f32.gmra.mrb[4].mxu1 %vm1549_vm9, %v2566_v52 }
 0x115   : > { %2264 = vst.msk [vmem:[#allocation4 + $0xb8] sm:$0xff] %vm1219_vm5, %v2224_v46  ;;  %2237 = vrot.lane.b32.xlu1 %v6869_v36, %s6198_s15  ;;  %v2384_v36 = vld [vmem:[#allocation2 + $0x130] sm:$0xff]  ;;  %v6952_v4 = vld [vmem:[#allocation2 + $0x67] sm:$0xff]  ;;  %v850_v46 = vld [vmem:[#allocation2 + $0x19] sm:$0xff] }
 0x116   : > { %2143 = vrot.lane.b32.xlu0 %v2381_v50, %s6197_s29  ;;  %747 = vst.msk [vmem:[#allocation4 + $0x60] sm:$0xff] %vm646_vm0, %v6952_v4  ;;  %v721_v50 = vld [vmem:[#allocation2 + $0x17] sm:$0xff]  ;;  %v6968_v19 = vld [vmem:[#allocation2 + $0x6f] sm:$0xff] }
 0x117   : > { %v2034_v54 = vpop.permute.xlu1 %2033  ;;  %737 = vst.msk [vmem:[#allocation4 + $0x10] sm:$0xff] %vm646_vm0, %v721_v50  ;;  %748 = vst.msk [vmem:[#allocation4 + $0x68] sm:$0xff] %vm646_vm0, %v6968_v19 }
 0x118   : > { %v1940_v31 = vpop.permute.xlu0 %1939  ;;  %2073 = vst.msk [vmem:[#allocation4 + $0xc0] sm:$0xff] %vm1025_vm3, %v2034_v54  ;;  %v1140_v54 = vld [vmem:[#allocation2 + $0x29] sm:$0xff] }
 0x119   : > { %1978 = vst.msk [vmem:[#allocation4 + $0xc8] sm:$0xff] %vm928_vm2, %v1940_v31  ;;  %2239 = vrot.lane.b32.xlu1 %v2477_v22, %s6198_s15  ;;  %v589_v22 = vmin.f32 %v517_v37, 1.0 }
 0x11a   : > { %2523 = vrot.lane.b32.xlu0 %v2478_v53, %s6201_s17 }
 0x11b   : > { %v2414_v60 = vpop.permute.xlu1 %2413  ;;  %662 = vst.msk [vmem:[#allocation2 + $0x78] sm:$0xff] %vm646_vm0, %v589_v22 }
 0x11c   : > { %v2320_v61 = vpop.permute.xlu0 %2319  ;;  %2455 = vst.msk [vmem:[#allocation4 + $0xb0] sm:$0xff] %vm1413_vm7, %v2414_v60 }
 0x11d   : > { %2360 = vst.msk [vmem:[#allocation4 + $0xb8] sm:$0xff] %vm1316_vm6, %v2320_v61  ;;  %2335 = vrot.lane.b32.xlu1 %v2288_v57, %s6199_s8  ;;  %v7017_v61 = vld [vmem:[#allocation2 + $0x38] sm:$0xff] }
 0x11e   : > { %2333 = vrot.lane.b32.xlu0 %v2287_v58, %s6199_s8 }
 0x11f   : > { %v2130_v30 = vpop.permute.xlu1 %2129 }
 0x120   : > { %v2036_v42 = vpop.permute.xlu0 %2035  ;;  %2169 = vst.msk [vmem:[#allocation4 + $0xc0] sm:$0xff] %vm1122_vm4, %v2130_v30  ;;  %v7037_v30 = vld [vmem:[#allocation2 + $0x40] sm:$0xff] }
 0x121   : > { %2074 = vst.msk [vmem:[#allocation4 + $0xc8] sm:$0xff] %vm1025_vm3, %v2036_v42  ;;  %2431 = vrot.lane.b32.xlu1 %v2384_v36, %s6200_s16 }
 0x122   : > { %2429 = vrot.lane.b32.xlu0 %v2383_v5, %s6200_s16  ;;  %v7008_v58 = vld [vmem:[#allocation2 + $0x77] sm:$0xff]  ;;  %v7025_v1 = vld [vmem:[#allocation2 + $0x7f] sm:$0xff] }
 0x123   : > { %v2510_v11 = vpop.permute.xlu1 %2509  ;;  %749 = vst.msk [vmem:[#allocation4 + $0x70] sm:$0xff] %vm646_vm0, %v7008_v58  ;;  %750 = vst.msk [vmem:[#allocation4 + $0x78] sm:$0xff] %vm646_vm0, %v7025_v1 }
 0x124   : > { %v2416_v12 = vpop.permute.xlu0 %2415  ;;  %2551 = vst.msk [vmem:[#allocation4 + $0xb0] sm:$0xff] %vm1510_vm8, %v2510_v11 }
 0x125   : > { %2456 = vst.msk [vmem:[#allocation4 + $0xb8] sm:$0xff] %vm1413_vm7, %v2416_v12  ;;  %2527 = vrot.lane.b32.xlu1 %v2480_v9, %s6201_s17  ;;  %v1141_v12 = vld [vmem:[#allocation2 + $0x31] sm:$0xff] }
 0x126   : > { %2525 = vrot.lane.b32.xlu0 %v2479_v10, %s6201_s17 }
 0x127   : > { %v2132_v13 = vpop.permute.xlu1 %2131 }
 0x128   : > { %v1846_v14 = vpop.permute.xlu0 %1845  ;;  %2170 = vst.msk [vmem:[#allocation4 + $0xc8] sm:$0xff] %vm1122_vm4, %v2132_v13 }
 0x129   : > { %1883 = vst.msk [vmem:[#allocation4 + $0xd0] sm:$0xff] %vm831_vm1, %v1846_v14  ;;  %785 = vrot.lane.b32.xlu1 %v752_v15, %s6195_s22 }
 0x12a   : > { %783 = vrot.lane.b32.xlu0 %v751_v16, %s6195_s22 }
 0x12b   : > { %v2512_v23 = vpop.permute.xlu1 %2511  ;;  %v2567_v20 = vld [vmem:[#allocation4 + $0xb0] sm:$0xff] }
 0x12c   : > { %v2226_v25 = vpop.permute.xlu0 %2225  ;;  %2552 = vst.msk [vmem:[#allocation4 + $0xb8] sm:$0xff] %vm1510_vm8, %v2512_v23  ;;  %5612 = vmatprep.mubr.msk.f32.mxu1 %vm1549_vm9, %v2567_v20 }
 0x12d   : > { %2265 = vst.msk [vmem:[#allocation4 + $0xc0] sm:$0xff] %vm1219_vm5, %v2226_v25  ;;  %882 = vrot.lane.b32.xlu1 %v849_v24, %s6194_s21  ;;  %v7073_v25 = vld [vmem:[#allocation2 + $0x48] sm:$0xff] }
 0x12e   : > { %880 = vrot.lane.b32.xlu0 %v848_v26, %s6194_s21 }
 0x12f   : > { %v1942_v38 = vpop.permute.xlu1 %1941 }
 0x130   : > { %v1848_v39 = vpop.permute.xlu0 %1847  ;;  %1979 = vst.msk [vmem:[#allocation4 + $0xd0] sm:$0xff] %vm928_vm2, %v1942_v38  ;;  %v7090_v38 = vld [vmem:[#allocation2 + $0x50] sm:$0xff] }
 0x131   : > { %1884 = vst.msk [vmem:[#allocation4 + $0xd8] sm:$0xff] %vm831_vm1, %v1848_v39  ;;  %979 = vrot.lane.b32.xlu1 %v6698_v28, %s6196_s23  ;;  %v1139_v28 = vld [vmem:[#allocation2 + $0x21] sm:$0xff] }
 0x132   : > { %977 = vrot.lane.b32.xlu0 %v6692_v35, %s6196_s23 }
 0x133   : > { %v2322_v43 = vpop.permute.xlu1 %2321  ;;  %v2568_v45 = vld [vmem:[#allocation4 + $0xb8] sm:$0xff] }
 0x134   : > { %v2228_v44 = vpop.permute.xlu0 %2227  ;;  %2361 = vst.msk [vmem:[#allocation4 + $0xc0] sm:$0xff] %vm1316_vm6, %v2322_v43  ;;  %5613 = vmatmul.mubr.msk.f32.gmra.mrb[6].mxu1 %vm1549_vm9, %v2568_v45 }
 0x135   : > { %2266 = vst.msk [vmem:[#allocation4 + $0xc8] sm:$0xff] %vm1219_vm5, %v2228_v44  ;;  %787 = vrot.lane.b32.xlu1 %v753_v29, %s6195_s22 }
 0x136   : > { %1074 = vrot.lane.b32.xlu0 %v1042_v32, %s6197_s29 }
 0x137   : > { %v2038_v35 = vpop.permute.xlu1 %2037 }
 0x138   : > { %v1944_v55 = vpop.permute.xlu0 %1943  ;;  %2075 = vst.msk [vmem:[#allocation4 + $0xd0] sm:$0xff] %vm1025_vm3, %v2038_v35 }
 0x139   : > { %1980 = vst.msk [vmem:[#allocation4 + $0xd8] sm:$0xff] %vm928_vm2, %v1944_v55  ;;  %1171 = vrot.lane.b32.xlu1 %v1139_v28, %s6198_s15 }
 0x13a   : > { %1076 = vrot.lane.b32.xlu0 %v1043_v48, %s6197_s29 }
 0x13b   : > { %v2418_v52 = vpop.permute.xlu1 %2417 }
 0x13c   : > { %v2324_v53 = vpop.permute.xlu0 %2323  ;;  %2457 = vst.msk [vmem:[#allocation4 + $0xc0] sm:$0xff] %vm1413_vm7, %v2418_v52 }
 0x13d   : > { %2362 = vst.msk [vmem:[#allocation4 + $0xc8] sm:$0xff] %vm1316_vm6, %v2324_v53  ;;  %884 = vrot.lane.b32.xlu1 %v850_v46, %s6194_s21  ;;  %v7131_v53 = vld [vmem:[#allocation2 + $0x58] sm:$0xff] }
 0x13e   : > { %789 = vrot.lane.b32.xlu0 %v1042_v32, %s6195_s22 }
 0x13f   : > { %v2134_v31 = vpop.permute.xlu1 %2133 }
 0x140   : > { %v2040_v57 = vpop.permute.xlu0 %2039  ;;  %2171 = vst.msk [vmem:[#allocation4 + $0xd0] sm:$0xff] %vm1122_vm4, %v2134_v31 }
 0x141   : > { %2076 = vst.msk [vmem:[#allocation4 + $0xd8] sm:$0xff] %vm1025_vm3, %v2040_v57  ;;  %1268 = vrot.lane.b32.xlu1 %v6744_v2, %s6199_s8 }
 0x142   : > { %1173 = vrot.lane.b32.xlu0 %v1140_v54, %s6198_s15 }
 0x143   : > { %v2514_v59 = vpop.permute.xlu1 %2513 }
 0x144   : > { %v2420_v60 = vpop.permute.xlu0 %2419  ;;  %2553 = vst.msk [vmem:[#allocation4 + $0xc0] sm:$0xff] %vm1510_vm8, %v2514_v59 }
 0x145   : > { %2458 = vst.msk [vmem:[#allocation4 + $0xc8] sm:$0xff] %vm1413_vm7, %v2420_v60  ;;  %981 = vrot.lane.b32.xlu1 %v6751_v3, %s6196_s23  ;;  %v7146_v60 = vld [vmem:[#allocation2 + $0x59] sm:$0xff] }
 0x146   : > { %886 = vrot.lane.b32.xlu0 %v1139_v28, %s6194_s21 }
 0x147   : > { %v2136_v62 = vpop.permute.xlu1 %2135 }
 0x148   : > { %v1850_v0 = vpop.permute.xlu0 %1849  ;;  %2172 = vst.msk [vmem:[#allocation4 + $0xd8] sm:$0xff] %vm1122_vm4, %v2136_v62 }
 0x149   : > { %1885 = vst.msk [vmem:[#allocation4 + $0xe0] sm:$0xff] %vm831_vm1, %v1850_v0  ;;  %1365 = vrot.lane.b32.xlu1 %v7017_v61, %s6200_s16 }
 0x14a   : > { %1270 = vrot.lane.b32.xlu0 %v6763_v7, %s6199_s8 }
 0x14b   : > { %v2516_v3 = vpop.permute.xlu1 %2515  ;;  %v2569_v5 = vld [vmem:[#allocation4 + $0xc0] sm:$0xff] }
 0x14c   : > { %v2230_v36 = vpop.permute.xlu0 %2229  ;;  %2554 = vst.msk [vmem:[#allocation4 + $0xc8] sm:$0xff] %vm1510_vm8, %v2516_v3  ;;  %5615 = vmatprep.mubr.msk.f32.mxu1 %vm1549_vm9, %v2569_v5 }
 0x14d   : > { %2267 = vst.msk [vmem:[#allocation4 + $0xd0] sm:$0xff] %vm1219_vm5, %v2230_v36  ;;  %1078 = vrot.lane.b32.xlu1 %v1044_v21, %s6197_s29 }
 0x14e   : > { %983 = vrot.lane.b32.xlu0 %v6744_v2, %s6196_s23  ;;  %v7051_v2 = vld [vmem:[#allocation2 + $0x41] sm:$0xff] }
 0x14f   : > { %v1946_v42 = vpop.permute.xlu1 %1945 }
 0x150   : > { %v1852_v8 = vpop.permute.xlu0 %1851  ;;  %1981 = vst.msk [vmem:[#allocation4 + $0xe0] sm:$0xff] %vm928_vm2, %v1946_v42 }
 0x151   : > { %1886 = vst.msk [vmem:[#allocation4 + $0xe8] sm:$0xff] %vm831_vm1, %v1852_v8  ;;  %1462 = vrot.lane.b32.xlu1 %v7035_v6, %s6201_s17 }
 0x152   : > { %1367 = vrot.lane.b32.xlu0 %v7037_v30, %s6200_s16 }
 0x153   : > { %v2326_v9 = vpop.permute.xlu1 %2325  ;;  %v2570_v11 = vld [vmem:[#allocation4 + $0xc8] sm:$0xff] }
 0x154   : > { %v2232_v10 = vpop.permute.xlu0 %2231  ;;  %2363 = vst.msk [vmem:[#allocation4 + $0xd0] sm:$0xff] %vm1316_vm6, %v2326_v9  ;;  %5616 = vmatmul.mubr.msk.f32.gmra.mrb[8].mxu1 %vm1549_vm9, %v2570_v11 }
 0x155   : > { %2268 = vst.msk [vmem:[#allocation4 + $0xd8] sm:$0xff] %vm1219_vm5, %v2232_v10  ;;  %1080 = vrot.lane.b32.xlu1 %v7017_v61, %s6197_s29 }
 0x156   : > { %791 = vrot.lane.b32.xlu0 %v1043_v48, %s6195_s22 }
 0x157   : > { %v2042_v15 = vpop.permute.xlu1 %2041 }
 0x158   : > { %v1948_v16 = vpop.permute.xlu0 %1947  ;;  %2077 = vst.msk [vmem:[#allocation4 + $0xe0] sm:$0xff] %vm1025_vm3, %v2042_v15  ;;  %v7192_v15 = vld [vmem:[%s8882_s4] ss:$0 sm:$0xff] }
 0x159   : > { %1982 = vst.msk [vmem:[#allocation4 + $0xe8] sm:$0xff] %vm928_vm2, %v1948_v16  ;;  %1464 = vrot.lane.b32.xlu1 %v7051_v2, %s6201_s17  ;;  %v7196_v16 = vld [vmem:[#allocation2 + $0x68] sm:$0xff] }
 0x15a   : > { %1175 = vrot.lane.b32.xlu0 %v1141_v12, %s6198_s15 }
 0x15b   : > { %v2422_v13 = vpop.permute.xlu1 %2421 }
 0x15c   : > { %v2328_v14 = vpop.permute.xlu0 %2327  ;;  %2459 = vst.msk [vmem:[#allocation4 + $0xd0] sm:$0xff] %vm1413_vm7, %v2422_v13 }
 0x15d   : > { %2364 = vst.msk [vmem:[#allocation4 + $0xd8] sm:$0xff] %vm1316_vm6, %v2328_v14  ;;  %888 = vrot.lane.b32.xlu1 %v1140_v54, %s6194_s21 }
 0x15e   : > { %793 = vrot.lane.b32.xlu0 %v1044_v21, %s6195_s22 }
 0x15f   : > { %v2138_v50 = vpop.permute.xlu1 %2137 }
 0x160   : > { %v2044_v24 = vpop.permute.xlu0 %2043  ;;  %2173 = vst.msk [vmem:[#allocation4 + $0xe0] sm:$0xff] %vm1122_vm4, %v2138_v50 }
 0x161   : > { %2078 = vst.msk [vmem:[#allocation4 + $0xe8] sm:$0xff] %vm1025_vm3, %v2044_v24  ;;  %1272 = vrot.lane.b32.xlu1 %v6820_v41, %s6199_s8 }
 0x162   : > { %1177 = vrot.lane.b32.xlu0 %v7035_v6, %s6198_s15 }
 0x163   : > { %v2518_v26 = vpop.permute.xlu1 %2517 }
 0x164   : > { %v2424_v23 = vpop.permute.xlu0 %2423  ;;  %2555 = vst.msk [vmem:[#allocation4 + $0xd0] sm:$0xff] %vm1510_vm8, %v2518_v26 }
 0x165   : > { %2460 = vst.msk [vmem:[#allocation4 + $0xd8] sm:$0xff] %vm1413_vm7, %v2424_v23  ;;  %985 = vrot.lane.b32.xlu1 %v6763_v7, %s6196_s23  ;;  %v7088_v7 = vld [vmem:[#allocation2 + $0x49] sm:$0xff] }
 0x166   : > { %890 = vrot.lane.b32.xlu0 %v1141_v12, %s6194_s21 }
 0x167   : > { %v2140_v20 = vpop.permute.xlu1 %2139 }
 0x168   : > { %v1854_v18 = vpop.permute.xlu0 %1853  ;;  %2174 = vst.msk [vmem:[#allocation4 + $0xe8] sm:$0xff] %vm1122_vm4, %v2140_v20 }
 0x169   : > { %1887 = vst.msk [vmem:[#allocation4 + $0xf0] sm:$0xff] %vm831_vm1, %v1854_v18  ;;  %1369 = vrot.lane.b32.xlu1 %v7073_v25, %s6200_s16 }
 0x16a   : > { %1274 = vrot.lane.b32.xlu0 %v6838_v49, %s6199_s8 }
 0x16b   : > { %v2520_v33 = vpop.permute.xlu1 %2519  ;;  %v2571_v37 = vld [vmem:[#allocation4 + $0xd0] sm:$0xff] }
 0x16c   : > { %v2234_v34 = vpop.permute.xlu0 %2233  ;;  %2556 = vst.msk [vmem:[#allocation4 + $0xd8] sm:$0xff] %vm1510_vm8, %v2520_v33  ;;  %5618 = vmatprep.mubr.msk.f32.mxu1 %vm1549_vm9, %v2571_v37 }
 0x16d   : > { %2269 = vst.msk [vmem:[#allocation4 + $0xe0] sm:$0xff] %vm1219_vm5, %v2234_v34  ;;  %1082 = vrot.lane.b32.xlu1 %v7037_v30, %s6197_s29  ;;  %v7212_v34 = vld [vmem:[#allocation2 + $0x69] sm:$0xff] }
 0x16e   : > { %987 = vrot.lane.b32.xlu0 %v6820_v41, %s6196_s23  ;;  %v7105_v41 = vld [vmem:[#allocation2 + $0x51] sm:$0xff] }
 0x16f   : > { %v1950_v39 = vpop.permute.xlu1 %1949 }
 0x170   : > { %v1856_v22 = vpop.permute.xlu0 %1855  ;;  %1983 = vst.msk [vmem:[#allocation4 + $0xf0] sm:$0xff] %vm928_vm2, %v1950_v39 }
 0x171   : > { %1888 = vst.msk [vmem:[#allocation4 + $0xf8] sm:$0xff] %vm831_vm1, %v1856_v22  ;;  %1466 = vrot.lane.b32.xlu1 %v7088_v7, %s6201_s17  ;;  %v7229_v22 = vld [vmem:[#allocation2 + $0x71] sm:$0xff] }
 0x172   : > { %1371 = vrot.lane.b32.xlu0 %v7090_v38, %s6200_s16 }
 0x173   : > { %v2330_v29 = vpop.permute.xlu1 %2329  ;;  %v2572_v43 = vld [vmem:[#allocation4 + $0xd8] sm:$0xff] }
 0x174   : > { %v2236_v32 = vpop.permute.xlu0 %2235  ;;  %2365 = vst.msk [vmem:[#allocation4 + $0xe0] sm:$0xff] %vm1316_vm6, %v2330_v29  ;;  %5619 = vmatmul.mubr.msk.f32.gmra.mrb[10].mxu1 %vm1549_vm9, %v2572_v43 }
 0x175   : > { %2270 = vst.msk [vmem:[#allocation4 + $0xe8] sm:$0xff] %vm1219_vm5, %v2236_v32  ;;  %1084 = vrot.lane.b32.xlu1 %v7073_v25, %s6197_s29 }
 0x176   : > { %795 = vrot.lane.b32.xlu0 %v7017_v61, %s6195_s22  ;;  %v7148_v61 = vld [vmem:[#allocation2 + $0x60] sm:$0xff] }
 0x177   : > { %v2046_v44 = vpop.permute.xlu1 %2045 }
 0x178   : > { %v1952_v45 = vpop.permute.xlu0 %1951  ;;  %2079 = vst.msk [vmem:[#allocation4 + $0xf0] sm:$0xff] %vm1025_vm3, %v2046_v44  ;;  %v398_v44 = vld [vmem:[%s8879_s1 + $0x140] sm:$0xff] }
 0x179   : > { %1984 = vst.msk [vmem:[#allocation4 + $0xf8] sm:$0xff] %vm928_vm2, %v1952_v45  ;;  %1468 = vrot.lane.b32.xlu1 %v7105_v41, %s6201_s17 }
 0x17a   : > { %1179 = vrot.lane.b32.xlu0 %v7051_v2, %s6198_s15 }
 0x17b   : > { %v2426_v28 = vpop.permute.xlu1 %2425 }
 0x17c   : > { %v2332_v48 = vpop.permute.xlu0 %2331  ;;  %2461 = vst.msk [vmem:[#allocation4 + $0xe0] sm:$0xff] %vm1413_vm7, %v2426_v28 }
 0x17d   : > { %2366 = vst.msk [vmem:[#allocation4 + $0xe8] sm:$0xff] %vm1316_vm6, %v2332_v48  ;;  %892 = vrot.lane.b32.xlu1 %v7035_v6, %s6194_s21 }
 0x17e   : > { %797 = vrot.lane.b32.xlu0 %v7037_v30, %s6195_s22 }
 0x17f   : > { %v2142_v35 = vpop.permute.xlu1 %2141 }
 0x180   : > { %v2048_v55 = vpop.permute.xlu0 %2047  ;;  %2175 = vst.msk [vmem:[#allocation4 + $0xf0] sm:$0xff] %vm1122_vm4, %v2142_v35 }
 0x181   : > { %2080 = vst.msk [vmem:[#allocation4 + $0xf8] sm:$0xff] %vm1025_vm3, %v2048_v55  ;;  %1276 = vrot.lane.b32.xlu1 %v6889_v17, %s6199_s8 }
 0x182   : > { %1181 = vrot.lane.b32.xlu0 %v7088_v7, %s6198_s15 }
 0x183   : > { %v2522_v46 = vpop.permute.xlu1 %2521 }
 0x184   : > { %v2428_v52 = vpop.permute.xlu0 %2427  ;;  %2557 = vst.msk [vmem:[#allocation4 + $0xe0] sm:$0xff] %vm1510_vm8, %v2522_v46 }
 0x185   : > { %2462 = vst.msk [vmem:[#allocation4 + $0xe8] sm:$0xff] %vm1413_vm7, %v2428_v52  ;;  %989 = vrot.lane.b32.xlu1 %v6838_v49, %s6196_s23 }
 0x186   : > { %894 = vrot.lane.b32.xlu0 %v7051_v2, %s6194_s21 }
 0x187   : > { %v2238_v54 = vpop.permute.xlu1 %2237 }
 0x188   : > { %v2144_v31 = vpop.permute.xlu0 %2143  ;;  %2271 = vst.msk [vmem:[#allocation4 + $0xf0] sm:$0xff] %vm1219_vm5, %v2238_v54  ;;  %v7260_v54 = vld [vmem:[#allocation2 + $0x78] sm:$0xff] }
 0x189   : > { %2176 = vst.msk [vmem:[#allocation4 + $0xf8] sm:$0xff] %vm1122_vm4, %v2144_v31  ;;  %1373 = vrot.lane.b32.xlu1 %v7131_v53, %s6200_s16 }
 0x18a   : > { %1278 = vrot.lane.b32.xlu0 %v6904_v27, %s6199_s8 }
 0x18b   : > { %v2240_v57 = vpop.permute.xlu1 %2239  ;;  %v2573_v49 = vld [vmem:[#allocation4 + $0xe0] sm:$0xff] }
 0x18c   : > { %v2524_v59 = vpop.permute.xlu0 %2523  ;;  %2272 = vst.msk [vmem:[#allocation4 + $0xf8] sm:$0xff] %vm1219_vm5, %v2240_v57  ;;  %5621 = vmatprep.mubr.msk.f32.mxu1 %vm1549_vm9, %v2573_v49 }
 0x18d   : > { %2558 = vst.msk [vmem:[#allocation4 + $0xe8] sm:$0xff] %vm1510_vm8, %v2524_v59  ;;  %1086 = vrot.lane.b32.xlu1 %v7090_v38, %s6197_s29 }
 0x18e   : > { %991 = vrot.lane.b32.xlu0 %v6889_v17, %s6196_s23  ;;  %v7163_v17 = vld [vmem:[#allocation2 + $0x61] sm:$0xff] }
 0x18f   : > { %v2336_v62 = vpop.permute.xlu1 %2335 }
 0x190   : > { %v2334_v0 = vpop.permute.xlu0 %2333  ;;  %2368 = vst.msk [vmem:[#allocation4 + $0xf8] sm:$0xff] %vm1316_vm6, %v2336_v62 }
 0x191   : > { %2367 = vst.msk [vmem:[#allocation4 + $0xf0] sm:$0xff] %vm1316_vm6, %v2334_v0  ;;  %1470 = vrot.lane.b32.xlu1 %v7146_v60, %s6201_s17 }
 0x192   : > { %1375 = vrot.lane.b32.xlu0 %v7148_v61, %s6200_s16 }
 0x193   : > { %v2432_v21 = vpop.permute.xlu1 %2431 }
 0x194   : > { %v2430_v3 = vpop.permute.xlu0 %2429  ;;  %v2574_v36 = vld [vmem:[#allocation4 + $0xe8] sm:$0xff]  ;;  %2464 = vst.msk [vmem:[#allocation4 + $0xf8] sm:$0xff] %vm1413_vm7, %v2432_v21 }
 0x195   : > { %2463 = vst.msk [vmem:[#allocation4 + $0xf0] sm:$0xff] %vm1413_vm7, %v2430_v3  ;;  %5622 = vmatmul.mubr.msk.f32.gmra.mrb[12].mxu1 %vm1549_vm9, %v2574_v36  ;;  %1088 = vrot.lane.b32.xlu1 %v7131_v53, %s6197_s29  ;;  %v327_v3 = vld [vmem:[%s6314_s13 + $0x148] sm:$0xff] }
 0x196   : > { %799 = vrot.lane.b32.xlu0 %v7073_v25, %s6195_s22  ;;  %v399_v36 = vld [vmem:[%s8879_s1 + $0x148] sm:$0xff] }
 0x197   : > { %v2528_v5 = vpop.permute.xlu1 %2527 }
 0x198   : > { %v2526_v6 = vpop.permute.xlu0 %2525  ;;  %2560 = vst.msk [vmem:[#allocation4 + $0xf8] sm:$0xff] %vm1510_vm8, %v2528_v5  ;;  %v471_v5 = vadd.f32 %v399_v36, %v327_v3 }
 0x199   : > { %2559 = vst.msk [vmem:[#allocation4 + $0xf0] sm:$0xff] %vm1510_vm8, %v2526_v6  ;;  %1472 = vrot.lane.b32.xlu1 %v7163_v17, %s6201_s17 }
 0x19a   : > { %1183 = vrot.lane.b32.xlu0 %v7105_v41, %s6198_s15 }
 0x19b   : > { %v786_v30 = vpop.permute.xlu1 %785 }
 0x19c   : > { %v784_v42 = vpop.permute.xlu0 %783  ;;  %833 = vst.msk [vmem:[#allocation4 + $0x8] sm:$0xff] %vm831_vm1, %v786_v30  ;;  %v7281_v30 = vld [vmem:[#allocation2 + $0x79] sm:$0xff] }
 0x19d   : > { %832 = vst.msk [vmem:[#allocation4] sm:$0xff] %vm831_vm1, %v784_v42  ;;  %896 = vrot.lane.b32.xlu1 %v7088_v7, %s6194_s21  ;;  %v7214_v7 = vld [vmem:[#allocation2 + $0x70] sm:$0xff]  ;;  %v543_v42 = vmax.f32 %v471_v5, 0.0  ;;  %v330_v5 = vld [vmem:[%s6314_s13 + $0x160] sm:$0xff] }
 0x19e   : > { %801 = vrot.lane.b32.xlu0 %v7090_v38, %s6195_s22 }
 0x19f   : > { %v883_v8 = vpop.permute.xlu1 %882  ;;  %v2576_v11 = vld [vmem:[#allocation4 + $0xf8] sm:$0xff] }
 0x1a0   : > { %v881_v9 = vpop.permute.xlu0 %880  ;;  %v2575_v10 = vld [vmem:[#allocation4 + $0xf0] sm:$0xff]  ;;  %930 = vst.msk [vmem:[#allocation4 + $0x8] sm:$0xff] %vm928_vm2, %v883_v8 }
 0x1a1   : > { %929 = vst.msk [vmem:[#allocation4] sm:$0xff] %vm928_vm2, %v881_v9  ;;  %5624 = vmatprep.mubr.msk.f32.mxu1 %vm1549_vm9, %v2575_v10  ;;  %1280 = vrot.lane.b32.xlu1 %v6952_v4, %s6199_s8  ;;  %v7283_v9 = vld [vmem:[#allocation2 + $0x80] sm:$0xff] }
 0x1a2   : > { %5625 = vmatmul.mubr.msk.f32.gmra.mrb[14].mxu1 %vm1549_vm9, %v2576_v11  ;;  %1185 = vrot.lane.b32.xlu0 %v7146_v60, %s6198_s15  ;;  %v615_v11 = vmin.f32 %v543_v42, 1.0 }
 0x1a3   : > { %v980_v2 = vpop.permute.xlu1 %979 }
 0x1a4   : > { %v978_v12 = vpop.permute.xlu0 %977  ;;  %1027 = vst.msk [vmem:[#allocation4 + $0x8] sm:$0xff] %vm1025_vm3, %v980_v2 }
 0x1a5   : > { %1026 = vst.msk [vmem:[#allocation4] sm:$0xff] %vm1025_vm3, %v978_v12  ;;  %993 = vrot.lane.b32.xlu1 %v6904_v27, %s6196_s23 }
 0x1a6   : > { %898 = vrot.lane.b32.xlu0 %v7105_v41, %s6194_s21  ;;  %v326_v41 = vld [vmem:[%s6314_s13 + $0x140] sm:$0xff]  ;;  %688 = vst.msk [vmem:[#allocation2 + $0x148] sm:$0xff] %vm646_vm0, %v615_v11 }
 0x1a7   : > { %v5605_v13 = vpop.f32.mrb[0].mxu1  ;;  %v788_v14 = vpop.permute.xlu1 %787  ;;  %v470_v28 = vadd.f32 %v398_v44, %v326_v41 }
 0x1a8   : > { %v2697_v50 = vadd.f32 %v5605_v13, %v7192_v15  ;;  %834 = vst.msk [vmem:[#allocation4 + $0x10] sm:$0xff] %vm831_vm1, %v788_v14  ;;  %v1075_v24 = vpop.permute.xlu0 %1074  ;;  %v2691_v26 = vpop.f32.mrb[1].mxu1  ;;  %v7300_v13 = vld [vmem:[#allocation2 + $0x81] sm:$0xff] }
 0x1a9   : > { %1123 = vst.msk [vmem:[#allocation4] sm:$0xff] %vm1122_vm4, %v1075_v24  ;;  %v2692_v27 = vadd.f32 %v7192_v15, %v2691_v26  ;;  %1377 = vrot.lane.b32.xlu1 %v7196_v16, %s6200_s16  ;;  %v542_v48 = vmax.f32 %v470_v28, 0.0  ;;  %v328_v26 = vld [vmem:[%s6314_s13 + $0x150] sm:$0xff] }
 0x1aa   : > { %v2771_v23 = vmax.f32 %v2697_v50, 0.0  ;;  %1282 = vrot.lane.b32.xlu0 %v6968_v19, %s6199_s8 }
 0x1ab   : > { %v2770_v25 = vmax.f32 %v2692_v27, 0.0  ;;  %v1172_v20 = vpop.permute.xlu1 %1171  ;;  %v614_v46 = vmin.f32 %v542_v48, 1.0  ;;  %v329_v48 = vld [vmem:[%s6314_s13 + $0x158] sm:$0xff] }
 0x1ac   : > { %1220 = vst.msk [vmem:[#allocation4] sm:$0xff] %vm1219_vm5, %v1172_v20  ;;  %v1077_v18 = vpop.permute.xlu0 %1076 }
 0x1ad   : > { %v5919_v33 = vpack.c.bf16 %v2771_v23, %v2770_v25  ;;  %1124 = vst.msk [vmem:[#allocation4 + $0x8] sm:$0xff] %vm1122_vm4, %v1077_v18  ;;  %1090 = vrot.lane.b32.xlu1 %v7148_v61, %s6197_s29  ;;  %v1246_v25 = vld [vmem:[#allocation2 + $0x87] sm:$0xff] }
 0x1ae   : > { %995 = vrot.lane.b32.xlu0 %v6952_v4, %s6196_s23  ;;  %687 = vst.msk [vmem:[#allocation2 + $0x140] sm:$0xff] %vm646_vm0, %v614_v46 }
 0x1af   : > { %5920 = vmatpush3.bf16.msra.mxu1 %v5919_v33  ;;  %v885_v37 = vpop.permute.xlu1 %884 }
 0x1b0   : > { %931 = vst.msk [vmem:[#allocation4 + $0x10] sm:$0xff] %vm928_vm2, %v885_v37  ;;  %v790_v38 = vpop.permute.xlu0 %789  ;;  %5921 = vmatprep.subr.bf16.mxu1 %v6202_v40 }
 0x1b1   : > { %835 = vst.msk [vmem:[#allocation4 + $0x18] sm:$0xff] %vm831_vm1, %v790_v38  ;;  %1474 = vrot.lane.b32.xlu1 %v7212_v34, %s6201_s17  ;;  %v1343_v38 = vld [vmem:[#allocation2 + $0x88] sm:$0xff] }
 0x1b2   : > { %1379 = vrot.lane.b32.xlu0 %v7214_v7, %s6200_s16 }
 0x1b3   : > { %v1269_v4 = vpop.permute.xlu1 %1268 }
 0x1b4   : > { %1317 = vst.msk [vmem:[#allocation4] sm:$0xff] %vm1316_vm6, %v1269_v4  ;;  %v1174_v39 = vpop.permute.xlu0 %1173 }
 0x1b5   : > { %1221 = vst.msk [vmem:[#allocation4 + $0x8] sm:$0xff] %vm1219_vm5, %v1174_v39  ;;  %1092 = vrot.lane.b32.xlu1 %v7196_v16, %s6197_s29 }
 0x1b6   : > { %803 = vrot.lane.b32.xlu0 %v7131_v53, %s6195_s22 }
 0x1b7   : > { %v982_v29 = vpop.permute.xlu1 %981 }
 0x1b8   : > { %1028 = vst.msk [vmem:[#allocation4 + $0x10] sm:$0xff] %vm1025_vm3, %v982_v29  ;;  %v887_v32 = vpop.permute.xlu0 %886  ;;  %v7330_v29 = vld [vmem:[#allocation2 + $0x8f] sm:$0xff] }
 0x1b9   : > { %932 = vst.msk [vmem:[#allocation4 + $0x18] sm:$0xff] %vm928_vm2, %v887_v32  ;;  %1476 = vrot.lane.b32.xlu1 %v7229_v22, %s6201_s17 }
 0x1ba   : > { %1187 = vrot.lane.b32.xlu0 %v7163_v17, %s6198_s15 }
 0x1bb   : > { %v1366_v43 = vpop.permute.xlu1 %1365 }
 0x1bc   : > { %1414 = vst.msk [vmem:[#allocation4] sm:$0xff] %vm1413_vm7, %v1366_v43  ;;  %v1271_v45 = vpop.permute.xlu0 %1270 }
 0x1bd   : > { %1318 = vst.msk [vmem:[#allocation4 + $0x8] sm:$0xff] %vm1316_vm6, %v1271_v45  ;;  %900 = vrot.lane.b32.xlu1 %v7146_v60, %s6194_s21 }
 0x1be   : > { %805 = vrot.lane.b32.xlu0 %v7148_v61, %s6195_s22 }
 0x1bf   : > { %v1079_v35 = vpop.permute.xlu1 %1078 }
 0x1c0   : > { %1125 = vst.msk [vmem:[#allocation4 + $0x10] sm:$0xff] %vm1122_vm4, %v1079_v35  ;;  %v984_v55 = vpop.permute.xlu0 %983  ;;  %v401_v35 = vld [vmem:[%s8879_s1 + $0x158] sm:$0xff] }
 0x1c1   : > { %1029 = vst.msk [vmem:[#allocation4 + $0x18] sm:$0xff] %vm1025_vm3, %v984_v55  ;;  %1284 = vrot.lane.b32.xlu1 %v7008_v58, %s6199_s8  ;;  %v473_v46 = vadd.f32 %v401_v35, %v329_v48  ;;  %v2929_v48 = vld [vmem:[#allocation2 + $0x10f] sm:$0xff] }
 0x1c2   : > { %1189 = vrot.lane.b32.xlu0 %v7212_v34, %s6198_s15 }
 0x1c3   : > { %v1463_v52 = vpop.permute.xlu1 %1462 }
 0x1c4   : > { %1511 = vst.msk [vmem:[#allocation4] sm:$0xff] %vm1510_vm8, %v1463_v52  ;;  %v1368_v53 = vpop.permute.xlu0 %1367 }
 0x1c5   : > { %1415 = vst.msk [vmem:[#allocation4 + $0x8] sm:$0xff] %vm1413_vm7, %v1368_v53  ;;  %997 = vrot.lane.b32.xlu1 %v6968_v19, %s6196_s23  ;;  %v1440_v53 = vld [vmem:[#allocation2 + $0x89] sm:$0xff] }
 0x1c6   : > { %902 = vrot.lane.b32.xlu0 %v7163_v17, %s6194_s21 }
 0x1c7   : > { %v5608_v31 = vpop.f32.mrb[2].mxu1  ;;  %v1081_v57 = vpop.permute.xlu1 %1080 }
 0x1c8   : > { %v2707_v59 = vadd.f32 %v5608_v31, %v7192_v15  ;;  %1126 = vst.msk [vmem:[#allocation4 + $0x18] sm:$0xff] %vm1122_vm4, %v1081_v57  ;;  %v792_v49 = vpop.permute.xlu0 %791  ;;  %v2701_v60 = vpop.f32.mrb[3].mxu1  ;;  %v545_v31 = vmax.f32 %v473_v46, 0.0 }
 0x1c9   : > { %836 = vst.msk [vmem:[#allocation4 + $0x20] sm:$0xff] %vm831_vm1, %v792_v49  ;;  %v2702_v61 = vadd.f32 %v7192_v15, %v2701_v60  ;;  %1381 = vrot.lane.b32.xlu1 %v7260_v54, %s6200_s16 }
 0x1ca   : > { %v2773_v19 = vmax.f32 %v2707_v59, 0.0  ;;  %1286 = vrot.lane.b32.xlu0 %v7025_v1, %s6199_s8  ;;  %v7349_v59 = vld [vmem:[#allocation2 + $0x90] sm:$0xff]  ;;  %v617_v60 = vmin.f32 %v545_v31, 1.0  ;;  %v1250_v31 = vld [vmem:[#allocation2 + $0xa7] sm:$0xff] }
 0x1cb   : > { %v2772_v62 = vmax.f32 %v2702_v61, 0.0  ;;  %v1465_v0 = vpop.permute.xlu1 %1464  ;;  %v1527_v21 = vld [vmem:[#allocation4] sm:$0xff] }
 0x1cc   : > { %1512 = vst.msk [vmem:[#allocation4 + $0x8] sm:$0xff] %vm1510_vm8, %v1465_v0  ;;  %v1176_v17 = vpop.permute.xlu0 %1175  ;;  %5561 = vmatprep.mubr.msk.f32.mxu0 %vm1549_vm9, %v1527_v21  ;;  %v7368_v21 = vld [vmem:[#allocation2 + $0x91] sm:$0xff] }
 0x1cd   : > { %v5922_v6 = vpack.c.bf16 %v2773_v19, %v2772_v62  ;;  %1222 = vst.msk [vmem:[#allocation4 + $0x10] sm:$0xff] %vm1219_vm5, %v1176_v17  ;;  %1094 = vrot.lane.b32.xlu1 %v7214_v7, %s6197_s29  ;;  %v7358_v62 = vld [vmem:[#allocation2 + $0x11f] sm:$0xff] }
 0x1ce   : > { %999 = vrot.lane.b32.xlu0 %v7008_v58, %s6196_s23  ;;  %690 = vst.msk [vmem:[#allocation2 + $0x158] sm:$0xff] %vm646_vm0, %v617_v60 }
 0x1cf   : > { %5923 = vmatpush3.bf16.msra.mxu1 %v5922_v6  ;;  %v889_v8 = vpop.permute.xlu1 %888 }
 0x1d0   : > { %933 = vst.msk [vmem:[#allocation4 + $0x20] sm:$0xff] %vm928_vm2, %v889_v8  ;;  %v794_v10 = vpop.permute.xlu0 %793  ;;  %5924 = vmatprep.subr.bf16.mxu1 %v6202_v40  ;;  %v1248_v8 = vld [vmem:[#allocation2 + $0x97] sm:$0xff] }
 0x1d1   : > { %837 = vst.msk [vmem:[#allocation4 + $0x28] sm:$0xff] %vm831_vm1, %v794_v10  ;;  %1478 = vrot.lane.b32.xlu1 %v7281_v30, %s6201_s17 }
 0x1d2   : > { %1383 = vrot.lane.b32.xlu0 %v7283_v9, %s6200_s16 }
 0x1d3   : > { %v1273_v58 = vpop.permute.xlu1 %1272  ;;  %v1528_v2 = vld [vmem:[#allocation4 + $0x8] sm:$0xff] }
 0x1d4   : > { %1319 = vst.msk [vmem:[#allocation4 + $0x10] sm:$0xff] %vm1316_vm6, %v1273_v58  ;;  %v1178_v12 = vpop.permute.xlu0 %1177  ;;  %5562 = vmatmul.mubr.msk.f32.vlgmr.msra.gmra.mrb[0].mxu0 %vm1549_vm9, %v1528_v2 }
 0x1d5   : > { %1223 = vst.msk [vmem:[#allocation4 + $0x18] sm:$0xff] %vm1219_vm5, %v1178_v12  ;;  %1096 = vrot.lane.b32.xlu1 %v7260_v54, %s6197_s29 }
 0x1d6   : > { %807 = vrot.lane.b32.xlu0 %v7196_v16, %s6195_s22  ;;  %v400_v16 = vld [vmem:[%s8879_s1 + $0x150] sm:$0xff]  ;;  %2945 = vst.msk [vmem:[#allocation4 + $0x8] sm:$0xff] %vm646_vm0, %v2929_v48  ;;  %v3058_v48 = vld [vmem:[#allocation2 + $0x119] sm:$0xff] }
 0x1d7   : > { %v986_v14 = vpop.permute.xlu1 %985  ;;  %v472_v23 = vadd.f32 %v400_v16, %v328_v26 }
 0x1d8   : > { %1030 = vst.msk [vmem:[#allocation4 + $0x20] sm:$0xff] %vm1025_vm3, %v986_v14  ;;  %v891_v50 = vpop.permute.xlu0 %890 }
 0x1d9   : > { %934 = vst.msk [vmem:[#allocation4 + $0x28] sm:$0xff] %vm928_vm2, %v891_v50  ;;  %1480 = vrot.lane.b32.xlu1 %v7300_v13, %s6201_s17  ;;  %v544_v20 = vmax.f32 %v472_v23, 0.0 }
 0x1da   : > { %1191 = vrot.lane.b32.xlu0 %v7229_v22, %s6198_s15 }
 0x1db   : > { %v1370_v24 = vpop.permute.xlu1 %1369  ;;  %v616_v37 = vmin.f32 %v544_v20, 1.0  ;;  %v2928_v20 = vld [vmem:[#allocation2 + $0x107] sm:$0xff] }
 0x1dc   : > { %1416 = vst.msk [vmem:[#allocation4 + $0x10] sm:$0xff] %vm1413_vm7, %v1370_v24  ;;  %v1275_v27 = vpop.permute.xlu0 %1274  ;;  %v1249_v24 = vld [vmem:[#allocation2 + $0x9f] sm:$0xff] }
 0x1dd   : > { %1320 = vst.msk [vmem:[#allocation4 + $0x18] sm:$0xff] %vm1316_vm6, %v1275_v27  ;;  %904 = vrot.lane.b32.xlu1 %v7212_v34, %s6194_s21 }
 0x1de   : > { %809 = vrot.lane.b32.xlu0 %v7214_v7, %s6195_s22  ;;  %689 = vst.msk [vmem:[#allocation2 + $0x150] sm:$0xff] %vm646_vm0, %v616_v37  ;;  %2944 = vst.msk [vmem:[#allocation4] sm:$0xff] %vm646_vm0, %v2928_v20  ;;  %v405_v20 = vld [vmem:[%s8879_s1 + $0x178] sm:$0xff] }
 0x1df   : > { %v1083_v18 = vpop.permute.xlu1 %1082 }
 0x1e0   : > { %1127 = vst.msk [vmem:[#allocation4 + $0x20] sm:$0xff] %vm1122_vm4, %v1083_v18  ;;  %v988_v33 = vpop.permute.xlu0 %987 }
 0x1e1   : > { %1031 = vst.msk [vmem:[#allocation4 + $0x28] sm:$0xff] %vm1025_vm3, %v988_v33  ;;  %1288 = vrot.lane.b32.xlu1 %v1246_v25, %s6199_s8 }
 0x1e2   : > { %1193 = vrot.lane.b32.xlu0 %v7281_v30, %s6198_s15 }
 0x1e3   : > { %v1467_v34 = vpop.permute.xlu1 %1466 }
 0x1e4   : > { %1513 = vst.msk [vmem:[#allocation4 + $0x10] sm:$0xff] %vm1510_vm8, %v1467_v34  ;;  %v1372_v7 = vpop.permute.xlu0 %1371  ;;  %v331_v34 = vld [vmem:[%s6314_s13 + $0x168] sm:$0xff] }
 0x1e5   : > { %1417 = vst.msk [vmem:[#allocation4 + $0x18] sm:$0xff] %vm1413_vm7, %v1372_v7  ;;  %1001 = vrot.lane.b32.xlu1 %v7025_v1, %s6196_s23  ;;  %v403_v7 = vld [vmem:[%s8879_s1 + $0x168] sm:$0xff] }
 0x1e6   : > { %906 = vrot.lane.b32.xlu0 %v7229_v22, %s6194_s21 }
 0x1e7   : > { %v5611_v4 = vpop.f32.mrb[4].mxu1  ;;  %v1085_v39 = vpop.permute.xlu1 %1084 }
 0x1e8   : > { %v2717_v32 = vadd.f32 %v5611_v4, %v7192_v15  ;;  %1128 = vst.msk [vmem:[#allocation4 + $0x28] sm:$0xff] %vm1122_vm4, %v1085_v39  ;;  %v796_v43 = vpop.permute.xlu0 %795  ;;  %v2711_v41 = vpop.f32.mrb[5].mxu1  ;;  %v475_v4 = vadd.f32 %v403_v7, %v331_v34 }
 0x1e9   : > { %838 = vst.msk [vmem:[#allocation4 + $0x30] sm:$0xff] %vm831_vm1, %v796_v43  ;;  %v2712_v44 = vadd.f32 %v7192_v15, %v2711_v41  ;;  %1385 = vrot.lane.b32.xlu1 %v1343_v38, %s6200_s16  ;;  %v1346_v41 = vld [vmem:[#allocation2 + $0xa0] sm:$0xff] }
 0x1ea   : > { %v2775_v1 = vmax.f32 %v2717_v32, 0.0  ;;  %1290 = vrot.lane.b32.xlu0 %v7330_v29, %s6199_s8  ;;  %v547_v32 = vmax.f32 %v475_v4, 0.0 }
 0x1eb   : > { %v2774_v22 = vmax.f32 %v2712_v44, 0.0  ;;  %v1469_v45 = vpop.permute.xlu1 %1468  ;;  %v1529_v28 = vld [vmem:[#allocation4 + $0x10] sm:$0xff] }
 0x1ec   : > { %1514 = vst.msk [vmem:[#allocation4 + $0x18] sm:$0xff] %vm1510_vm8, %v1469_v45  ;;  %v1180_v55 = vpop.permute.xlu0 %1179  ;;  %5564 = vmatprep.mubr.msk.f32.mxu0 %vm1549_vm9, %v1529_v28  ;;  %v7424_v28 = vld [vmem:[#allocation2 + $0x12f] sm:$0xff] }
 0x1ed   : > { %v5925_v52 = vpack.c.bf16 %v2775_v1, %v2774_v22  ;;  %1224 = vst.msk [vmem:[#allocation4 + $0x20] sm:$0xff] %vm1219_vm5, %v1180_v55  ;;  %1098 = vrot.lane.b32.xlu1 %v7283_v9, %s6197_s29  ;;  %v619_v1 = vmin.f32 %v547_v32, 1.0  ;;  %v2960_v55 = vld [vmem:[#allocation2 + $0x108] sm:$0xff] }
 0x1ee   : > { %1003 = vrot.lane.b32.xlu0 %v1246_v25, %s6196_s23 }
 0x1ef   : > { %5926 = vmatpush3.bf16.msra.mxu1 %v5925_v52  ;;  %v893_v57 = vpop.permute.xlu1 %892  ;;  %692 = vst.msk [vmem:[#allocation2 + $0x168] sm:$0xff] %vm646_vm0, %v619_v1  ;;  %v1443_v52 = vld [vmem:[#allocation2 + $0xa1] sm:$0xff] }
 0x1f0   : > { %935 = vst.msk [vmem:[#allocation4 + $0x30] sm:$0xff] %vm928_vm2, %v893_v57  ;;  %v798_v49 = vpop.permute.xlu0 %797  ;;  %5927 = vmatprep.subr.bf16.mxu1 %v6202_v40 }
 0x1f1   : > { %839 = vst.msk [vmem:[#allocation4 + $0x38] sm:$0xff] %vm831_vm1, %v798_v49  ;;  %1482 = vrot.lane.b32.xlu1 %v1440_v53, %s6201_s17  ;;  %v404_v49 = vld [vmem:[%s8879_s1 + $0x170] sm:$0xff] }
 0x1f2   : > { %1387 = vrot.lane.b32.xlu0 %v7349_v59, %s6200_s16 }
 0x1f3   : > { %v1277_v61 = vpop.permute.xlu1 %1276  ;;  %v1530_v19 = vld [vmem:[#allocation4 + $0x18] sm:$0xff] }
 0x1f4   : > { %1321 = vst.msk [vmem:[#allocation4 + $0x20] sm:$0xff] %vm1316_vm6, %v1277_v61  ;;  %v1182_v0 = vpop.permute.xlu0 %1181  ;;  %5565 = vmatmul.mubr.msk.f32.gmra.mrb[2].mxu0 %vm1549_vm9, %v1530_v19  ;;  %v3056_v19 = vld [vmem:[#allocation2 + $0x109] sm:$0xff] }
 0x1f5   : > { %2947 = vst.msk [vmem:[#allocation4 + $0x18] sm:$0xff] %vm646_vm0, %v7358_v62  ;;  %1100 = vrot.lane.b32.xlu1 %v1343_v38, %s6197_s29 }
 0x1f6   : > { %1225 = vst.msk [vmem:[#allocation4 + $0x28] sm:$0xff] %vm1219_vm5, %v1182_v0  ;;  %811 = vrot.lane.b32.xlu0 %v7260_v54, %s6195_s22  ;;  %v402_v54 = vld [vmem:[%s8879_s1 + $0x160] sm:$0xff] }
 0x1f7   : > { %v990_v3 = vpop.permute.xlu1 %989  ;;  %v474_v42 = vadd.f32 %v402_v54, %v330_v5  ;;  %v1347_v5 = vld [vmem:[#allocation2 + $0xa8] sm:$0xff] }
 0x1f8   : > { %1032 = vst.msk [vmem:[#allocation4 + $0x30] sm:$0xff] %vm1025_vm3, %v990_v3  ;;  %v895_v36 = vpop.permute.xlu0 %894  ;;  %v2961_v3 = vld [vmem:[#allocation2 + $0x110] sm:$0xff] }
 0x1f9   : > { %936 = vst.msk [vmem:[#allocation4 + $0x38] sm:$0xff] %vm928_vm2, %v895_v36  ;;  %1484 = vrot.lane.b32.xlu1 %v7368_v21, %s6201_s17  ;;  %v546_v10 = vmax.f32 %v474_v42, 0.0 }
 0x1fa   : > { %1195 = vrot.lane.b32.xlu0 %v7300_v13, %s6198_s15 }
 0x1fb   : > { %v1374_v17 = vpop.permute.xlu1 %1373  ;;  %v618_v2 = vmin.f32 %v546_v10, 1.0 }
 0x1fc   : > { %1418 = vst.msk [vmem:[#allocation4 + $0x20] sm:$0xff] %vm1413_vm7, %v1374_v17  ;;  %v1279_v6 = vpop.permute.xlu0 %1278 }
 0x1fd   : > { %1322 = vst.msk [vmem:[#allocation4 + $0x28] sm:$0xff] %vm1316_vm6, %v1279_v6  ;;  %908 = vrot.lane.b32.xlu1 %v7281_v30, %s6194_s21  ;;  %v1251_v6 = vld [vmem:[#allocation2 + $0xaf] sm:$0xff] }
 0x1fe   : > { %813 = vrot.lane.b32.xlu0 %v7283_v9, %s6195_s22  ;;  %691 = vst.msk [vmem:[#allocation2 + $0x160] sm:$0xff] %vm646_vm0, %v618_v2  ;;  %v1345_v9 = vld [vmem:[#allocation2 + $0x98] sm:$0xff] }
 0x1ff   : > { %v1087_v11 = vpop.permute.xlu1 %1086 }
 0x200   : > { %1129 = vst.msk [vmem:[#allocation4 + $0x30] sm:$0xff] %vm1122_vm4, %v1087_v11  ;;  %v992_v58 = vpop.permute.xlu0 %991 }
 0x201   : > { %1033 = vst.msk [vmem:[#allocation4 + $0x38] sm:$0xff] %vm1025_vm3, %v992_v58  ;;  %1292 = vrot.lane.b32.xlu1 %v1248_v8, %s6199_s8  ;;  %v3057_v58 = vld [vmem:[#allocation2 + $0x111] sm:$0xff] }
 0x202   : > { %1197 = vrot.lane.b32.xlu0 %v1440_v53, %s6198_s15 }
 0x203   : > { %v1471_v12 = vpop.permute.xlu1 %1470 }
 0x204   : > { %1515 = vst.msk [vmem:[#allocation4 + $0x20] sm:$0xff] %vm1510_vm8, %v1471_v12  ;;  %v1376_v30 = vpop.permute.xlu0 %1375 }
 0x205   : > { %1419 = vst.msk [vmem:[#allocation4 + $0x28] sm:$0xff] %vm1413_vm7, %v1376_v30  ;;  %1005 = vrot.lane.b32.xlu1 %v7330_v29, %s6196_s23  ;;  %v1442_v29 = vld [vmem:[#allocation2 + $0x99] sm:$0xff] }
 0x206   : > { %910 = vrot.lane.b32.xlu0 %v7300_v13, %s6194_s21  ;;  %v7403_v13 = vld [vmem:[#allocation2 + $0x127] sm:$0xff] }
 0x207   : > { %v5614_v14 = vpop.f32.mrb[6].mxu1  ;;  %v1089_v50 = vpop.permute.xlu1 %1088 }
 0x208   : > { %v2727_v26 = vadd.f32 %v5614_v14, %v7192_v15  ;;  %1130 = vst.msk [vmem:[#allocation4 + $0x38] sm:$0xff] %vm1122_vm4, %v1089_v50  ;;  %v800_v16 = vpop.permute.xlu0 %799  ;;  %v2721_v27 = vpop.f32.mrb[7].mxu1  ;;  %v1444_v50 = vld [vmem:[#allocation2 + $0xa9] sm:$0xff] }
 0x209   : > { %840 = vst.msk [vmem:[#allocation4 + $0x40] sm:$0xff] %vm831_vm1, %v800_v16  ;;  %v2722_v23 = vadd.f32 %v7192_v15, %v2721_v27  ;;  %1389 = vrot.lane.b32.xlu1 %v1345_v9, %s6200_s16 }
 0x20a   : > { %v2777_v25 = vmax.f32 %v2727_v26, 0.0  ;;  %1294 = vrot.lane.b32.xlu0 %v1249_v24, %s6199_s8  ;;  %v1348_v24 = vld [vmem:[#allocation2 + $0xb0] sm:$0xff] }
 0x20b   : > { %v2776_v18 = vmax.f32 %v2722_v23, 0.0  ;;  %v1473_v33 = vpop.permute.xlu1 %1472  ;;  %v1531_v37 = vld [vmem:[#allocation4 + $0x20] sm:$0xff]  ;;  %v7464_v26 = vld [vmem:[#allocation2 + $0x137] sm:$0xff] }
 0x20c   : > { %1516 = vst.msk [vmem:[#allocation4 + $0x28] sm:$0xff] %vm1510_vm8, %v1473_v33  ;;  %v1184_v38 = vpop.permute.xlu0 %1183  ;;  %5567 = vmatprep.mubr.msk.f32.mxu0 %vm1549_vm9, %v1531_v37  ;;  %v3248_v37 = vld [vmem:[#allocation2 + $0x120] sm:$0xff] }
 0x20d   : > { %2948 = vst.msk [vmem:[#allocation4 + $0x20] sm:$0xff] %vm646_vm0, %v7403_v13  ;;  %v5928_v39 = vpack.c.bf16 %v2777_v25, %v2776_v18  ;;  %1102 = vrot.lane.b32.xlu1 %v7349_v59, %s6197_s29  ;;  %v332_v59 = vld [vmem:[%s6314_s13 + $0x170] sm:$0xff]  ;;  %v333_v25 = vld [vmem:[%s6314_s13 + $0x178] sm:$0xff] }
 0x20e   : > { %1226 = vst.msk [vmem:[#allocation4 + $0x30] sm:$0xff] %vm1219_vm5, %v1184_v38  ;;  %1007 = vrot.lane.b32.xlu0 %v1248_v8, %s6196_s23  ;;  %v476_v61 = vadd.f32 %v404_v49, %v332_v59  ;;  %v2930_v8 = vld [vmem:[#allocation2 + $0x117] sm:$0xff]  ;;  %v7508_v59 = vld [vmem:[#allocation2 + $0x129] sm:$0xff] }
 0x20f   : > { %5929 = vmatpush3.bf16.msra.mxu1 %v5928_v39  ;;  %v897_v43 = vpop.permute.xlu1 %896  ;;  %2946 = vst.msk [vmem:[#allocation4 + $0x10] sm:$0xff] %vm646_vm0, %v2930_v8  ;;  %v2962_v39 = vld [vmem:[#allocation2 + $0x118] sm:$0xff]  ;;  %v7534_v8 = vld [vmem:[#allocation2 + $0x147] sm:$0xff] }
 0x210   : > { %937 = vst.msk [vmem:[#allocation4 + $0x40] sm:$0xff] %vm928_vm2, %v897_v43  ;;  %v802_v44 = vpop.permute.xlu0 %801  ;;  %5930 = vmatprep.subr.bf16.mxu1 %v6202_v40  ;;  %v548_v0 = vmax.f32 %v476_v61, 0.0  ;;  %v1445_v43 = vld [vmem:[#allocation2 + $0xb1] sm:$0xff] }
 0x211   : > { %841 = vst.msk [vmem:[#allocation4 + $0x48] sm:$0xff] %vm831_vm1, %v802_v44  ;;  %1486 = vrot.lane.b32.xlu1 %v1442_v29, %s6201_s17 }
 0x212   : > { %1391 = vrot.lane.b32.xlu0 %v1346_v41, %s6200_s16  ;;  %v620_v17 = vmin.f32 %v548_v0, 1.0  ;;  %v7484_v41 = vld [vmem:[#allocation2 + $0x13f] sm:$0xff] }
 0x213   : > { %v1281_v22 = vpop.permute.xlu1 %1280  ;;  %v1532_v45 = vld [vmem:[#allocation4 + $0x28] sm:$0xff] }
 0x214   : > { %1323 = vst.msk [vmem:[#allocation4 + $0x30] sm:$0xff] %vm1316_vm6, %v1281_v22  ;;  %v1186_v35 = vpop.permute.xlu0 %1185  ;;  %5568 = vmatmul.mubr.msk.f32.gmra.mrb[4].mxu0 %vm1549_vm9, %v1532_v45  ;;  %v7493_v22 = vld [vmem:[#allocation2 + $0x128] sm:$0xff] }
 0x215   : > { %2949 = vst.msk [vmem:[#allocation4 + $0x28] sm:$0xff] %vm646_vm0, %v7424_v28  ;;  %1199 = vrot.lane.b32.xlu1 %v7368_v21, %s6198_s15  ;;  %693 = vst.msk [vmem:[#allocation2 + $0x170] sm:$0xff] %vm646_vm0, %v620_v17 }
 0x216   : > { %1227 = vst.msk [vmem:[#allocation4 + $0x38] sm:$0xff] %vm1219_vm5, %v1186_v35  ;;  %1104 = vrot.lane.b32.xlu0 %v1345_v9, %s6197_s29 }
 0x217   : > { %v994_v46 = vpop.permute.xlu1 %993 }
 0x218   : > { %1034 = vst.msk [vmem:[#allocation4 + $0x40] sm:$0xff] %vm1025_vm3, %v994_v46  ;;  %v899_v53 = vpop.permute.xlu0 %898  ;;  %v406_v46 = vld [vmem:[%s8879_s1 + $0x180] sm:$0xff] }
 0x219   : > { %938 = vst.msk [vmem:[#allocation4 + $0x48] sm:$0xff] %vm928_vm2, %v899_v53  ;;  %2992 = vrot.lane.b32.xlu1 %v2960_v55, %s6195_s22  ;;  %v334_v55 = vld [vmem:[%s6314_s13 + $0x180] sm:$0xff] }
 0x21a   : > { %1488 = vrot.lane.b32.xlu0 %v1443_v52, %s6201_s17  ;;  %v478_v53 = vadd.f32 %v406_v46, %v334_v55 }
 0x21b   : > { %v1378_v57 = vpop.permute.xlu1 %1377 }
 0x21c   : > { %1420 = vst.msk [vmem:[#allocation4 + $0x30] sm:$0xff] %vm1413_vm7, %v1378_v57  ;;  %v1283_v60 = vpop.permute.xlu0 %1282 }
 0x21d   : > { %1324 = vst.msk [vmem:[#allocation4 + $0x38] sm:$0xff] %vm1316_vm6, %v1283_v60  ;;  %1296 = vrot.lane.b32.xlu1 %v1250_v31, %s6199_s8  ;;  %v550_v31 = vmax.f32 %v478_v53, 0.0 }
 0x21e   : > { %1201 = vrot.lane.b32.xlu0 %v1442_v29, %s6198_s15 }
 0x21f   : > { %v1091_v21 = vpop.permute.xlu1 %1090  ;;  %v622_v60 = vmin.f32 %v550_v31, 1.0 }
 0x220   : > { %1131 = vst.msk [vmem:[#allocation4 + $0x40] sm:$0xff] %vm1122_vm4, %v1091_v21  ;;  %v996_v36 = vpop.permute.xlu0 %995  ;;  %v7524_v21 = vld [vmem:[#allocation2 + $0x138] sm:$0xff] }
 0x221   : > { %1035 = vst.msk [vmem:[#allocation4 + $0x48] sm:$0xff] %vm1025_vm3, %v996_v36  ;;  %3088 = vrot.lane.b32.xlu1 %v3056_v19, %s6194_s21  ;;  %v6204_v19 = vmov 0.0  }
 0x222   : > { %2994 = vrot.lane.b32.xlu0 %v2961_v3, %s6195_s22  ;;  %695 = vst.msk [vmem:[#allocation2 + $0x180] sm:$0xff] %vm646_vm0, %v622_v60  ;;  %5659 = vmatprep.mubr.msk.f32.mxu1 %vm6203_vm10, %v6204_v19 }
 0x223   : > { %v1475_v54 = vpop.permute.xlu1 %1474 }
 0x224   : > { %1517 = vst.msk [vmem:[#allocation4 + $0x30] sm:$0xff] %vm1510_vm8, %v1475_v54  ;;  %v1380_v42 = vpop.permute.xlu0 %1379 }
 0x225   : > { %1421 = vst.msk [vmem:[#allocation4 + $0x38] sm:$0xff] %vm1413_vm7, %v1380_v42  ;;  %1393 = vrot.lane.b32.xlu1 %v1347_v5, %s6200_s16  ;;  %v3250_v42 = vld [vmem:[#allocation2 + $0x130] sm:$0xff] }
 0x226   : > { %1298 = vrot.lane.b32.xlu0 %v1251_v6, %s6199_s8 }
 0x227   : > { %v5617_v10 = vpop.f32.mrb[8].mxu1  ;;  %v1093_v11 = vpop.permute.xlu1 %1092 }
 0x228   : > { %v2737_v2 = vadd.f32 %v5617_v10, %v7192_v15  ;;  %1132 = vst.msk [vmem:[#allocation4 + $0x48] sm:$0xff] %vm1122_vm4, %v1093_v11  ;;  %v804_v12 = vpop.permute.xlu0 %803  ;;  %v2731_v30 = vpop.f32.mrb[9].mxu1 }
 0x229   : > { %842 = vst.msk [vmem:[#allocation4 + $0x50] sm:$0xff] %vm831_vm1, %v804_v12  ;;  %v2732_v9 = vadd.f32 %v7192_v15, %v2731_v30  ;;  %3184 = vrot.lane.b32.xlu1 %v7358_v62, %s6196_s23  ;;  %v477_v62 = vadd.f32 %v405_v20, %v333_v25  ;;  %v407_v12 = vld [vmem:[%s8879_s1 + $0x188] sm:$0xff] }
 0x22a   : > { %v2779_v14 = vmax.f32 %v2737_v2, 0.0  ;;  %3090 = vrot.lane.b32.xlu0 %v3057_v58, %s6194_s21  ;;  %v335_v2 = vld [vmem:[%s6314_s13 + $0x188] sm:$0xff] }
 0x22b   : > { %v2778_v16 = vmax.f32 %v2732_v9, 0.0  ;;  %v1477_v27 = vpop.permute.xlu1 %1476  ;;  %v1533_v23 = vld [vmem:[#allocation4 + $0x30] sm:$0xff]  ;;  %v549_v34 = vmax.f32 %v477_v62, 0.0  ;;  %v479_v9 = vadd.f32 %v407_v12, %v335_v2  ;;  %v7644_v2 = vld [vmem:[#allocation2 + $0x15f] sm:$0xff] }
 0x22c   : > { %1518 = vst.msk [vmem:[#allocation4 + $0x38] sm:$0xff] %vm1510_vm8, %v1477_v27  ;;  %v1188_v18 = vpop.permute.xlu0 %1187  ;;  %5570 = vmatprep.mubr.msk.f32.mxu0 %vm1549_vm9, %v1533_v23  ;;  %v7550_v27 = vld [vmem:[#allocation2 + $0x140] sm:$0xff] }
 0x22d   : > { %2950 = vst.msk [vmem:[#allocation4 + $0x30] sm:$0xff] %vm646_vm0, %v7464_v26  ;;  %v5931_v33 = vpack.c.bf16 %v2779_v14, %v2778_v16  ;;  %1490 = vrot.lane.b32.xlu1 %v1444_v50, %s6201_s17  ;;  %v621_v4 = vmin.f32 %v549_v34, 1.0  ;;  %v7548_v50 = vld [vmem:[#allocation2 + $0x139] sm:$0xff]  ;;  %v3346_v34 = vld [vmem:[#allocation2 + $0x131] sm:$0xff] }
 0x22e   : > { %1228 = vst.msk [vmem:[#allocation4 + $0x40] sm:$0xff] %vm1219_vm5, %v1188_v18  ;;  %1395 = vrot.lane.b32.xlu0 %v1348_v24, %s6200_s16  ;;  %v551_v24 = vmax.f32 %v479_v9, 0.0  ;;  %v7560_v18 = vld [vmem:[#allocation2 + $0x14f] sm:$0xff]  ;;  %v7654_v9 = vld [vmem:[%s8882_s4] ss:$0 sm:$0xff] }
 0x22f   : > { %5932 = vmatpush3.bf16.msra.mxu1 %v5931_v33  ;;  %v901_v7 = vpop.permute.xlu1 %900  ;;  %694 = vst.msk [vmem:[#allocation2 + $0x178] sm:$0xff] %vm646_vm0, %v621_v4  ;;  %v7571_v33 = vld [vmem:[#allocation2 + $0x141] sm:$0xff]  ;;  %v336_v4 = vld [vmem:[%s6314_s13 + $0x190] sm:$0xff] }
 0x230   : > { %939 = vst.msk [vmem:[#allocation4 + $0x50] sm:$0xff] %vm928_vm2, %v901_v7  ;;  %v806_v38 = vpop.permute.xlu0 %805  ;;  %5933 = vmatprep.subr.bf16.mxu1 %v6202_v40  ;;  %v623_v25 = vmin.f32 %v551_v24, 1.0 }
 0x231   : > { %843 = vst.msk [vmem:[#allocation4 + $0x58] sm:$0xff] %vm831_vm1, %v806_v38  ;;  %3280 = vrot.lane.b32.xlu1 %v3248_v37, %s6197_s29 }
 0x232   : > { %3186 = vrot.lane.b32.xlu0 %v7403_v13, %s6196_s23  ;;  %v3344_v13 = vld [vmem:[#allocation2 + $0x121] sm:$0xff]  ;;  %696 = vst.msk [vmem:[#allocation2 + $0x188] sm:$0xff] %vm646_vm0, %v623_v25 }
 0x233   : > { %v1285_v29 = vpop.permute.xlu1 %1284  ;;  %v1534_v32 = vld [vmem:[#allocation4 + $0x38] sm:$0xff] }
 0x234   : > { %1325 = vst.msk [vmem:[#allocation4 + $0x40] sm:$0xff] %vm1316_vm6, %v1285_v29  ;;  %v1190_v44 = vpop.permute.xlu0 %1189  ;;  %5571 = vmatmul.mubr.msk.f32.gmra.mrb[6].mxu0 %vm1549_vm9, %v1534_v32 }
 0x235   : > { %2951 = vst.msk [vmem:[#allocation4 + $0x38] sm:$0xff] %vm646_vm0, %v7484_v41  ;;  %2996 = vrot.lane.b32.xlu1 %v2962_v39, %s6195_s22  ;;  %v408_v39 = vld [vmem:[%s8879_s1 + $0x190] sm:$0xff] }
 0x236   : > { %1229 = vst.msk [vmem:[#allocation4 + $0x48] sm:$0xff] %vm1219_vm5, %v1190_v44  ;;  %1492 = vrot.lane.b32.xlu0 %v1445_v43, %s6201_s17  ;;  %v480_v32 = vadd.f32 %v408_v39, %v336_v4  ;;  %v5320_v4 = vld [vmem:[%s8880_s2 + $0x1] sm:$0x1] }
 0x237   : > { %v998_v1 = vpop.permute.xlu1 %997 }
 0x238   : > { %1036 = vst.msk [vmem:[#allocation4 + $0x50] sm:$0xff] %vm1025_vm3, %v998_v1  ;;  %v903_v45 = vpop.permute.xlu0 %902  ;;  %v552_v43 = vmax.f32 %v480_v32, 0.0 }
 0x239   : > { %940 = vst.msk [vmem:[#allocation4 + $0x58] sm:$0xff] %vm928_vm2, %v903_v45  ;;  %3376 = vrot.lane.b32.xlu1 %v3344_v13, %s6198_s15 }
 0x23a   : > { %3282 = vrot.lane.b32.xlu0 %v7493_v22, %s6197_s29  ;;  %v624_v1 = vmin.f32 %v552_v43, 1.0 }
 0x23b   : > { %v1382_v35 = vpop.permute.xlu1 %1381 }
 0x23c   : > { %1422 = vst.msk [vmem:[#allocation4 + $0x40] sm:$0xff] %vm1413_vm7, %v1382_v35  ;;  %v1287_v52 = vpop.permute.xlu0 %1286  ;;  %v7603_v35 = vld [vmem:[#allocation2 + $0x148] sm:$0xff] }
 0x23d   : > { %1326 = vst.msk [vmem:[#allocation4 + $0x48] sm:$0xff] %vm1316_vm6, %v1287_v52  ;;  %3092 = vrot.lane.b32.xlu1 %v3058_v48, %s6194_s21 }
 0x23e   : > { %2998 = vrot.lane.b32.xlu0 %v3248_v37, %s6195_s22  ;;  %697 = vst.msk [vmem:[#allocation2 + $0x190] sm:$0xff] %vm646_vm0, %v624_v1  ;;  %v7705_v1 = vld [vmem:[#allocation2 + $0x158] sm:$0xff] }
 0x23f   : > { %v1095_v57 = vpop.permute.xlu1 %1094 }
 0x240   : > { %1133 = vst.msk [vmem:[#allocation4 + $0x50] sm:$0xff] %vm1122_vm4, %v1095_v57  ;;  %v1000_v49 = vpop.permute.xlu0 %999 }
 0x241   : > { %1037 = vst.msk [vmem:[#allocation4 + $0x58] sm:$0xff] %vm1025_vm3, %v1000_v49  ;;  %3472 = vrot.lane.b32.xlu1 %v7464_v26, %s6199_s8  ;;  %v7615_v49 = vld [vmem:[#allocation2 + $0x157] sm:$0xff] }
 0x242   : > { %3378 = vrot.lane.b32.xlu0 %v7508_v59, %s6198_s15 }
 0x243   : > { %v1479_v61 = vpop.permute.xlu1 %1478 }
 0x244   : > { %1519 = vst.msk [vmem:[#allocation4 + $0x40] sm:$0xff] %vm1510_vm8, %v1479_v61  ;;  %v1384_v0 = vpop.permute.xlu0 %1383 }
 0x245   : > { %1423 = vst.msk [vmem:[#allocation4 + $0x48] sm:$0xff] %vm1413_vm7, %v1384_v0  ;;  %3188 = vrot.lane.b32.xlu1 %v7424_v28, %s6196_s23 }
 0x246   : > { %3094 = vrot.lane.b32.xlu0 %v3344_v13, %s6194_s21 }
 0x247   : > { %v5620_v3 = vpop.f32.mrb[10].mxu1  ;;  %v1097_v36 = vpop.permute.xlu1 %1096 }
 0x248   : > { %v2747_v17 = vadd.f32 %v5620_v3, %v7192_v15  ;;  %1134 = vst.msk [vmem:[#allocation4 + $0x58] sm:$0xff] %vm1122_vm4, %v1097_v36  ;;  %v808_v5 = vpop.permute.xlu0 %807  ;;  %v2741_v54 = vpop.f32.mrb[11].mxu1  ;;  %v337_v3 = vld [vmem:[%s6314_s13 + $0x198] sm:$0xff] }
 0x249   : > { %844 = vst.msk [vmem:[#allocation4 + $0x60] sm:$0xff] %vm831_vm1, %v808_v5  ;;  %v2742_v6 = vadd.f32 %v7192_v15, %v2741_v54  ;;  %3568 = vrot.lane.b32.xlu1 %v7524_v21, %s6200_s16  ;;  %v7632_v54 = vld [vmem:[#allocation2 + $0x149] sm:$0xff] }
 0x24a   : > { %v2781_v28 = vmax.f32 %v2747_v17, 0.0  ;;  %3474 = vrot.lane.b32.xlu0 %v7484_v41, %s6199_s8 }
 0x24b   : > { %v2780_v10 = vmax.f32 %v2742_v6, 0.0  ;;  %v1481_v11 = vpop.permute.xlu1 %1480  ;;  %v1535_v58 = vld [vmem:[#allocation4 + $0x40] sm:$0xff] }
 0x24c   : > { %1520 = vst.msk [vmem:[#allocation4 + $0x48] sm:$0xff] %vm1510_vm8, %v1481_v11  ;;  %v1192_v30 = vpop.permute.xlu0 %1191  ;;  %5573 = vmatprep.mubr.msk.f32.mxu0 %vm1549_vm9, %v1535_v58 }
 0x24d   : > { %2952 = vst.msk [vmem:[#allocation4 + $0x40] sm:$0xff] %vm646_vm0, %v7534_v8  ;;  %v5934_v14 = vpack.c.bf16 %v2781_v28, %v2780_v10  ;;  %3284 = vrot.lane.b32.xlu1 %v3250_v42, %s6197_s29 }
 0x24e   : > { %1230 = vst.msk [vmem:[#allocation4 + $0x50] sm:$0xff] %vm1219_vm5, %v1192_v30  ;;  %3190 = vrot.lane.b32.xlu0 %v7464_v26, %s6196_s23 }
 0x24f   : > { %5935 = vmatpush3.bf16.msra.mxu1 %v5934_v14  ;;  %v905_v16 = vpop.permute.xlu1 %904 }
 0x250   : > { %941 = vst.msk [vmem:[#allocation4 + $0x60] sm:$0xff] %vm928_vm2, %v905_v16  ;;  %v810_v23 = vpop.permute.xlu0 %809  ;;  %5936 = vmatprep.subr.bf16.mxu1 %v6202_v40 }
 0x251   : > { %845 = vst.msk [vmem:[#allocation4 + $0x68] sm:$0xff] %vm831_vm1, %v810_v23  ;;  %3664 = vrot.lane.b32.xlu1 %v7548_v50, %s6201_s17  ;;  %v7662_v23 = vld [vmem:[#allocation2 + $0x151] sm:$0xff] }
 0x252   : > { %3570 = vrot.lane.b32.xlu0 %v7550_v27, %s6200_s16 }
 0x253   : > { %v1289_v26 = vpop.permute.xlu1 %1288  ;;  %v1536_v20 = vld [vmem:[#allocation4 + $0x48] sm:$0xff] }
 0x254   : > { %1327 = vst.msk [vmem:[#allocation4 + $0x50] sm:$0xff] %vm1316_vm6, %v1289_v26  ;;  %v1194_v62 = vpop.permute.xlu0 %1193  ;;  %5574 = vmatmul.mubr.msk.f32.gmra.mrb[8].mxu0 %vm1549_vm9, %v1536_v20 }
 0x255   : > { %2953 = vst.msk [vmem:[#allocation4 + $0x48] sm:$0xff] %vm646_vm0, %v7560_v18  ;;  %3286 = vrot.lane.b32.xlu1 %v7524_v21, %s6197_s29 }
 0x256   : > { %1231 = vst.msk [vmem:[#allocation4 + $0x58] sm:$0xff] %vm1219_vm5, %v1194_v62  ;;  %3000 = vrot.lane.b32.xlu0 %v7493_v22, %s6195_s22  ;;  %v7591_v22 = vld [vmem:[#allocation2 + $0x187] sm:$0xff] }
 0x257   : > { %v1002_v37 = vpop.permute.xlu1 %1001  ;;  %4042 = vst.msk [vmem:[#allocation4 + $0x80] sm:$0xff] %vm646_vm0, %v7591_v22 }
 0x258   : > { %1038 = vst.msk [vmem:[#allocation4 + $0x60] sm:$0xff] %vm1025_vm3, %v1002_v37  ;;  %v907_v7 = vpop.permute.xlu0 %906 }
 0x259   : > { %942 = vst.msk [vmem:[#allocation4 + $0x68] sm:$0xff] %vm928_vm2, %v907_v7  ;;  %3666 = vrot.lane.b32.xlu1 %v7571_v33, %s6201_s17  ;;  %v338_v7 = vld [vmem:[%s6314_s13 + $0x1a0] sm:$0xff] }
 0x25a   : > { %3380 = vrot.lane.b32.xlu0 %v3346_v34, %s6198_s15 }
 0x25b   : > { %v1386_v38 = vpop.permute.xlu1 %1385 }
 0x25c   : > { %1424 = vst.msk [vmem:[#allocation4 + $0x50] sm:$0xff] %vm1413_vm7, %v1386_v38  ;;  %v1291_v29 = vpop.permute.xlu0 %1290 }
 0x25d   : > { %1328 = vst.msk [vmem:[#allocation4 + $0x58] sm:$0xff] %vm1316_vm6, %v1291_v29  ;;  %3096 = vrot.lane.b32.xlu1 %v7508_v59, %s6194_s21 }
 0x25e   : > { %3002 = vrot.lane.b32.xlu0 %v3250_v42, %s6195_s22  ;;  %v7634_v42 = vld [vmem:[#allocation2 + $0x150] sm:$0xff] }
 0x25f   : > { %v1099_v44 = vpop.permute.xlu1 %1098 }
 0x260   : > { %1135 = vst.msk [vmem:[#allocation4 + $0x60] sm:$0xff] %vm1122_vm4, %v1099_v44  ;;  %v1004_v13 = vpop.permute.xlu0 %1003 }
 0x261   : > { %1039 = vst.msk [vmem:[#allocation4 + $0x68] sm:$0xff] %vm1025_vm3, %v1004_v13  ;;  %3476 = vrot.lane.b32.xlu1 %v7534_v8, %s6199_s8 }
 0x262   : > { %3382 = vrot.lane.b32.xlu0 %v7548_v50, %s6198_s15 }
 0x263   : > { %v1483_v45 = vpop.permute.xlu1 %1482 }
 0x264   : > { %1521 = vst.msk [vmem:[#allocation4 + $0x50] sm:$0xff] %vm1510_vm8, %v1483_v45  ;;  %v1388_v48 = vpop.permute.xlu0 %1387 }
 0x265   : > { %1425 = vst.msk [vmem:[#allocation4 + $0x58] sm:$0xff] %vm1413_vm7, %v1388_v48  ;;  %3192 = vrot.lane.b32.xlu1 %v7484_v41, %s6196_s23  ;;  %v7611_v41 = vld [vmem:[#allocation2 + $0x18f] sm:$0xff] }
 0x266   : > { %3098 = vrot.lane.b32.xlu0 %v3346_v34, %s6194_s21  ;;  %4043 = vst.msk [vmem:[#allocation4 + $0x88] sm:$0xff] %vm646_vm0, %v7611_v41 }
 0x267   : > { %v1101_v46 = vpop.permute.xlu1 %1100 }
 0x268   : > { %v5623_v55 = vpop.f32.mrb[12].mxu1  ;;  %1136 = vst.msk [vmem:[#allocation4 + $0x68] sm:$0xff] %vm1122_vm4, %v1101_v46  ;;  %v812_v53 = vpop.permute.xlu0 %811 }
 0x269   : > { %v2757_v52 = vadd.f32 %v5623_v55, %v7192_v15  ;;  %v2751_v31 = vpop.f32.mrb[13].mxu1  ;;  %846 = vst.msk [vmem:[#allocation4 + $0x70] sm:$0xff] %vm831_vm1, %v812_v53  ;;  %3572 = vrot.lane.b32.xlu1 %v7603_v35, %s6200_s16  ;;  %v411_v53 = vld [vmem:[%s8879_s1 + $0x1a8] sm:$0xff] }
 0x26a   : > { %v2752_v57 = vadd.f32 %v7192_v15, %v2751_v31  ;;  %3478 = vrot.lane.b32.xlu0 %v7560_v18, %s6199_s8  ;;  %v409_v15 = vld [vmem:[%s8879_s1 + $0x198] sm:$0xff] }
 0x26b   : > { %v2783_v59 = vmax.f32 %v2757_v52, 0.0  ;;  %v1485_v61 = vpop.permute.xlu1 %1484  ;;  %v1537_v0 = vld [vmem:[#allocation4 + $0x50] sm:$0xff]  ;;  %v481_v17 = vadd.f32 %v409_v15, %v337_v3  ;;  %v339_v52 = vld [vmem:[%s6314_s13 + $0x1a8] sm:$0xff]  ;;  %v7743_v3 = vld [vmem:[#allocation2 + $0x160] sm:$0xff] }
 0x26c   : > { %v2782_v60 = vmax.f32 %v2752_v57, 0.0  ;;  %1522 = vst.msk [vmem:[#allocation4 + $0x58] sm:$0xff] %vm1510_vm8, %v1485_v61  ;;  %v1196_v36 = vpop.permute.xlu0 %1195  ;;  %5576 = vmatprep.mubr.msk.f32.mxu0 %vm1549_vm9, %v1537_v0  ;;  %v483_v57 = vadd.f32 %v411_v53, %v339_v52  ;;  %v7832_v53 = vld [vmem:[#allocation2 + $0x170] sm:$0xff] }
 0x26d   : > { %2954 = vst.msk [vmem:[#allocation4 + $0x50] sm:$0xff] %vm646_vm0, %v7615_v49  ;;  %3288 = vrot.lane.b32.xlu1 %v7550_v27, %s6197_s29  ;;  %v553_v6 = vmax.f32 %v481_v17, 0.0 }
 0x26e   : > { %v5937_v5 = vpack.c.bf16 %v2783_v59, %v2782_v60  ;;  %1232 = vst.msk [vmem:[#allocation4 + $0x60] sm:$0xff] %vm1219_vm5, %v1196_v36  ;;  %3194 = vrot.lane.b32.xlu0 %v7534_v8, %s6196_s23  ;;  %v7736_v59 = vld [vmem:[%s8881_s3 + $0x40] sm:$0xff]  ;;  %v555_v61 = vmax.f32 %v483_v57, 0.0 }
 0x26f   : > { %v909_v28 = vpop.permute.xlu1 %908  ;;  %v625_v11 = vmin.f32 %v553_v6, 1.0  ;;  %v7741_v60 = vld [vmem:[#allocation2 + $0x159] sm:$0xff]  ;;  %v7755_v6 = vld [vmem:[#allocation2 + $0x16f] sm:$0xff] }
 0x270   : > { %5938 = vmatpush3.bf16.msra.mxu1 %v5937_v5  ;;  %943 = vst.msk [vmem:[#allocation4 + $0x70] sm:$0xff] %vm928_vm2, %v909_v28  ;;  %v814_v10 = vpop.permute.xlu0 %813  ;;  %v627_v36 = vmin.f32 %v555_v61, 1.0  ;;  %v7765_v28 = vld [vmem:[#allocation2 + $0x161] sm:$0xff] }
 0x271   : > { %5939 = vmatprep.subr.bf16.mxu1 %v6202_v40  ;;  %847 = vst.msk [vmem:[#allocation4 + $0x78] sm:$0xff] %vm831_vm1, %v814_v10  ;;  %3668 = vrot.lane.b32.xlu1 %v7632_v54, %s6201_s17  ;;  %v7835_v61 = vld [vmem:[#allocation2 + $0x17f] sm:$0xff] }
 0x272   : > { %3574 = vrot.lane.b32.xlu0 %v7634_v42, %s6200_s16  ;;  %698 = vst.msk [vmem:[#allocation2 + $0x198] sm:$0xff] %vm646_vm0, %v625_v11  ;;  %700 = vst.msk [vmem:[#allocation2 + $0x1a8] sm:$0xff] %vm646_vm0, %v627_v36  ;;  %v340_v11 = vld [vmem:[%s6314_s13 + $0x1b0] sm:$0xff] }
 0x273   : > { %v1293_v8 = vpop.permute.xlu1 %1292  ;;  %v1538_v58 = vld [vmem:[#allocation4 + $0x58] sm:$0xff] }
 0x274   : > { %1329 = vst.msk [vmem:[#allocation4 + $0x60] sm:$0xff] %vm1316_vm6, %v1293_v8  ;;  %v1198_v12 = vpop.permute.xlu0 %1197  ;;  %5577 = vmatmul.mubr.msk.f32.gmra.mrb[10].mxu0 %vm1549_vm9, %v1538_v58  ;;  %v412_v8 = vld [vmem:[%s8879_s1 + $0x1b0] sm:$0xff] }
 0x275   : > { %v5626_v30 = vpop.f32.mrb[14].mxu1  ;;  %2955 = vst.msk [vmem:[#allocation4 + $0x58] sm:$0xff] %vm646_vm0, %v7644_v2  ;;  %3290 = vrot.lane.b32.xlu1 %v7603_v35, %s6197_s29 }
 0x276   : > { %1233 = vst.msk [vmem:[#allocation4 + $0x68] sm:$0xff] %vm1219_vm5, %v1198_v12  ;;  %v2767_v14 = vadd.f32 %v7654_v9, %v5626_v30  ;;  %v2761_v24 = vpop.f32.mrb[15].mxu1  ;;  %3004 = vrot.lane.b32.xlu0 %v7524_v21, %s6195_s22  ;;  %v410_v21 = vld [vmem:[%s8879_s1 + $0x1a0] sm:$0xff]  ;;  %v484_v12 = vadd.f32 %v412_v8, %v340_v11 }
 0x277   : > { %v2762_v16 = vadd.f32 %v7654_v9, %v2761_v24  ;;  %v1006_v26 = vpop.permute.xlu1 %1005  ;;  %v482_v39 = vadd.f32 %v410_v21, %v338_v7 }
 0x278   : > { %v2785_v25 = vmax.f32 %v2767_v14, 0.0  ;;  %1040 = vst.msk [vmem:[#allocation4 + $0x70] sm:$0xff] %vm1025_vm3, %v1006_v26  ;;  %v911_v62 = vpop.permute.xlu0 %910 }
 0x279   : > { %v2784_v20 = vmax.f32 %v2762_v16, 0.0  ;;  %944 = vst.msk [vmem:[#allocation4 + $0x78] sm:$0xff] %vm928_vm2, %v911_v62  ;;  %3670 = vrot.lane.b32.xlu1 %v7662_v23, %s6201_s17  ;;  %v554_v29 = vmax.f32 %v482_v39, 0.0  ;;  %v7802_v62 = vld [vmem:[#allocation2 + $0x168] sm:$0xff] }
 0x27a   : > { %3384 = vrot.lane.b32.xlu0 %v7571_v33, %s6198_s15 }
 0x27b   : > { %v5940_v37 = vpack.c.bf16 %v2785_v25, %v2784_v20  ;;  %v1390_v34 = vpop.permute.xlu1 %1389  ;;  %v626_v44 = vmin.f32 %v554_v29, 1.0 }
 0x27c   : > { %1426 = vst.msk [vmem:[#allocation4 + $0x60] sm:$0xff] %vm1413_vm7, %v1390_v34  ;;  %v1295_v38 = vpop.permute.xlu0 %1294 }
 0x27d   : > { %5941 = vmatpush3.bf16.msra.mxu1 %v5940_v37  ;;  %1330 = vst.msk [vmem:[#allocation4 + $0x68] sm:$0xff] %vm1316_vm6, %v1295_v38  ;;  %3100 = vrot.lane.b32.xlu1 %v7548_v50, %s6194_s21  ;;  %v7690_v50 = vld [vmem:[#allocation2 + $0x197] sm:$0xff] }
 0x27e   : > { %5967 = vmatprep.subr.bf16.mxu1 %v6449_v47  ;;  %3006 = vrot.lane.b32.xlu0 %v7550_v27, %s6195_s22  ;;  %699 = vst.msk [vmem:[#allocation2 + $0x1a0] sm:$0xff] %vm646_vm0, %v626_v44  ;;  %4044 = vst.msk [vmem:[#allocation4 + $0x90] sm:$0xff] %vm646_vm0, %v7690_v50  ;;  %v7804_v37 = vld [vmem:[#allocation2 + $0x177] sm:$0xff] }
 0x27f   : > { %v1103_v32 = vpop.permute.xlu1 %1102  ;;  %v341_v38 = vld [vmem:[%s6314_s13 + $0x1b8] sm:$0xff] }
 0x280   : > { %5660 = vmatmul.mubr.f32.vlgmr.msra.gmra.mrb[16].mxu1 %v5320_v4  ;;  %1137 = vst.msk [vmem:[#allocation4 + $0x70] sm:$0xff] %vm1122_vm4, %v1103_v32  ;;  %v1008_v43 = vpop.permute.xlu0 %1007 }
 0x281   : > { %5969 = vmatpush3.bf16.msra.mxu1 %v6449_v47  ;;  %1041 = vst.msk [vmem:[#allocation4 + $0x78] sm:$0xff] %vm1025_vm3, %v1008_v43  ;;  %3480 = vrot.lane.b32.xlu1 %v7615_v49, %s6199_s8 }
 0x282   : > { %5971 = vmatprep.subr.bf16.mxu1 %v6468_v51  ;;  %3386 = vrot.lane.b32.xlu0 %v7632_v54, %s6198_s15 }
 0x283   : > { %v1487_v27 = vpop.permute.xlu1 %1486 }
 0x284   : > { %1523 = vst.msk [vmem:[#allocation4 + $0x60] sm:$0xff] %vm1510_vm8, %v1487_v27  ;;  %v1392_v13 = vpop.permute.xlu0 %1391 }
 0x285   : > { %5973 = vmatpush3.bf16.msra.mxu1 %v6468_v51  ;;  %1427 = vst.msk [vmem:[#allocation4 + $0x68] sm:$0xff] %vm1413_vm7, %v1392_v13  ;;  %3196 = vrot.lane.b32.xlu1 %v7560_v18, %s6196_s23  ;;  %v7713_v18 = vld [vmem:[#allocation2 + $0x19f] sm:$0xff]  ;;  %v7781_v16 = vld [vmem:[#allocation2 + $0x1a7] sm:$0xff] }
 0x286   : > { %5975 = vmatprep.subr.bf16.mxu1 %v6489_v56  ;;  %3102 = vrot.lane.b32.xlu0 %v7571_v33, %s6194_s21  ;;  %v7717_v33 = vld [vmem:[#allocation2 + $0x167] sm:$0xff]  ;;  %4045 = vst.msk [vmem:[#allocation4 + $0x98] sm:$0xff] %vm646_vm0, %v7713_v18  ;;  %4046 = vst.msk [vmem:[#allocation4 + $0xa0] sm:$0xff] %vm646_vm0, %v7781_v16 }
 0x287   : > { %v1200_v45 = vpop.permute.xlu1 %1199 }
 0x288   : > { %1234 = vst.msk [vmem:[#allocation4 + $0x70] sm:$0xff] %vm1219_vm5, %v1200_v45  ;;  %v1105_v48 = vpop.permute.xlu0 %1104 }
 0x289   : > { %5977 = vmatpush3.bf16.msra.mxu1 %v6489_v56  ;;  %1138 = vst.msk [vmem:[#allocation4 + $0x78] sm:$0xff] %vm1122_vm4, %v1105_v48  ;;  %3576 = vrot.lane.b32.xlu1 %v7705_v1, %s6200_s16 }
 0x28a   : > { %5979 = vmatprep.subr.bf16.mxu1 %v6511_v63  ;;  %3482 = vrot.lane.b32.xlu0 %v7644_v2, %s6199_s8 }
 0x28b   : > { %v2993_v55 = vpop.permute.xlu1 %2992  ;;  %v1539_v46 = vld [vmem:[#allocation4 + $0x60] sm:$0xff] }
 0x28c   : > { %3040 = vst.msk [vmem:[#allocation4] sm:$0xff] %vm831_vm1, %v2993_v55  ;;  %v1489_v31 = vpop.permute.xlu0 %1488  ;;  %5579 = vmatprep.mubr.msk.f32.mxu0 %vm1549_vm9, %v1539_v46  ;;  %v7829_v46 = vld [vmem:[#allocation2 + $0x169] sm:$0xff] }
 0x28d   : > { %5981 = vmatpush3.bf16.msra.mxu1 %v6511_v63  ;;  %2956 = vst.msk [vmem:[#allocation4 + $0x60] sm:$0xff] %vm646_vm0, %v7717_v33  ;;  %3292 = vrot.lane.b32.xlu1 %v7634_v42, %s6197_s29 }
 0x28e   : > { %1524 = vst.msk [vmem:[#allocation4 + $0x68] sm:$0xff] %vm1510_vm8, %v1489_v31  ;;  %5713 = vmatprep.subr.mxu1 %v7736_v59  ;;  %3198 = vrot.lane.b32.xlu0 %v7615_v49, %s6196_s23 }
 0x28f   : > { %v1297_v0 = vpop.permute.xlu1 %1296 }
 0x290   : > { %1331 = vst.msk [vmem:[#allocation4 + $0x70] sm:$0xff] %vm1316_vm6, %v1297_v0  ;;  %v1202_v15 = vpop.permute.xlu0 %1201 }
 0x291   : > { %5714 = vmatpush3.msra.mxu1 %v7736_v59  ;;  %1235 = vst.msk [vmem:[#allocation4 + $0x78] sm:$0xff] %vm1219_vm5, %v1202_v15  ;;  %3672 = vrot.lane.b32.xlu1 %v7741_v60, %s6201_s17  ;;  %v7854_v15 = vld [vmem:[#allocation2 + $0x171] sm:$0xff] }
 0x292   : > { %6007 = vmatprep.subr.bf16.mxu1 %v6449_v47  ;;  %3578 = vrot.lane.b32.xlu0 %v7743_v3, %s6200_s16 }
 0x293   : > { %v3089_v49 = vpop.permute.xlu1 %3088 }
 0x294   : > { %3136 = vst.msk [vmem:[#allocation4] sm:$0xff] %vm928_vm2, %v3089_v49  ;;  %v2995_v17 = vpop.permute.xlu0 %2994 }
 0x295   : > { %v1540_v5 = vld [vmem:[#allocation4 + $0x68] sm:$0xff]  ;;  %3041 = vst.msk [vmem:[#allocation4 + $0x8] sm:$0xff] %vm831_vm1, %v2995_v17  ;;  %3294 = vrot.lane.b32.xlu1 %v7705_v1, %s6197_s29 }
 0x296   : > { %5580 = vmatmul.mubr.msk.f32.gmra.mrb[12].mxu0 %vm1549_vm9, %v1540_v5  ;;  %2957 = vst.msk [vmem:[#allocation4 + $0x68] sm:$0xff] %vm646_vm0, %v7755_v6  ;;  %3008 = vrot.lane.b32.xlu0 %v7603_v35, %s6195_s22  ;;  %v556_v35 = vmax.f32 %v484_v12, 0.0  ;;  %v342_v5 = vld [vmem:[%s6314_s13 + $0x1c0] sm:$0xff] }
 0x297   : > { %v1394_v10 = vpop.permute.xlu1 %1393 }
 0x298   : > { %1428 = vst.msk [vmem:[#allocation4 + $0x70] sm:$0xff] %vm1413_vm7, %v1394_v10  ;;  %v1299_v58 = vpop.permute.xlu0 %1298  ;;  %v628_v24 = vmin.f32 %v556_v35, 1.0 }
 0x299   : > { %1332 = vst.msk [vmem:[#allocation4 + $0x78] sm:$0xff] %vm1316_vm6, %v1299_v58  ;;  %3674 = vrot.lane.b32.xlu1 %v7765_v28, %s6201_s17 }
 0x29a   : > { %3388 = vrot.lane.b32.xlu0 %v7662_v23, %s6198_s15  ;;  %701 = vst.msk [vmem:[#allocation2 + $0x1b0] sm:$0xff] %vm646_vm0, %v628_v24 }
 0x29b   : > { %v3185_v30 = vpop.permute.xlu1 %3184 }
 0x29c   : > { %3232 = vst.msk [vmem:[#allocation4] sm:$0xff] %vm1025_vm3, %v3185_v30  ;;  %v3091_v14 = vpop.permute.xlu0 %3090 }
 0x29d   : > { %3137 = vst.msk [vmem:[#allocation4 + $0x8] sm:$0xff] %vm928_vm2, %v3091_v14  ;;  %3104 = vrot.lane.b32.xlu1 %v7632_v54, %s6194_s21  ;;  %v7889_v14 = vld [vmem:[#allocation2 + $0x178] sm:$0xff] }
 0x29e   : > { %3010 = vrot.lane.b32.xlu0 %v7634_v42, %s6195_s22 }
 0x29f   : > { %v1491_v25 = vpop.permute.xlu1 %1490 }
 0x2a0   : > { %1525 = vst.msk [vmem:[#allocation4 + $0x70] sm:$0xff] %vm1510_vm8, %v1491_v25  ;;  %v1396_v26 = vpop.permute.xlu0 %1395 }
 0x2a1   : > { %1429 = vst.msk [vmem:[#allocation4 + $0x78] sm:$0xff] %vm1413_vm7, %v1396_v26  ;;  %3484 = vrot.lane.b32.xlu1 %v7717_v33, %s6199_s8  ;;  %v7798_v20 = vld [vmem:[#allocation2 + $0x1af] sm:$0xff] }
 0x2a2   : > { %3390 = vrot.lane.b32.xlu0 %v7741_v60, %s6198_s15  ;;  %4047 = vst.msk [vmem:[#allocation4 + $0xa8] sm:$0xff] %vm646_vm0, %v7798_v20 }
 0x2a3   : > { %v3281_v54 = vpop.permute.xlu1 %3280 }
 0x2a4   : > { %3328 = vst.msk [vmem:[#allocation4] sm:$0xff] %vm1122_vm4, %v3281_v54  ;;  %v3187_v42 = vpop.permute.xlu0 %3186 }
 0x2a5   : > { %3233 = vst.msk [vmem:[#allocation4 + $0x8] sm:$0xff] %vm1025_vm3, %v3187_v42  ;;  %3200 = vrot.lane.b32.xlu1 %v7644_v2, %s6196_s23  ;;  %v413_v2 = vld [vmem:[%s8879_s1 + $0x1b8] sm:$0xff] }
 0x2a6   : > { %3106 = vrot.lane.b32.xlu0 %v7662_v23, %s6194_s21  ;;  %v485_v29 = vadd.f32 %v413_v2, %v341_v38  ;;  %v343_v2 = vld [vmem:[%s6314_s13 + $0x1c8] sm:$0xff] }
 0x2a7   : > { %v2997_v34 = vpop.permute.xlu1 %2996  ;;  %v5563_v7 = vpop.f32.mrb[0].mxu0  ;;  %v1541_v21 = vld [vmem:[#allocation4 + $0x70] sm:$0xff] }
 0x2a8   : > { %3042 = vst.msk [vmem:[#allocation4 + $0x10] sm:$0xff] %vm831_vm1, %v2997_v34  ;;  %v1493_v4 = vpop.permute.xlu0 %1492  ;;  %v1670_v23 = vadd.f32 %v7654_v9, %v5563_v7  ;;  %v1664_v39 = vpop.f32.mrb[1].mxu0  ;;  %5582 = vmatprep.mubr.msk.f32.mxu0 %vm1549_vm9, %v1541_v21  ;;  %v557_v44 = vmax.f32 %v485_v29, 0.0 }
 0x2a9   : > { %2958 = vst.msk [vmem:[#allocation4 + $0x70] sm:$0xff] %vm646_vm0, %v7804_v37  ;;  %v1665_v32 = vadd.f32 %v7654_v9, %v1664_v39  ;;  %3580 = vrot.lane.b32.xlu1 %v7802_v62, %s6200_s16 }
 0x2aa   : > { %1526 = vst.msk [vmem:[#allocation4 + $0x78] sm:$0xff] %vm1510_vm8, %v1493_v4  ;;  %v1744_v43 = vmax.f32 %v1670_v23, 0.0  ;;  %3486 = vrot.lane.b32.xlu0 %v7755_v6, %s6199_s8  ;;  %v629_v48 = vmin.f32 %v557_v44, 1.0  ;;  %v415_v4 = vld [vmem:[%s8879_s1 + $0x1c8] sm:$0xff] }
 0x2ab   : > { %v1743_v27 = vmax.f32 %v1665_v32, 0.0  ;;  %v3377_v13 = vpop.permute.xlu1 %3376  ;;  %v487_v39 = vadd.f32 %v415_v4, %v343_v2  ;;  %v7914_v32 = vld [vmem:[#allocation2 + $0x179] sm:$0xff] }
 0x2ac   : > { %3424 = vst.msk [vmem:[#allocation4] sm:$0xff] %vm1219_vm5, %v3377_v13  ;;  %v3283_v45 = vpop.permute.xlu0 %3282 }
 0x2ad   : > { %v5943_v55 = vpack.c.bf16 %v1744_v43, %v1743_v27  ;;  %3329 = vst.msk [vmem:[#allocation4 + $0x8] sm:$0xff] %vm1122_vm4, %v3283_v45  ;;  %3296 = vrot.lane.b32.xlu1 %v7743_v3, %s6197_s29  ;;  %v559_v43 = vmax.f32 %v487_v39, 0.0  ;;  %v7916_v27 = vld [vmem:[#allocation2 + $0x180] sm:$0xff] }
 0x2ae   : > { %3202 = vrot.lane.b32.xlu0 %v7717_v33, %s6196_s23  ;;  %702 = vst.msk [vmem:[#allocation2 + $0x1b8] sm:$0xff] %vm646_vm0, %v629_v48 }
 0x2af   : > { %v3093_v52 = vpop.permute.xlu1 %3092  ;;  %5944 = vmatpush3.bf16.msra.mxu0 %v5943_v55  ;;  %v631_v45 = vmin.f32 %v559_v43, 1.0 }
 0x2b0   : > { %3138 = vst.msk [vmem:[#allocation4 + $0x10] sm:$0xff] %vm928_vm2, %v3093_v52  ;;  %v2999_v31 = vpop.permute.xlu0 %2998  ;;  %5945 = vmatprep.subr.bf16.mxu0 %v6202_v40  ;;  %v7934_v52 = vld [vmem:[#allocation2 + $0x181] sm:$0xff] }
 0x2b1   : > { %v1542_v57 = vld [vmem:[#allocation4 + $0x78] sm:$0xff]  ;;  %3043 = vst.msk [vmem:[#allocation4 + $0x18] sm:$0xff] %vm831_vm1, %v2999_v31  ;;  %3676 = vrot.lane.b32.xlu1 %v7829_v46, %s6201_s17 }
 0x2b2   : > { %5583 = vmatmul.mubr.msk.f32.gmra.mrb[14].mxu0 %vm1549_vm9, %v1542_v57  ;;  %2959 = vst.msk [vmem:[#allocation4 + $0x78] sm:$0xff] %vm646_vm0, %v7835_v61  ;;  %3582 = vrot.lane.b32.xlu0 %v7832_v53, %s6200_s16  ;;  %704 = vst.msk [vmem:[#allocation2 + $0x1c8] sm:$0xff] %vm646_vm0, %v631_v45 }
 0x2b3   : > { %5694 = vmatprep.mubr.msk.f32.mxu0 %vm6203_vm10, %v6204_v19  ;;  %v3473_v33 = vpop.permute.xlu1 %3472 }
 0x2b4   : > { %3520 = vst.msk [vmem:[#allocation4] sm:$0xff] %vm1316_vm6, %v3473_v33  ;;  %v3379_v0 = vpop.permute.xlu0 %3378  ;;  %v416_v33 = vld [vmem:[%s8879_s1 + $0x1d0] sm:$0xff] }
 0x2b5   : > { %3425 = vst.msk [vmem:[#allocation4 + $0x8] sm:$0xff] %vm1219_vm5, %v3379_v0  ;;  %3298 = vrot.lane.b32.xlu1 %v7802_v62, %s6197_s29  ;;  %v7876_v30 = vld [vmem:[#allocation2 + $0x1b7] sm:$0xff] }
 0x2b6   : > { %3012 = vrot.lane.b32.xlu0 %v7705_v1, %s6195_s22  ;;  %v414_v1 = vld [vmem:[%s8879_s1 + $0x1c0] sm:$0xff]  ;;  %4048 = vst.msk [vmem:[#allocation4 + $0xb0] sm:$0xff] %vm646_vm0, %v7876_v30 }
 0x2b7   : > { %v3189_v36 = vpop.permute.xlu1 %3188  ;;  %v486_v11 = vadd.f32 %v414_v1, %v342_v5 }
 0x2b8   : > { %3234 = vst.msk [vmem:[#allocation4 + $0x10] sm:$0xff] %vm1025_vm3, %v3189_v36  ;;  %v3095_v49 = vpop.permute.xlu0 %3094 }
 0x2b9   : > { %3139 = vst.msk [vmem:[#allocation4 + $0x18] sm:$0xff] %vm928_vm2, %v3095_v49  ;;  %3678 = vrot.lane.b32.xlu1 %v7854_v15, %s6201_s17  ;;  %v558_v8 = vmax.f32 %v486_v11, 0.0 }
 0x2ba   : > { %3392 = vrot.lane.b32.xlu0 %v7765_v28, %s6198_s15 }
 0x2bb   : > { %v3569_v17 = vpop.permute.xlu1 %3568  ;;  %v630_v35 = vmin.f32 %v558_v8, 1.0 }
 0x2bc   : > { %3616 = vst.msk [vmem:[#allocation4] sm:$0xff] %vm1413_vm7, %v3569_v17  ;;  %v3475_v10 = vpop.permute.xlu0 %3474 }
 0x2bd   : > { %3521 = vst.msk [vmem:[#allocation4 + $0x8] sm:$0xff] %vm1316_vm6, %v3475_v10  ;;  %3108 = vrot.lane.b32.xlu1 %v7741_v60, %s6194_s21 }
 0x2be   : > { %3014 = vrot.lane.b32.xlu0 %v7743_v3, %s6195_s22  ;;  %703 = vst.msk [vmem:[#allocation2 + $0x1c0] sm:$0xff] %vm646_vm0, %v630_v35 }
 0x2bf   : > { %v3285_v58 = vpop.permute.xlu1 %3284 }
 0x2c0   : > { %3330 = vst.msk [vmem:[#allocation4 + $0x10] sm:$0xff] %vm1122_vm4, %v3285_v58  ;;  %v3191_v12 = vpop.permute.xlu0 %3190 }
 0x2c1   : > { %3235 = vst.msk [vmem:[#allocation4 + $0x18] sm:$0xff] %vm1025_vm3, %v3191_v12  ;;  %3488 = vrot.lane.b32.xlu1 %v7804_v37, %s6199_s8 }
 0x2c2   : > { %3394 = vrot.lane.b32.xlu0 %v7829_v46, %s6198_s15 }
 0x2c3   : > { %v3665_v60 = vpop.permute.xlu1 %3664 }
 0x2c4   : > { %3712 = vst.msk [vmem:[#allocation4] sm:$0xff] %vm1510_vm8, %v3665_v60  ;;  %v3571_v3 = vpop.permute.xlu0 %3570 }
 0x2c5   : > { %3617 = vst.msk [vmem:[#allocation4 + $0x8] sm:$0xff] %vm1413_vm7, %v3571_v3  ;;  %3204 = vrot.lane.b32.xlu1 %v7755_v6, %s6196_s23  ;;  %v7897_v6 = vld [vmem:[#allocation2 + $0x1bf] sm:$0xff]  ;;  %v7961_v1 = vld [vmem:[#allocation2 + $0x1c7] sm:$0xff] }
 0x2c6   : > { %3110 = vrot.lane.b32.xlu0 %v7765_v28, %s6194_s21  ;;  %4049 = vst.msk [vmem:[#allocation4 + $0xb8] sm:$0xff] %vm646_vm0, %v7897_v6  ;;  %4050 = vst.msk [vmem:[#allocation4 + $0xc0] sm:$0xff] %vm646_vm0, %v7961_v1  ;;  %v345_v3 = vld [vmem:[%s6314_s13 + $0x1d8] sm:$0xff] }
 0x2c7   : > { %v3287_v24 = vpop.permute.xlu1 %3286  ;;  %v5566_v25 = vpop.f32.mrb[2].mxu0 }
 0x2c8   : > { %3331 = vst.msk [vmem:[#allocation4 + $0x18] sm:$0xff] %vm1122_vm4, %v3287_v24  ;;  %v3001_v26 = vpop.permute.xlu0 %3000  ;;  %v1680_v54 = vadd.f32 %v7654_v9, %v5566_v25  ;;  %v1674_v42 = vpop.f32.mrb[3].mxu0  ;;  %v417_v24 = vld [vmem:[%s8879_s1 + $0x1d8] sm:$0xff] }
 0x2c9   : > { %3044 = vst.msk [vmem:[#allocation4 + $0x20] sm:$0xff] %vm831_vm1, %v3001_v26  ;;  %v1675_v34 = vadd.f32 %v7654_v9, %v1674_v42  ;;  %3584 = vrot.lane.b32.xlu1 %v7889_v14, %s6200_s16  ;;  %v489_v26 = vadd.f32 %v417_v24, %v345_v3  ;;  %v8003_v42 = vld [vmem:[#allocation2 + $0x189] sm:$0xff] }
 0x2ca   : > { %v1746_v28 = vmax.f32 %v1680_v54, 0.0  ;;  %3490 = vrot.lane.b32.xlu0 %v7835_v61, %s6199_s8 }
 0x2cb   : > { %v1745_v7 = vmax.f32 %v1675_v34, 0.0  ;;  %v3667_v21 = vpop.permute.xlu1 %3666  ;;  %v3728_v38 = vld [vmem:[#allocation4] sm:$0xff]  ;;  %v561_v34 = vmax.f32 %v489_v26, 0.0 }
 0x2cc   : > { %3713 = vst.msk [vmem:[#allocation4 + $0x8] sm:$0xff] %vm1510_vm8, %v3667_v21  ;;  %v3381_v23 = vpop.permute.xlu0 %3380  ;;  %5715 = vmatprep.mubr.msk.f32.mxu1 %vm1549_vm9, %v3728_v38  ;;  %v8101_v26 = vld [vmem:[#allocation2 + $0x1a1] sm:$0xff] }
 0x2cd   : > { %v5946_v29 = vpack.c.bf16 %v1746_v28, %v1745_v7  ;;  %3426 = vst.msk [vmem:[#allocation4 + $0x10] sm:$0xff] %vm1219_vm5, %v3381_v23  ;;  %3300 = vrot.lane.b32.xlu1 %v7832_v53, %s6197_s29  ;;  %v8005_v7 = vld [vmem:[#allocation2 + $0x190] sm:$0xff]  ;;  %v633_v38 = vmin.f32 %v561_v34, 1.0 }
 0x2ce   : > { %3206 = vrot.lane.b32.xlu0 %v7804_v37, %s6196_s23  ;;  %v8022_v23 = vld [vmem:[#allocation2 + $0x191] sm:$0xff] }
 0x2cf   : > { %v3097_v44 = vpop.permute.xlu1 %3096  ;;  %5947 = vmatpush3.bf16.msra.mxu0 %v5946_v29  ;;  %706 = vst.msk [vmem:[#allocation2 + $0x1d8] sm:$0xff] %vm646_vm0, %v633_v38 }
 0x2d0   : > { %3140 = vst.msk [vmem:[#allocation4 + $0x20] sm:$0xff] %vm928_vm2, %v3097_v44  ;;  %v3003_v13 = vpop.permute.xlu0 %3002  ;;  %5948 = vmatprep.subr.bf16.mxu0 %v6202_v40  ;;  %v346_v44 = vld [vmem:[%s6314_s13 + $0x1e0] sm:$0xff] }
 0x2d1   : > { %3045 = vst.msk [vmem:[#allocation4 + $0x28] sm:$0xff] %vm831_vm1, %v3003_v13  ;;  %3680 = vrot.lane.b32.xlu1 %v7914_v32, %s6201_s17 }
 0x2d2   : > { %3586 = vrot.lane.b32.xlu0 %v7916_v27, %s6200_s16 }
 0x2d3   : > { %v3477_v37 = vpop.permute.xlu1 %3476  ;;  %v3729_v48 = vld [vmem:[#allocation4 + $0x8] sm:$0xff] }
 0x2d4   : > { %3522 = vst.msk [vmem:[#allocation4 + $0x10] sm:$0xff] %vm1316_vm6, %v3477_v37  ;;  %v3383_v55 = vpop.permute.xlu0 %3382  ;;  %5716 = vmatmul.mubr.msk.f32.vlgmr.msra.gmra.mrb[18].mxu1 %vm1549_vm9, %v3729_v48 }
 0x2d5   : > { %3427 = vst.msk [vmem:[#allocation4 + $0x18] sm:$0xff] %vm1219_vm5, %v3383_v55  ;;  %3302 = vrot.lane.b32.xlu1 %v7889_v14, %s6197_s29  ;;  %6009 = vmatpush3.bf16.msra.mxu1 %v6449_v47 }
 0x2d6   : > { %3016 = vrot.lane.b32.xlu0 %v7802_v62, %s6195_s22  ;;  %6011 = vmatprep.subr.bf16.mxu1 %v6468_v51  ;;  %v344_v62 = vld [vmem:[%s6314_s13 + $0x1d0] sm:$0xff] }
 0x2d7   : > { %v3193_v31 = vpop.permute.xlu1 %3192  ;;  %v488_v36 = vadd.f32 %v416_v33, %v344_v62 }
 0x2d8   : > { %3236 = vst.msk [vmem:[#allocation4 + $0x20] sm:$0xff] %vm1025_vm3, %v3193_v31  ;;  %v3099_v57 = vpop.permute.xlu0 %3098 }
 0x2d9   : > { %3141 = vst.msk [vmem:[#allocation4 + $0x28] sm:$0xff] %vm928_vm2, %v3099_v57  ;;  %3682 = vrot.lane.b32.xlu1 %v7934_v52, %s6201_s17  ;;  %6013 = vmatpush3.bf16.msra.mxu1 %v6468_v51  ;;  %v560_v51 = vmax.f32 %v488_v36, 0.0 }
 0x2da   : > { %3396 = vrot.lane.b32.xlu0 %v7854_v15, %s6198_s15  ;;  %6015 = vmatprep.subr.bf16.mxu1 %v6489_v56 }
 0x2db   : > { %v3573_v47 = vpop.permute.xlu1 %3572  ;;  %v632_v5 = vmin.f32 %v560_v51, 1.0 }
 0x2dc   : > { %3618 = vst.msk [vmem:[#allocation4 + $0x10] sm:$0xff] %vm1413_vm7, %v3573_v47  ;;  %v3479_v0 = vpop.permute.xlu0 %3478  ;;  %v8057_v47 = vld [vmem:[#allocation2 + $0x198] sm:$0xff] }
 0x2dd   : > { %3523 = vst.msk [vmem:[#allocation4 + $0x18] sm:$0xff] %vm1316_vm6, %v3479_v0  ;;  %3112 = vrot.lane.b32.xlu1 %v7829_v46, %s6194_s21  ;;  %6017 = vmatpush3.bf16.msra.mxu1 %v6489_v56 }
 0x2de   : > { %3018 = vrot.lane.b32.xlu0 %v7832_v53, %s6195_s22  ;;  %6019 = vmatprep.subr.bf16.mxu1 %v6511_v63  ;;  %705 = vst.msk [vmem:[#allocation2 + $0x1d0] sm:$0xff] %vm646_vm0, %v632_v5 }
 0x2df   : > { %v3289_v49 = vpop.permute.xlu1 %3288 }
 0x2e0   : > { %3332 = vst.msk [vmem:[#allocation4 + $0x20] sm:$0xff] %vm1122_vm4, %v3289_v49  ;;  %v3195_v17 = vpop.permute.xlu0 %3194 }
 0x2e1   : > { %3237 = vst.msk [vmem:[#allocation4 + $0x28] sm:$0xff] %vm1025_vm3, %v3195_v17  ;;  %3492 = vrot.lane.b32.xlu1 %v7591_v22, %s6199_s8  ;;  %6021 = vmatpush3.bf16.msra.mxu1 %v6511_v63  ;;  %v7977_v63 = vld [vmem:[#allocation2 + $0x188] sm:$0xff] }
 0x2e2   : > { %3398 = vrot.lane.b32.xlu0 %v7914_v32, %s6198_s15  ;;  %5790 = vmatprep.subr.mxu1 %v7736_v59 }
 0x2e3   : > { %v3669_v56 = vpop.permute.xlu1 %3668 }
 0x2e4   : > { %3714 = vst.msk [vmem:[#allocation4 + $0x10] sm:$0xff] %vm1510_vm8, %v3669_v56  ;;  %v3575_v46 = vpop.permute.xlu0 %3574 }
 0x2e5   : > { %3619 = vst.msk [vmem:[#allocation4 + $0x18] sm:$0xff] %vm1413_vm7, %v3575_v46  ;;  %3208 = vrot.lane.b32.xlu1 %v7835_v61, %s6196_s23  ;;  %5791 = vmatpush3.msra.mxu1 %v7736_v59  ;;  %v7986_v61 = vld [vmem:[#allocation2 + $0x1cf] sm:$0xff]  ;;  %v8044_v57 = vld [vmem:[#allocation2 + $0x1d7] sm:$0xff] }
 0x2e6   : > { %3114 = vrot.lane.b32.xlu0 %v7854_v15, %s6194_s21  ;;  %6046 = vmatprep.subr.bf16.mxu1 %v6202_v40  ;;  %4051 = vst.msk [vmem:[#allocation4 + $0xc8] sm:$0xff] %vm646_vm0, %v7986_v61  ;;  %4052 = vst.msk [vmem:[#allocation4 + $0xd0] sm:$0xff] %vm646_vm0, %v8044_v57  ;;  %v347_v46 = vld [vmem:[%s6314_s13 + $0x1e8] sm:$0xff] }
 0x2e7   : > { %v3291_v53 = vpop.permute.xlu1 %3290  ;;  %v5569_v10 = vpop.f32.mrb[4].mxu0 }
 0x2e8   : > { %3333 = vst.msk [vmem:[#allocation4 + $0x28] sm:$0xff] %vm1122_vm4, %v3291_v53  ;;  %v3005_v11 = vpop.permute.xlu0 %3004  ;;  %v1690_v8 = vadd.f32 %v7654_v9, %v5569_v10  ;;  %v1684_v58 = vpop.f32.mrb[5].mxu0  ;;  %v419_v53 = vld [vmem:[%s8879_s1 + $0x1e8] sm:$0xff] }
 0x2e9   : > { %3046 = vst.msk [vmem:[#allocation4 + $0x30] sm:$0xff] %vm831_vm1, %v3005_v11  ;;  %v1685_v59 = vadd.f32 %v7654_v9, %v1684_v58  ;;  %3588 = vrot.lane.b32.xlu1 %v7977_v63, %s6200_s16  ;;  %v491_v11 = vadd.f32 %v419_v53, %v347_v46  ;;  %v8082_v58 = vld [vmem:[#allocation2 + $0x199] sm:$0xff]  ;;  %v8173_v53 = vld [vmem:[#allocation2 + $0x1b1] sm:$0xff] }
 0x2ea   : > { %v1748_v15 = vmax.f32 %v1690_v8, 0.0  ;;  %3494 = vrot.lane.b32.xlu0 %v7611_v41, %s6199_s8 }
 0x2eb   : > { %v1747_v12 = vmax.f32 %v1685_v59, 0.0  ;;  %v3671_v35 = vpop.permute.xlu1 %3670  ;;  %v3730_v60 = vld [vmem:[#allocation4 + $0x10] sm:$0xff]  ;;  %v563_v59 = vmax.f32 %v491_v11, 0.0 }
 0x2ec   : > { %3715 = vst.msk [vmem:[#allocation4 + $0x18] sm:$0xff] %vm1510_vm8, %v3671_v35  ;;  %v3385_v25 = vpop.permute.xlu0 %3384  ;;  %5718 = vmatprep.mubr.msk.f32.mxu1 %vm1549_vm9, %v3730_v60 }
 0x2ed   : > { %v5949_v54 = vpack.c.bf16 %v1748_v15, %v1747_v12  ;;  %3428 = vst.msk [vmem:[#allocation4 + $0x20] sm:$0xff] %vm1219_vm5, %v3385_v25  ;;  %3304 = vrot.lane.b32.xlu1 %v7916_v27, %s6197_s29  ;;  %v8084_v12 = vld [vmem:[#allocation2 + $0x1a0] sm:$0xff]  ;;  %v635_v60 = vmin.f32 %v563_v59, 1.0 }
 0x2ee   : > { %3210 = vrot.lane.b32.xlu0 %v7591_v22, %s6196_s23  ;;  %v350_v59 = vld [vmem:[%s6314_s13 + $0x200] sm:$0xff] }
 0x2ef   : > { %v3101_v28 = vpop.permute.xlu1 %3100  ;;  %5950 = vmatpush3.bf16.msra.mxu0 %v5949_v54  ;;  %708 = vst.msk [vmem:[#allocation2 + $0x1e8] sm:$0xff] %vm646_vm0, %v635_v60 }
 0x2f0   : > { %3142 = vst.msk [vmem:[#allocation4 + $0x30] sm:$0xff] %vm928_vm2, %v3101_v28  ;;  %v3007_v21 = vpop.permute.xlu0 %3006  ;;  %5951 = vmatprep.subr.bf16.mxu0 %v6202_v40  ;;  %v348_v28 = vld [vmem:[%s6314_s13 + $0x1f0] sm:$0xff] }
 0x2f1   : > { %3047 = vst.msk [vmem:[#allocation4 + $0x38] sm:$0xff] %vm831_vm1, %v3007_v21  ;;  %3684 = vrot.lane.b32.xlu1 %v8003_v42, %s6201_s17  ;;  %v420_v21 = vld [vmem:[%s8879_s1 + $0x1f0] sm:$0xff] }
 0x2f2   : > { %3590 = vrot.lane.b32.xlu0 %v8005_v7, %s6200_s16 }
 0x2f3   : > { %v3481_v22 = vpop.permute.xlu1 %3480  ;;  %v3731_v2 = vld [vmem:[#allocation4 + $0x18] sm:$0xff] }
 0x2f4   : > { %3524 = vst.msk [vmem:[#allocation4 + $0x20] sm:$0xff] %vm1316_vm6, %v3481_v22  ;;  %v3387_v4 = vpop.permute.xlu0 %3386  ;;  %5719 = vmatmul.mubr.msk.f32.gmra.mrb[20].mxu1 %vm1549_vm9, %v3731_v2  ;;  %v492_v22 = vadd.f32 %v420_v21, %v348_v28 }
 0x2f5   : > { %3429 = vst.msk [vmem:[#allocation4 + $0x28] sm:$0xff] %vm1219_vm5, %v3387_v4  ;;  %3306 = vrot.lane.b32.xlu1 %v7977_v63, %s6197_s29 }
 0x2f6   : > { %3020 = vrot.lane.b32.xlu0 %v7889_v14, %s6195_s22  ;;  %v418_v14 = vld [vmem:[%s8879_s1 + $0x1e0] sm:$0xff] }
 0x2f7   : > { %v3197_v39 = vpop.permute.xlu1 %3196  ;;  %v490_v45 = vadd.f32 %v418_v14, %v346_v44 }
 0x2f8   : > { %3238 = vst.msk [vmem:[#allocation4 + $0x30] sm:$0xff] %vm1025_vm3, %v3197_v39  ;;  %v3103_v29 = vpop.permute.xlu0 %3102 }
 0x2f9   : > { %3143 = vst.msk [vmem:[#allocation4 + $0x38] sm:$0xff] %vm928_vm2, %v3103_v29  ;;  %3686 = vrot.lane.b32.xlu1 %v8022_v23, %s6201_s17  ;;  %v562_v37 = vmax.f32 %v490_v45, 0.0 }
 0x2fa   : > { %3400 = vrot.lane.b32.xlu0 %v7934_v52, %s6198_s15 }
 0x2fb   : > { %v3577_v43 = vpop.permute.xlu1 %3576  ;;  %v634_v31 = vmin.f32 %v562_v37, 1.0 }
 0x2fc   : > { %3620 = vst.msk [vmem:[#allocation4 + $0x20] sm:$0xff] %vm1413_vm7, %v3577_v43  ;;  %v3483_v13 = vpop.permute.xlu0 %3482  ;;  %v8127_v43 = vld [vmem:[#allocation2 + $0x1a8] sm:$0xff] }
 0x2fd   : > { %3525 = vst.msk [vmem:[#allocation4 + $0x28] sm:$0xff] %vm1316_vm6, %v3483_v13  ;;  %3116 = vrot.lane.b32.xlu1 %v7914_v32, %s6194_s21 }
 0x2fe   : > { %3022 = vrot.lane.b32.xlu0 %v7916_v27, %s6195_s22  ;;  %707 = vst.msk [vmem:[#allocation2 + $0x1e0] sm:$0xff] %vm646_vm0, %v634_v31 }
 0x2ff   : > { %v3293_v48 = vpop.permute.xlu1 %3292 }
 0x300   : > { %3334 = vst.msk [vmem:[#allocation4 + $0x30] sm:$0xff] %vm1122_vm4, %v3293_v48  ;;  %v3199_v55 = vpop.permute.xlu0 %3198 }
 0x301   : > { %3239 = vst.msk [vmem:[#allocation4 + $0x38] sm:$0xff] %vm1025_vm3, %v3199_v55  ;;  %3496 = vrot.lane.b32.xlu1 %v7690_v50, %s6199_s8 }
 0x302   : > { %3402 = vrot.lane.b32.xlu0 %v8003_v42, %s6198_s15 }
 0x303   : > { %v3673_v32 = vpop.permute.xlu1 %3672 }
 0x304   : > { %3716 = vst.msk [vmem:[#allocation4 + $0x20] sm:$0xff] %vm1510_vm8, %v3673_v32  ;;  %v3579_v27 = vpop.permute.xlu0 %3578  ;;  %v8148_v32 = vld [vmem:[#allocation2 + $0x1a9] sm:$0xff] }
 0x305   : > { %3621 = vst.msk [vmem:[#allocation4 + $0x28] sm:$0xff] %vm1413_vm7, %v3579_v27  ;;  %3212 = vrot.lane.b32.xlu1 %v7611_v41, %s6196_s23  ;;  %v8065_v41 = vld [vmem:[#allocation2 + $0x1df] sm:$0xff]  ;;  %v8123_v29 = vld [vmem:[#allocation2 + $0x1e7] sm:$0xff]  ;;  %v8150_v27 = vld [vmem:[#allocation2 + $0x1b0] sm:$0xff] }
 0x306   : > { %3118 = vrot.lane.b32.xlu0 %v7934_v52, %s6194_s21  ;;  %4053 = vst.msk [vmem:[#allocation4 + $0xd8] sm:$0xff] %vm646_vm0, %v8065_v41  ;;  %4054 = vst.msk [vmem:[#allocation4 + $0xe0] sm:$0xff] %vm646_vm0, %v8123_v29 }
 0x307   : > { %v3295_v62 = vpop.permute.xlu1 %3294  ;;  %v5572_v33 = vpop.f32.mrb[6].mxu0 }
 0x308   : > { %3335 = vst.msk [vmem:[#allocation4 + $0x38] sm:$0xff] %vm1122_vm4, %v3295_v62  ;;  %v3009_v0 = vpop.permute.xlu0 %3008  ;;  %v1700_v36 = vadd.f32 %v7654_v9, %v5572_v33  ;;  %v1694_v51 = vpop.f32.mrb[7].mxu0 }
 0x309   : > { %3048 = vst.msk [vmem:[#allocation4 + $0x40] sm:$0xff] %vm831_vm1, %v3009_v0  ;;  %v1695_v49 = vadd.f32 %v7654_v9, %v1694_v51  ;;  %3592 = vrot.lane.b32.xlu1 %v8057_v47, %s6200_s16 }
 0x30a   : > { %v1750_v52 = vmax.f32 %v1700_v36, 0.0  ;;  %3498 = vrot.lane.b32.xlu0 %v7713_v18, %s6199_s8 }
 0x30b   : > { %v1749_v17 = vmax.f32 %v1695_v49, 0.0  ;;  %v3675_v5 = vpop.permute.xlu1 %3674  ;;  %v3732_v56 = vld [vmem:[#allocation4 + $0x20] sm:$0xff] }
 0x30c   : > { %3717 = vst.msk [vmem:[#allocation4 + $0x28] sm:$0xff] %vm1510_vm8, %v3675_v5  ;;  %v3389_v10 = vpop.permute.xlu0 %3388  ;;  %5721 = vmatprep.mubr.msk.f32.mxu1 %vm1549_vm9, %v3732_v56 }
 0x30d   : > { %v5952_v8 = vpack.c.bf16 %v1750_v52, %v1749_v17  ;;  %3430 = vst.msk [vmem:[#allocation4 + $0x30] sm:$0xff] %vm1219_vm5, %v3389_v10  ;;  %3308 = vrot.lane.b32.xlu1 %v8005_v7, %s6197_s29 }
 0x30e   : > { %3214 = vrot.lane.b32.xlu0 %v7690_v50, %s6196_s23 }
 0x30f   : > { %v3105_v15 = vpop.permute.xlu1 %3104  ;;  %5953 = vmatpush3.bf16.msra.mxu0 %v5952_v8 }
 0x310   : > { %3144 = vst.msk [vmem:[#allocation4 + $0x40] sm:$0xff] %vm928_vm2, %v3105_v15  ;;  %v3011_v35 = vpop.permute.xlu0 %3010  ;;  %5954 = vmatprep.subr.bf16.mxu0 %v6202_v40 }
 0x311   : > { %3049 = vst.msk [vmem:[#allocation4 + $0x48] sm:$0xff] %vm831_vm1, %v3011_v35  ;;  %3688 = vrot.lane.b32.xlu1 %v8082_v58, %s6201_s17 }
 0x312   : > { %3594 = vrot.lane.b32.xlu0 %v8084_v12, %s6200_s16 }
 0x313   : > { %v3485_v50 = vpop.permute.xlu1 %3484  ;;  %v3733_v3 = vld [vmem:[#allocation4 + $0x28] sm:$0xff] }
 0x314   : > { %3526 = vst.msk [vmem:[#allocation4 + $0x30] sm:$0xff] %vm1316_vm6, %v3485_v50  ;;  %v3391_v24 = vpop.permute.xlu0 %3390  ;;  %5722 = vmatmul.mubr.msk.f32.gmra.mrb[22].mxu1 %vm1549_vm9, %v3733_v3 }
 0x315   : > { %3431 = vst.msk [vmem:[#allocation4 + $0x38] sm:$0xff] %vm1219_vm5, %v3391_v24  ;;  %3404 = vrot.lane.b32.xlu1 %v8022_v23, %s6198_s15 }
 0x316   : > { %3310 = vrot.lane.b32.xlu0 %v8057_v47, %s6197_s29 }
 0x317   : > { %v3201_v25 = vpop.permute.xlu1 %3200 }
 0x318   : > { %3240 = vst.msk [vmem:[#allocation4 + $0x40] sm:$0xff] %vm1025_vm3, %v3201_v25  ;;  %v3107_v54 = vpop.permute.xlu0 %3106 }
 0x319   : > { %3145 = vst.msk [vmem:[#allocation4 + $0x48] sm:$0xff] %vm928_vm2, %v3107_v54  ;;  %4090 = vrot.lane.b32.xlu1 %v7977_v63, %s6195_s22  ;;  %v564_v63 = vmax.f32 %v492_v22, 0.0  ;;  %v8215_v54 = vld [vmem:[#allocation2 + $0x1b8] sm:$0xff] }
 0x31a   : > { %3690 = vrot.lane.b32.xlu0 %v8101_v26, %s6201_s17 }
 0x31b   : > { %v3581_v34 = vpop.permute.xlu1 %3580  ;;  %v636_v39 = vmin.f32 %v564_v63, 1.0 }
 0x31c   : > { %3622 = vst.msk [vmem:[#allocation4 + $0x30] sm:$0xff] %vm1413_vm7, %v3581_v34  ;;  %v3487_v38 = vpop.permute.xlu0 %3486 }
 0x31d   : > { %3527 = vst.msk [vmem:[#allocation4 + $0x38] sm:$0xff] %vm1316_vm6, %v3487_v38  ;;  %3500 = vrot.lane.b32.xlu1 %v7781_v16, %s6199_s8  ;;  %v8221_v38 = vld [vmem:[%s8882_s4] ss:$0 sm:$0xff] }
 0x31e   : > { %3406 = vrot.lane.b32.xlu0 %v8082_v58, %s6198_s15  ;;  %709 = vst.msk [vmem:[#allocation2 + $0x1f0] sm:$0xff] %vm646_vm0, %v636_v39 }
 0x31f   : > { %v3297_v2 = vpop.permute.xlu1 %3296 }
 0x320   : > { %3336 = vst.msk [vmem:[#allocation4 + $0x40] sm:$0xff] %vm1122_vm4, %v3297_v2  ;;  %v3203_v4 = vpop.permute.xlu0 %3202 }
 0x321   : > { %3241 = vst.msk [vmem:[#allocation4 + $0x48] sm:$0xff] %vm1025_vm3, %v3203_v4  ;;  %4186 = vrot.lane.b32.xlu1 %v8003_v42, %s6194_s21 }
 0x322   : > { %4092 = vrot.lane.b32.xlu0 %v8005_v7, %s6195_s22 }
 0x323   : > { %v3677_v44 = vpop.permute.xlu1 %3676 }
 0x324   : > { %3718 = vst.msk [vmem:[#allocation4 + $0x30] sm:$0xff] %vm1510_vm8, %v3677_v44  ;;  %v3583_v14 = vpop.permute.xlu0 %3582 }
 0x325   : > { %3623 = vst.msk [vmem:[#allocation4 + $0x38] sm:$0xff] %vm1413_vm7, %v3583_v14  ;;  %3596 = vrot.lane.b32.xlu1 %v8127_v43, %s6200_s16  ;;  %v8144_v55 = vld [vmem:[#allocation2 + $0x1ef] sm:$0xff] }
 0x326   : > { %3502 = vrot.lane.b32.xlu0 %v7798_v20, %s6199_s8  ;;  %4055 = vst.msk [vmem:[#allocation4 + $0xe8] sm:$0xff] %vm646_vm0, %v8144_v55  ;;  %v351_v14 = vld [vmem:[%s6314_s13 + $0x208] sm:$0xff] }
 0x327   : > { %v3299_v42 = vpop.permute.xlu1 %3298  ;;  %v5575_v7 = vpop.f32.mrb[8].mxu0 }
 0x328   : > { %3337 = vst.msk [vmem:[#allocation4 + $0x48] sm:$0xff] %vm1122_vm4, %v3299_v42  ;;  %v3013_v13 = vpop.permute.xlu0 %3012  ;;  %v1710_v45 = vadd.f32 %v7654_v9, %v5575_v7  ;;  %v1704_v37 = vpop.f32.mrb[9].mxu0  ;;  %v423_v42 = vld [vmem:[%s8879_s1 + $0x208] sm:$0xff] }
 0x329   : > { %3050 = vst.msk [vmem:[#allocation4 + $0x50] sm:$0xff] %vm831_vm1, %v3013_v13  ;;  %v1705_v48 = vadd.f32 %v7654_v9, %v1704_v37  ;;  %4282 = vrot.lane.b32.xlu1 %v7713_v18, %s6196_s23  ;;  %v349_v9 = vld [vmem:[%s6314_s13 + $0x1f8] sm:$0xff]  ;;  %v495_v13 = vadd.f32 %v423_v42, %v351_v14 }
 0x32a   : > { %v1752_v31 = vmax.f32 %v1710_v45, 0.0  ;;  %4188 = vrot.lane.b32.xlu0 %v8022_v23, %s6194_s21  ;;  %v421_v18 = vld [vmem:[%s8879_s1 + $0x1f8] sm:$0xff] }
 0x32b   : > { %v1751_v62 = vmax.f32 %v1705_v48, 0.0  ;;  %v3679_v33 = vpop.permute.xlu1 %3678  ;;  %v3734_v0 = vld [vmem:[#allocation4 + $0x30] sm:$0xff]  ;;  %v493_v23 = vadd.f32 %v421_v18, %v349_v9  ;;  %v8245_v37 = vld [vmem:[#allocation2 + $0x1b9] sm:$0xff]  ;;  %v567_v48 = vmax.f32 %v495_v13, 0.0 }
 0x32c   : > { %3719 = vst.msk [vmem:[#allocation4 + $0x38] sm:$0xff] %vm1510_vm8, %v3679_v33  ;;  %v3393_v36 = vpop.permute.xlu0 %3392  ;;  %5724 = vmatprep.mubr.msk.f32.mxu1 %vm1549_vm9, %v3734_v0 }
 0x32d   : > { %v5955_v51 = vpack.c.bf16 %v1752_v31, %v1751_v62  ;;  %3432 = vst.msk [vmem:[#allocation4 + $0x40] sm:$0xff] %vm1219_vm5, %v3393_v36  ;;  %3692 = vrot.lane.b32.xlu1 %v8148_v32, %s6201_s17  ;;  %v565_v49 = vmax.f32 %v493_v23, 0.0  ;;  %v8247_v62 = vld [vmem:[#allocation2 + $0x1c0] sm:$0xff]  ;;  %v639_v0 = vmin.f32 %v567_v48, 1.0 }
 0x32e   : > { %3598 = vrot.lane.b32.xlu0 %v8150_v27, %s6200_s16 }
 0x32f   : > { %v3109_v52 = vpop.permute.xlu1 %3108  ;;  %5956 = vmatpush3.bf16.msra.mxu0 %v5955_v51  ;;  %v637_v5 = vmin.f32 %v565_v49, 1.0  ;;  %712 = vst.msk [vmem:[#allocation2 + $0x208] sm:$0xff] %vm646_vm0, %v639_v0  ;;  %v8266_v51 = vld [vmem:[#allocation2 + $0x1c1] sm:$0xff] }
 0x330   : > { %3146 = vst.msk [vmem:[#allocation4 + $0x50] sm:$0xff] %vm928_vm2, %v3109_v52  ;;  %v3015_v17 = vpop.permute.xlu0 %3014  ;;  %5957 = vmatprep.subr.bf16.mxu0 %v6202_v40 }
 0x331   : > { %3051 = vst.msk [vmem:[#allocation4 + $0x58] sm:$0xff] %vm831_vm1, %v3015_v17  ;;  %4378 = vrot.lane.b32.xlu1 %v8084_v12, %s6197_s29 }
 0x332   : > { %4284 = vrot.lane.b32.xlu0 %v7781_v16, %s6196_s23  ;;  %710 = vst.msk [vmem:[#allocation2 + $0x1f8] sm:$0xff] %vm646_vm0, %v637_v5  ;;  %v352_v5 = vld [vmem:[%s6314_s13 + $0x210] sm:$0xff] }
 0x333   : > { %v3489_v56 = vpop.permute.xlu1 %3488  ;;  %v3735_v46 = vld [vmem:[#allocation4 + $0x38] sm:$0xff] }
 0x334   : > { %3528 = vst.msk [vmem:[#allocation4 + $0x40] sm:$0xff] %vm1316_vm6, %v3489_v56  ;;  %v3395_v10 = vpop.permute.xlu0 %3394  ;;  %5725 = vmatmul.mubr.msk.f32.gmra.mrb[24].mxu1 %vm1549_vm9, %v3735_v46 }
 0x335   : > { %3433 = vst.msk [vmem:[#allocation4 + $0x48] sm:$0xff] %vm1219_vm5, %v3395_v10  ;;  %4094 = vrot.lane.b32.xlu1 %v8057_v47, %s6195_s22  ;;  %v422_v47 = vld [vmem:[%s8879_s1 + $0x200] sm:$0xff] }
 0x336   : > { %3694 = vrot.lane.b32.xlu0 %v8173_v53, %s6201_s17  ;;  %v494_v35 = vadd.f32 %v422_v47, %v350_v59  ;;  %v8297_v59 = vld [vmem:[#allocation2 + $0x1c8] sm:$0xff] }
 0x337   : > { %v3205_v16 = vpop.permute.xlu1 %3204 }
 0x338   : > { %3242 = vst.msk [vmem:[#allocation4 + $0x50] sm:$0xff] %vm1025_vm3, %v3205_v16  ;;  %v3111_v11 = vpop.permute.xlu0 %3110  ;;  %v566_v60 = vmax.f32 %v494_v35, 0.0 }
 0x339   : > { %3147 = vst.msk [vmem:[#allocation4 + $0x58] sm:$0xff] %vm928_vm2, %v3111_v11  ;;  %4474 = vrot.lane.b32.xlu1 %v8101_v26, %s6198_s15  ;;  %v8202_v25 = vld [vmem:[#allocation2 + $0x1f7] sm:$0xff] }
 0x33a   : > { %4380 = vrot.lane.b32.xlu0 %v8127_v43, %s6197_s29  ;;  %v638_v24 = vmin.f32 %v566_v60, 1.0  ;;  %4056 = vst.msk [vmem:[#allocation4 + $0xf0] sm:$0xff] %vm646_vm0, %v8202_v25 }
 0x33b   : > { %v3585_v8 = vpop.permute.xlu1 %3584 }
 0x33c   : > { %3624 = vst.msk [vmem:[#allocation4 + $0x40] sm:$0xff] %vm1413_vm7, %v3585_v8  ;;  %v3491_v15 = vpop.permute.xlu0 %3490 }
 0x33d   : > { %3529 = vst.msk [vmem:[#allocation4 + $0x48] sm:$0xff] %vm1316_vm6, %v3491_v15  ;;  %4190 = vrot.lane.b32.xlu1 %v8082_v58, %s6194_s21 }
 0x33e   : > { %4096 = vrot.lane.b32.xlu0 %v8084_v12, %s6195_s22  ;;  %711 = vst.msk [vmem:[#allocation2 + $0x200] sm:$0xff] %vm646_vm0, %v638_v24 }
 0x33f   : > { %v3301_v50 = vpop.permute.xlu1 %3300 }
 0x340   : > { %3338 = vst.msk [vmem:[#allocation4 + $0x50] sm:$0xff] %vm1122_vm4, %v3301_v50  ;;  %v3207_v3 = vpop.permute.xlu0 %3206 }
 0x341   : > { %3243 = vst.msk [vmem:[#allocation4 + $0x58] sm:$0xff] %vm1025_vm3, %v3207_v3  ;;  %4570 = vrot.lane.b32.xlu1 %v7876_v30, %s6199_s8 }
 0x342   : > { %4476 = vrot.lane.b32.xlu0 %v8148_v32, %s6198_s15 }
 0x343   : > { %v3681_v58 = vpop.permute.xlu1 %3680 }
 0x344   : > { %3720 = vst.msk [vmem:[#allocation4 + $0x40] sm:$0xff] %vm1510_vm8, %v3681_v58  ;;  %v3587_v12 = vpop.permute.xlu0 %3586  ;;  %v353_v58 = vld [vmem:[%s6314_s13 + $0x218] sm:$0xff] }
 0x345   : > { %3625 = vst.msk [vmem:[#allocation4 + $0x48] sm:$0xff] %vm1413_vm7, %v3587_v12  ;;  %4286 = vrot.lane.b32.xlu1 %v7798_v20, %s6196_s23  ;;  %v425_v12 = vld [vmem:[%s8879_s1 + $0x218] sm:$0xff] }
 0x346   : > { %4192 = vrot.lane.b32.xlu0 %v8101_v26, %s6194_s21  ;;  %v8228_v26 = vld [vmem:[#allocation2 + $0x1ff] sm:$0xff] }
 0x347   : > { %v3303_v34 = vpop.permute.xlu1 %3302  ;;  %v5578_v28 = vpop.f32.mrb[10].mxu0  ;;  %4057 = vst.msk [vmem:[#allocation4 + $0xf8] sm:$0xff] %vm646_vm0, %v8228_v26 }
 0x348   : > { %3339 = vst.msk [vmem:[#allocation4 + $0x58] sm:$0xff] %vm1122_vm4, %v3303_v34  ;;  %v3017_v21 = vpop.permute.xlu0 %3016  ;;  %v1720_v22 = vadd.f32 %v8221_v38, %v5578_v28  ;;  %v1714_v63 = vpop.f32.mrb[11].mxu0 }
 0x349   : > { %3052 = vst.msk [vmem:[#allocation4 + $0x60] sm:$0xff] %vm831_vm1, %v3017_v21  ;;  %v1715_v20 = vadd.f32 %v8221_v38, %v1714_v63  ;;  %4666 = vrot.lane.b32.xlu1 %v8215_v54, %s6200_s16  ;;  %v497_v21 = vadd.f32 %v425_v12, %v353_v58  ;;  %v8318_v63 = vld [vmem:[#allocation2 + $0x1c9] sm:$0xff] }
 0x34a   : > { %v1754_v2 = vmax.f32 %v1720_v22, 0.0  ;;  %4572 = vrot.lane.b32.xlu0 %v7897_v6, %s6199_s8  ;;  %v428_v58 = vld [vmem:[%s8879_s1 + $0x230] sm:$0xff] }
 0x34b   : > { %v1753_v4 = vmax.f32 %v1715_v20, 0.0  ;;  %v3683_v39 = vpop.permute.xlu1 %3682  ;;  %v3736_v44 = vld [vmem:[#allocation4 + $0x40] sm:$0xff]  ;;  %v569_v20 = vmax.f32 %v497_v21, 0.0 }
 0x34c   : > { %3721 = vst.msk [vmem:[#allocation4 + $0x48] sm:$0xff] %vm1510_vm8, %v3683_v39  ;;  %v3397_v7 = vpop.permute.xlu0 %3396  ;;  %5727 = vmatprep.mubr.msk.f32.mxu1 %vm1549_vm9, %v3736_v44 }
 0x34d   : > { %v5958_v45 = vpack.c.bf16 %v1754_v2, %v1753_v4  ;;  %3434 = vst.msk [vmem:[#allocation4 + $0x50] sm:$0xff] %vm1219_vm5, %v3397_v7  ;;  %4382 = vrot.lane.b32.xlu1 %v8150_v27, %s6197_s29  ;;  %v8320_v4 = vld [vmem:[#allocation2 + $0x1d0] sm:$0xff]  ;;  %v641_v44 = vmin.f32 %v569_v20, 1.0  ;;  %v8417_v20 = vld [vmem:[#allocation2 + $0x1e1] sm:$0xff] }
 0x34e   : > { %4288 = vrot.lane.b32.xlu0 %v7876_v30, %s6196_s23  ;;  %v8337_v7 = vld [vmem:[#allocation2 + $0x1d1] sm:$0xff] }
 0x34f   : > { %v3113_v31 = vpop.permute.xlu1 %3112  ;;  %5959 = vmatpush3.bf16.msra.mxu0 %v5958_v45  ;;  %714 = vst.msk [vmem:[#allocation2 + $0x218] sm:$0xff] %vm646_vm0, %v641_v44  ;;  %v357_v44 = vld [vmem:[%s6314_s13 + $0x238] sm:$0xff] }
 0x350   : > { %3148 = vst.msk [vmem:[#allocation4 + $0x60] sm:$0xff] %vm928_vm2, %v3113_v31  ;;  %v3019_v33 = vpop.permute.xlu0 %3018  ;;  %5960 = vmatprep.subr.bf16.mxu0 %v6202_v40  ;;  %v354_v31 = vld [vmem:[%s6314_s13 + $0x220] sm:$0xff] }
 0x351   : > { %3053 = vst.msk [vmem:[#allocation4 + $0x68] sm:$0xff] %vm831_vm1, %v3019_v33  ;;  %4762 = vrot.lane.b32.xlu1 %v8245_v37, %s6201_s17 }
 0x352   : > { %4668 = vrot.lane.b32.xlu0 %v8247_v62, %s6200_s16 }
 0x353   : > { %v8256_v30 = vpop.f32.mrb[16].mxu1  ;;  %v3493_v9 = vpop.permute.xlu1 %3492  ;;  %v3737_v18 = vld [vmem:[#allocation4 + $0x48] sm:$0xff] }
 0x354   : > { %v5661_v36 = vpop.f32.mrb[17].mxu1  ;;  %3530 = vst.msk [vmem:[#allocation4 + $0x50] sm:$0xff] %vm1316_vm6, %v3493_v9  ;;  %v3399_v23 = vpop.permute.xlu0 %3398  ;;  %5728 = vmatmul.mubr.msk.f32.gmra.mrb[26].mxu1 %vm1549_vm9, %v3737_v18 }
 0x355   : > { %3435 = vst.msk [vmem:[#allocation4 + $0x58] sm:$0xff] %vm1219_vm5, %v3399_v23  ;;  %4384 = vrot.lane.b32.xlu1 %v8215_v54, %s6197_s29 }
 0x356   : > { %4098 = vrot.lane.b32.xlu0 %v8127_v43, %s6195_s22  ;;  %v424_v43 = vld [vmem:[%s8879_s1 + $0x210] sm:$0xff] }
 0x357   : > { %v3209_v49 = vpop.permute.xlu1 %3208  ;;  %v496_v46 = vadd.f32 %v424_v43, %v352_v5  ;;  %v8370_v43 = vld [vmem:[#allocation2 + $0x1d8] sm:$0xff] }
 0x358   : > { %3244 = vst.msk [vmem:[#allocation4 + $0x60] sm:$0xff] %vm1025_vm3, %v3209_v49  ;;  %v3115_v52 = vpop.permute.xlu0 %3114 }
 0x359   : > { %3149 = vst.msk [vmem:[#allocation4 + $0x68] sm:$0xff] %vm928_vm2, %v3115_v52  ;;  %4764 = vrot.lane.b32.xlu1 %v8266_v51, %s6201_s17  ;;  %v568_v10 = vmax.f32 %v496_v46, 0.0 }
 0x35a   : > { %4478 = vrot.lane.b32.xlu0 %v8173_v53, %s6198_s15 }
 0x35b   : > { %v3589_v17 = vpop.permute.xlu1 %3588  ;;  %v640_v8 = vmin.f32 %v568_v10, 1.0 }
 0x35c   : > { %3626 = vst.msk [vmem:[#allocation4 + $0x50] sm:$0xff] %vm1413_vm7, %v3589_v17  ;;  %v3495_v56 = vpop.permute.xlu0 %3494 }
 0x35d   : > { %3531 = vst.msk [vmem:[#allocation4 + $0x58] sm:$0xff] %vm1316_vm6, %v3495_v56  ;;  %4194 = vrot.lane.b32.xlu1 %v8148_v32, %s6194_s21 }
 0x35e   : > { %4100 = vrot.lane.b32.xlu0 %v8150_v27, %s6195_s22  ;;  %713 = vst.msk [vmem:[#allocation2 + $0x210] sm:$0xff] %vm646_vm0, %v640_v8 }
 0x35f   : > { %v3305_v16 = vpop.permute.xlu1 %3304 }
 0x360   : > { %3340 = vst.msk [vmem:[#allocation4 + $0x60] sm:$0xff] %vm1122_vm4, %v3305_v16  ;;  %v3211_v11 = vpop.permute.xlu0 %3210 }
 0x361   : > { %3245 = vst.msk [vmem:[#allocation4 + $0x68] sm:$0xff] %vm1025_vm3, %v3211_v11  ;;  %4574 = vrot.lane.b32.xlu1 %v7961_v1, %s6199_s8 }
 0x362   : > { %4480 = vrot.lane.b32.xlu0 %v8245_v37, %s6198_s15 }
 0x363   : > { %v3685_v32 = vpop.permute.xlu1 %3684 }
 0x364   : > { %3722 = vst.msk [vmem:[#allocation4 + $0x50] sm:$0xff] %vm1510_vm8, %v3685_v32  ;;  %v3591_v27 = vpop.permute.xlu0 %3590  ;;  %v427_v32 = vld [vmem:[%s8879_s1 + $0x228] sm:$0xff] }
 0x365   : > { %3627 = vst.msk [vmem:[#allocation4 + $0x58] sm:$0xff] %vm1413_vm7, %v3591_v27  ;;  %4290 = vrot.lane.b32.xlu1 %v7897_v6, %s6196_s23 }
 0x366   : > { %4196 = vrot.lane.b32.xlu0 %v8173_v53, %s6194_s21 }
 0x367   : > { %v3307_v47 = vpop.permute.xlu1 %3306 }
 0x368   : > { %3341 = vst.msk [vmem:[#allocation4 + $0x68] sm:$0xff] %vm1122_vm4, %v3307_v47  ;;  %v3021_v15 = vpop.permute.xlu0 %3020  ;;  %v1759_v47 = vld [vmem:[%s8880_s2] sm:$0x1] }
 0x369   : > { %v5581_v35 = vpop.f32.mrb[12].mxu0  ;;  %3054 = vst.msk [vmem:[#allocation4 + $0x70] sm:$0xff] %vm831_vm1, %v3021_v15  ;;  %4670 = vrot.lane.b32.xlu1 %v8297_v59, %s6200_s16 }
 0x36a   : > { %v1730_v60 = vadd.f32 %v8221_v38, %v5581_v35  ;;  %v1724_v50 = vpop.f32.mrb[13].mxu0  ;;  %4576 = vrot.lane.b32.xlu0 %v7986_v61, %s6199_s8  ;;  %v8393_v35 = vld [vmem:[#allocation2 + $0x1d9] sm:$0xff] }
 0x36b   : > { %v1725_v6 = vadd.f32 %v8221_v38, %v1724_v50  ;;  %v3687_v3 = vpop.permute.xlu1 %3686  ;;  %v3738_v24 = vld [vmem:[#allocation4 + $0x50] sm:$0xff] }
 0x36c   : > { %v1756_v53 = vmax.f32 %v1730_v60, 0.0  ;;  %3723 = vst.msk [vmem:[#allocation4 + $0x58] sm:$0xff] %vm1510_vm8, %v3687_v3  ;;  %v3401_v28 = vpop.permute.xlu0 %3400  ;;  %5730 = vmatprep.mubr.msk.f32.mxu1 %vm1549_vm9, %v3738_v24  ;;  %v356_v24 = vld [vmem:[%s6314_s13 + $0x230] sm:$0xff] }
 0x36d   : > { %v1755_v34 = vmax.f32 %v1725_v6, 0.0  ;;  %3436 = vst.msk [vmem:[#allocation4 + $0x60] sm:$0xff] %vm1219_vm5, %v3401_v28  ;;  %4386 = vrot.lane.b32.xlu1 %v8247_v62, %s6197_s29  ;;  %v8395_v6 = vld [vmem:[#allocation2 + $0x1e0] sm:$0xff] }
 0x36e   : > { %4292 = vrot.lane.b32.xlu0 %v7961_v1, %s6196_s23 }
 0x36f   : > { %v5961_v22 = vpack.c.bf16 %v1756_v53, %v1755_v34  ;;  %v3117_v2 = vpop.permute.xlu1 %3116 }
 0x370   : > { %3150 = vst.msk [vmem:[#allocation4 + $0x70] sm:$0xff] %vm928_vm2, %v3117_v2  ;;  %v3023_v39 = vpop.permute.xlu0 %3022 }
 0x371   : > { %5962 = vmatpush3.bf16.msra.mxu0 %v5961_v22  ;;  %3055 = vst.msk [vmem:[#allocation4 + $0x78] sm:$0xff] %vm831_vm1, %v3023_v39  ;;  %4766 = vrot.lane.b32.xlu1 %v8318_v63, %s6201_s17 }
 0x372   : > { %5963 = vmatprep.subr.bf16.mxu0 %v6202_v40  ;;  %4672 = vrot.lane.b32.xlu0 %v8320_v4, %s6200_s16 }
 0x373   : > { %v3497_v1 = vpop.permute.xlu1 %3496  ;;  %v3739_v14 = vld [vmem:[#allocation4 + $0x58] sm:$0xff] }
 0x374   : > { %3532 = vst.msk [vmem:[#allocation4 + $0x60] sm:$0xff] %vm1316_vm6, %v3497_v1  ;;  %v3403_v42 = vpop.permute.xlu0 %3402  ;;  %5731 = vmatmul.mubr.msk.f32.gmra.mrb[28].mxu1 %vm1549_vm9, %v3739_v14  ;;  %v429_v1 = vld [vmem:[%s8879_s1 + $0x238] sm:$0xff] }
 0x375   : > { %3437 = vst.msk [vmem:[#allocation4 + $0x68] sm:$0xff] %vm1219_vm5, %v3403_v42  ;;  %4388 = vrot.lane.b32.xlu1 %v8297_v59, %s6197_s29  ;;  %v501_v14 = vadd.f32 %v429_v1, %v357_v44  ;;  %v8545_v1 = vld [vmem:[#allocation2 + $0x201] sm:$0xff] }
 0x376   : > { %4102 = vrot.lane.b32.xlu0 %v8215_v54, %s6195_s22  ;;  %v426_v54 = vld [vmem:[%s8879_s1 + $0x220] sm:$0xff] }
 0x377   : > { %v3213_v13 = vpop.permute.xlu1 %3212  ;;  %v498_v0 = vadd.f32 %v426_v54, %v354_v31  ;;  %v573_v42 = vmax.f32 %v501_v14, 0.0 }
 0x378   : > { %3246 = vst.msk [vmem:[#allocation4 + $0x70] sm:$0xff] %vm1025_vm3, %v3213_v13  ;;  %v3119_v45 = vpop.permute.xlu0 %3118 }
 0x379   : > { %3151 = vst.msk [vmem:[#allocation4 + $0x78] sm:$0xff] %vm928_vm2, %v3119_v45  ;;  %4768 = vrot.lane.b32.xlu1 %v8337_v7, %s6201_s17  ;;  %v570_v9 = vmax.f32 %v498_v0, 0.0  ;;  %v645_v45 = vmin.f32 %v573_v42, 1.0 }
 0x37a   : > { %4482 = vrot.lane.b32.xlu0 %v8266_v51, %s6198_s15 }
 0x37b   : > { %v3593_v48 = vpop.permute.xlu1 %3592  ;;  %v642_v23 = vmin.f32 %v570_v9, 1.0  ;;  %718 = vst.msk [vmem:[#allocation2 + $0x238] sm:$0xff] %vm646_vm0, %v645_v45  ;;  %v4548_v45 = vld [vmem:[#allocation2 + $0x207] sm:$0xff] }
 0x37c   : > { %3628 = vst.msk [vmem:[#allocation4 + $0x60] sm:$0xff] %vm1413_vm7, %v3593_v48  ;;  %v3499_v33 = vpop.permute.xlu0 %3498 }
 0x37d   : > { %3533 = vst.msk [vmem:[#allocation4 + $0x68] sm:$0xff] %vm1316_vm6, %v3499_v33  ;;  %4198 = vrot.lane.b32.xlu1 %v8245_v37, %s6194_s21 }
 0x37e   : > { %4104 = vrot.lane.b32.xlu0 %v8247_v62, %s6195_s22  ;;  %715 = vst.msk [vmem:[#allocation2 + $0x220] sm:$0xff] %vm646_vm0, %v642_v23 }
 0x37f   : > { %v3309_v18 = vpop.permute.xlu1 %3308 }
 0x380   : > { %3342 = vst.msk [vmem:[#allocation4 + $0x70] sm:$0xff] %vm1122_vm4, %v3309_v18  ;;  %v3215_v36 = vpop.permute.xlu0 %3214 }
 0x381   : > { %3247 = vst.msk [vmem:[#allocation4 + $0x78] sm:$0xff] %vm1025_vm3, %v3215_v36  ;;  %4578 = vrot.lane.b32.xlu1 %v8044_v57, %s6199_s8 }
 0x382   : > { %4484 = vrot.lane.b32.xlu0 %v8318_v63, %s6198_s15 }
 0x383   : > { %v3689_v37 = vpop.permute.xlu1 %3688 }
 0x384   : > { %3724 = vst.msk [vmem:[#allocation4 + $0x60] sm:$0xff] %vm1510_vm8, %v3689_v37  ;;  %v3595_v62 = vpop.permute.xlu0 %3594 }
 0x385   : > { %v5584_v49 = vpop.f32.mrb[14].mxu0  ;;  %3629 = vst.msk [vmem:[#allocation4 + $0x68] sm:$0xff] %vm1413_vm7, %v3595_v62  ;;  %4294 = vrot.lane.b32.xlu1 %v7986_v61, %s6196_s23 }
 0x386   : > { %v1740_v52 = vadd.f32 %v8221_v38, %v5584_v49  ;;  %v1734_v17 = vpop.f32.mrb[15].mxu0  ;;  %4200 = vrot.lane.b32.xlu0 %v8266_v51, %s6194_s21  ;;  %v355_v51 = vld [vmem:[%s6314_s13 + $0x228] sm:$0xff]  ;;  %s270_s13 = scalar_lea.vmem [#allocation5], %s269_s14 }
 0x387   : > { %v1735_v5 = vadd.f32 %v8221_v38, %v1734_v17  ;;  %v3405_v46 = vpop.permute.xlu1 %3404  ;;  %v499_v15 = vadd.f32 %v427_v32, %v355_v51  ;;  %v8466_v17 = vld [vmem:[#allocation2 + $0x1e9] sm:$0xff] }
 0x388   : > { %v1758_v56 = vmax.f32 %v1740_v52, 0.0  ;;  %3438 = vst.msk [vmem:[#allocation4 + $0x70] sm:$0xff] %vm1219_vm5, %v3405_v46  ;;  %v3311_v16 = vpop.permute.xlu0 %3310 }
 0x389   : > { %v1757_v10 = vmax.f32 %v1735_v5, 0.0  ;;  %3343 = vst.msk [vmem:[#allocation4 + $0x78] sm:$0xff] %vm1122_vm4, %v3311_v16  ;;  %4674 = vrot.lane.b32.xlu1 %v8370_v43, %s6200_s16  ;;  %v571_v60 = vmax.f32 %v499_v15, 0.0 }
 0x38a   : > { %4580 = vrot.lane.b32.xlu0 %v8065_v41, %s6199_s8 }
 0x38b   : > { %v5964_v11 = vpack.c.bf16 %v1758_v56, %v1757_v10  ;;  %v4091_v61 = vpop.permute.xlu1 %4090  ;;  %v3740_v8 = vld [vmem:[#allocation4 + $0x60] sm:$0xff]  ;;  %v643_v3 = vmin.f32 %v571_v60, 1.0  ;;  %v8468_v56 = vld [vmem:[#allocation2 + $0x1f0] sm:$0xff] }
 0x38c   : > { %4138 = vst.msk [vmem:[#allocation4 + $0x80] sm:$0xff] %vm831_vm1, %v4091_v61  ;;  %v3691_v27 = vpop.permute.xlu0 %3690  ;;  %5733 = vmatprep.mubr.msk.f32.mxu1 %vm1549_vm9, %v3740_v8 }
 0x38d   : > { %5965 = vmatpush3.bf16.msra.mxu0 %v5964_v11  ;;  %3725 = vst.msk [vmem:[#allocation4 + $0x68] sm:$0xff] %vm1510_vm8, %v3691_v27  ;;  %4390 = vrot.lane.b32.xlu1 %v8320_v4, %s6197_s29  ;;  %v8484_v11 = vld [vmem:[#allocation2 + $0x1f1] sm:$0xff] }
 0x38e   : > { %5982 = vmatprep.subr.bf16.mxu0 %v6202_v40  ;;  %4296 = vrot.lane.b32.xlu0 %v8044_v57, %s6196_s23  ;;  %v500_v57 = vadd.f32 %v428_v58, %v356_v24  ;;  %716 = vst.msk [vmem:[#allocation2 + $0x228] sm:$0xff] %vm646_vm0, %v643_v3 }
 0x38f   : > { %v3501_v50 = vpop.permute.xlu1 %3500 }
 0x390   : > { %5695 = vmatmul.mubr.f32.vlgmr.msra.gmra.mrb[16].mxu0 %v1759_v47  ;;  %3534 = vst.msk [vmem:[#allocation4 + $0x70] sm:$0xff] %vm1316_vm6, %v3501_v50  ;;  %v3407_v53 = vpop.permute.xlu0 %3406  ;;  %v572_v34 = vmax.f32 %v500_v57, 0.0 }
 0x391   : > { %5771 = vmatprep.mubr.msk.f32.mxu0 %vm6203_vm10, %v6204_v19  ;;  %3439 = vst.msk [vmem:[#allocation4 + $0x78] sm:$0xff] %vm1219_vm5, %v3407_v53  ;;  %4770 = vrot.lane.b32.xlu1 %v8393_v35, %s6201_s17 }
 0x392   : > { %4676 = vrot.lane.b32.xlu0 %v8395_v6, %s6200_s16  ;;  %v644_v22 = vmin.f32 %v572_v34, 1.0 }
 0x393   : > { %v4187_v12 = vpop.permute.xlu1 %4186 }
 0x394   : > { %4234 = vst.msk [vmem:[#allocation4 + $0x80] sm:$0xff] %vm928_vm2, %v4187_v12  ;;  %v4093_v28 = vpop.permute.xlu0 %4092  ;;  %v3741_v21 = vld [vmem:[#allocation4 + $0x68] sm:$0xff] }
 0x395   : > { %4139 = vst.msk [vmem:[#allocation4 + $0x88] sm:$0xff] %vm831_vm1, %v4093_v28  ;;  %5734 = vmatmul.mubr.msk.f32.gmra.mrb[30].mxu1 %vm1549_vm9, %v3741_v21  ;;  %4392 = vrot.lane.b32.xlu1 %v8370_v43, %s6197_s29  ;;  %v8527_v21 = vld [vmem:[#allocation2 + $0x1f9] sm:$0xff] }
 0x396   : > { %4106 = vrot.lane.b32.xlu0 %v8297_v59, %s6195_s22  ;;  %717 = vst.msk [vmem:[#allocation2 + $0x230] sm:$0xff] %vm646_vm0, %v644_v22 }
 0x397   : > { %v3597_v2 = vpop.permute.xlu1 %3596 }
 0x398   : > { %3630 = vst.msk [vmem:[#allocation4 + $0x70] sm:$0xff] %vm1413_vm7, %v3597_v2  ;;  %v3503_v39 = vpop.permute.xlu0 %3502 }
 0x399   : > { %3535 = vst.msk [vmem:[#allocation4 + $0x78] sm:$0xff] %vm1316_vm6, %v3503_v39  ;;  %4772 = vrot.lane.b32.xlu1 %v8417_v20, %s6201_s17 }
 0x39a   : > { %4486 = vrot.lane.b32.xlu0 %v8337_v7, %s6198_s15 }
 0x39b   : > { %v4283_v59 = vpop.permute.xlu1 %4282 }
 0x39c   : > { %4330 = vst.msk [vmem:[#allocation4 + $0x80] sm:$0xff] %vm1025_vm3, %v4283_v59  ;;  %v4189_v13 = vpop.permute.xlu0 %4188 }
 0x39d   : > { %4235 = vst.msk [vmem:[#allocation4 + $0x88] sm:$0xff] %vm928_vm2, %v4189_v13  ;;  %4202 = vrot.lane.b32.xlu1 %v8318_v63, %s6194_s21 }
 0x39e   : > { %4108 = vrot.lane.b32.xlu0 %v8320_v4, %s6195_s22  ;;  %v8449_v4 = vld [vmem:[#allocation2 + $0x1e8] sm:$0xff] }
 0x39f   : > { %v3693_v48 = vpop.permute.xlu1 %3692 }
 0x3a0   : > { %3726 = vst.msk [vmem:[#allocation4 + $0x70] sm:$0xff] %vm1510_vm8, %v3693_v48  ;;  %v3599_v31 = vpop.permute.xlu0 %3598 }
 0x3a1   : > { %3631 = vst.msk [vmem:[#allocation4 + $0x78] sm:$0xff] %vm1413_vm7, %v3599_v31  ;;  %4582 = vrot.lane.b32.xlu1 %v8123_v29, %s6199_s8 }
 0x3a2   : > { %4488 = vrot.lane.b32.xlu0 %v8393_v35, %s6198_s15 }
 0x3a3   : > { %v4379_v54 = vpop.permute.xlu1 %4378 }
 0x3a4   : > { %4426 = vst.msk [vmem:[#allocation4 + $0x80] sm:$0xff] %vm1122_vm4, %v4379_v54  ;;  %v4285_v63 = vpop.permute.xlu0 %4284 }
 0x3a5   : > { %4331 = vst.msk [vmem:[#allocation4 + $0x88] sm:$0xff] %vm1025_vm3, %v4285_v63  ;;  %4298 = vrot.lane.b32.xlu1 %v8065_v41, %s6196_s23 }
 0x3a6   : > { %4204 = vrot.lane.b32.xlu0 %v8337_v7, %s6194_s21 }
 0x3a7   : > { %v4095_v33 = vpop.permute.xlu1 %4094  ;;  %v5717_v0 = vpop.f32.mrb[18].mxu1  ;;  %v3742_v9 = vld [vmem:[#allocation4 + $0x70] sm:$0xff] }
 0x3a8   : > { %4140 = vst.msk [vmem:[#allocation4 + $0x90] sm:$0xff] %vm831_vm1, %v4095_v33  ;;  %v3695_v18 = vpop.permute.xlu0 %3694  ;;  %v3864_v36 = vadd.f32 %v8221_v38, %v5717_v0  ;;  %v3858_v23 = vpop.f32.mrb[19].mxu1  ;;  %5736 = vmatprep.mubr.msk.f32.mxu1 %vm1549_vm9, %v3742_v9  ;;  %v4549_v9 = vld [vmem:[#allocation2 + $0x20f] sm:$0xff] }
 0x3a9   : > { %3727 = vst.msk [vmem:[#allocation4 + $0x78] sm:$0xff] %vm1510_vm8, %v3695_v18  ;;  %v3859_v41 = vadd.f32 %v8221_v38, %v3858_v23  ;;  %4678 = vrot.lane.b32.xlu1 %v8449_v4, %s6200_s16 }
 0x3aa   : > { %v3938_v7 = vmax.f32 %v3864_v36, 0.0  ;;  %4584 = vrot.lane.b32.xlu0 %v8144_v55, %s6199_s8 }
 0x3ab   : > { %v3937_v37 = vmax.f32 %v3859_v41, 0.0  ;;  %v4475_v62 = vpop.permute.xlu1 %4474 }
 0x3ac   : > { %4522 = vst.msk [vmem:[#allocation4 + $0x80] sm:$0xff] %vm1219_vm5, %v4475_v62  ;;  %v4381_v49 = vpop.permute.xlu0 %4380 }
 0x3ad   : > { %v5983_v52 = vpack.c.bf16 %v3938_v7, %v3937_v37  ;;  %4427 = vst.msk [vmem:[#allocation4 + $0x88] sm:$0xff] %vm1122_vm4, %v4381_v49  ;;  %4394 = vrot.lane.b32.xlu1 %v8395_v6, %s6197_s29 }
 0x3ae   : > { %4300 = vrot.lane.b32.xlu0 %v8123_v29, %s6196_s23 }
 0x3af   : > { %v4191_v5 = vpop.permute.xlu1 %4190  ;;  %5984 = vmatpush3.bf16.msra.mxu0 %v5983_v52 }
 0x3b0   : > { %4236 = vst.msk [vmem:[#allocation4 + $0x90] sm:$0xff] %vm928_vm2, %v4191_v5  ;;  %v4097_v46 = vpop.permute.xlu0 %4096  ;;  %v3743_v10 = vld [vmem:[#allocation4 + $0x78] sm:$0xff]  ;;  %5985 = vmatprep.subr.bf16.mxu0 %v6202_v40 }
 0x3b1   : > { %4141 = vst.msk [vmem:[#allocation4 + $0x98] sm:$0xff] %vm831_vm1, %v4097_v46  ;;  %5737 = vmatmul.mubr.msk.f32.gmra.mrb[32].mxu1 %vm1549_vm9, %v3743_v10  ;;  %4774 = vrot.lane.b32.xlu1 %v8466_v17, %s6201_s17 }
 0x3b2   : > { %4680 = vrot.lane.b32.xlu0 %v8468_v56, %s6200_s16 }
 0x3b3   : > { %v4571_v29 = vpop.permute.xlu1 %4570 }
 0x3b4   : > { %4618 = vst.msk [vmem:[#allocation4 + $0x80] sm:$0xff] %vm1316_vm6, %v4571_v29  ;;  %v4477_v16 = vpop.permute.xlu0 %4476 }
 0x3b5   : > { %4523 = vst.msk [vmem:[#allocation4 + $0x88] sm:$0xff] %vm1219_vm5, %v4477_v16  ;;  %4396 = vrot.lane.b32.xlu1 %v8449_v4, %s6197_s29 }
 0x3b6   : > { %4110 = vrot.lane.b32.xlu0 %v8370_v43, %s6195_s22 }
 0x3b7   : > { %v4287_v61 = vpop.permute.xlu1 %4286 }
 0x3b8   : > { %4332 = vst.msk [vmem:[#allocation4 + $0x90] sm:$0xff] %vm1025_vm3, %v4287_v61  ;;  %v4193_v8 = vpop.permute.xlu0 %4192 }
 0x3b9   : > { %4237 = vst.msk [vmem:[#allocation4 + $0x98] sm:$0xff] %vm928_vm2, %v4193_v8  ;;  %4776 = vrot.lane.b32.xlu1 %v8484_v11, %s6201_s17 }
 0x3ba   : > { %4490 = vrot.lane.b32.xlu0 %v8417_v20, %s6198_s15 }
 0x3bb   : > { %v4667_v51 = vpop.permute.xlu1 %4666 }
 0x3bc   : > { %4714 = vst.msk [vmem:[#allocation4 + $0x80] sm:$0xff] %vm1413_vm7, %v4667_v51  ;;  %v4573_v32 = vpop.permute.xlu0 %4572 }
 0x3bd   : > { %4619 = vst.msk [vmem:[#allocation4 + $0x88] sm:$0xff] %vm1316_vm6, %v4573_v32  ;;  %4206 = vrot.lane.b32.xlu1 %v8393_v35, %s6194_s21  ;;  %v8510_v35 = vld [vmem:[#allocation2 + $0x1f8] sm:$0xff] }
 0x3be   : > { %4112 = vrot.lane.b32.xlu0 %v8395_v6, %s6195_s22 }
 0x3bf   : > { %v4383_v43 = vpop.permute.xlu1 %4382 }
 0x3c0   : > { %4428 = vst.msk [vmem:[#allocation4 + $0x90] sm:$0xff] %vm1122_vm4, %v4383_v43  ;;  %v4289_v27 = vpop.permute.xlu0 %4288  ;;  %v4550_v43 = vld [vmem:[#allocation2 + $0x217] sm:$0xff] }
 0x3c1   : > { %4333 = vst.msk [vmem:[#allocation4 + $0x98] sm:$0xff] %vm1025_vm3, %v4289_v27  ;;  %4586 = vrot.lane.b32.xlu1 %v8202_v25, %s6199_s8 }
 0x3c2   : > { %4492 = vrot.lane.b32.xlu0 %v8466_v17, %s6198_s15 }
 0x3c3   : > { %v4763_v47 = vpop.permute.xlu1 %4762 }
 0x3c4   : > { %4810 = vst.msk [vmem:[#allocation4 + $0x80] sm:$0xff] %vm1510_vm8, %v4763_v47  ;;  %v4669_v15 = vpop.permute.xlu0 %4668 }
 0x3c5   : > { %4715 = vst.msk [vmem:[#allocation4 + $0x88] sm:$0xff] %vm1413_vm7, %v4669_v15  ;;  %4302 = vrot.lane.b32.xlu1 %v8144_v55, %s6196_s23 }
 0x3c6   : > { %4208 = vrot.lane.b32.xlu0 %v8417_v20, %s6194_s21  ;;  %v8529_v20 = vld [vmem:[#allocation2 + $0x200] sm:$0xff] }
 0x3c7   : > { %v4385_v60 = vpop.permute.xlu1 %4384  ;;  %v5720_v50 = vpop.f32.mrb[20].mxu1 }
 0x3c8   : > { %4429 = vst.msk [vmem:[#allocation4 + $0x98] sm:$0xff] %vm1122_vm4, %v4385_v60  ;;  %v4099_v6 = vpop.permute.xlu0 %4098  ;;  %v3874_v53 = vadd.f32 %v8221_v38, %v5720_v50  ;;  %v3868_v3 = vpop.f32.mrb[21].mxu1  ;;  %v4646_v60 = vld [vmem:[#allocation2 + $0x218] sm:$0xff] }
 0x3c9   : > { %4142 = vst.msk [vmem:[#allocation4 + $0xa0] sm:$0xff] %vm831_vm1, %v4099_v6  ;;  %v3869_v24 = vadd.f32 %v8221_v38, %v3868_v3  ;;  %4682 = vrot.lane.b32.xlu1 %v8510_v35, %s6200_s16 }
 0x3ca   : > { %v3940_v55 = vmax.f32 %v3874_v53, 0.0  ;;  %4588 = vrot.lane.b32.xlu0 %v8228_v26, %s6199_s8  ;;  %v4551_v53 = vld [vmem:[#allocation2 + $0x21f] sm:$0xff] }
 0x3cb   : > { %v3939_v58 = vmax.f32 %v3869_v24, 0.0  ;;  %v4765_v57 = vpop.permute.xlu1 %4764  ;;  %v4826_v12 = vld [vmem:[#allocation4 + $0x80] sm:$0xff] }
 0x3cc   : > { %4811 = vst.msk [vmem:[#allocation4 + $0x88] sm:$0xff] %vm1510_vm8, %v4765_v57  ;;  %v4479_v34 = vpop.permute.xlu0 %4478  ;;  %5792 = vmatprep.mubr.msk.f32.mxu1 %vm1549_vm9, %v4826_v12 }
 0x3cd   : > { %v5986_v28 = vpack.c.bf16 %v3940_v55, %v3939_v58  ;;  %4524 = vst.msk [vmem:[#allocation4 + $0x90] sm:$0xff] %vm1219_vm5, %v4479_v34  ;;  %4398 = vrot.lane.b32.xlu1 %v8468_v56, %s6197_s29 }
 0x3ce   : > { %4304 = vrot.lane.b32.xlu0 %v8202_v25, %s6196_s23 }
 0x3cf   : > { %v4195_v22 = vpop.permute.xlu1 %4194  ;;  %5987 = vmatpush3.bf16.msra.mxu0 %v5986_v28 }
 0x3d0   : > { %4238 = vst.msk [vmem:[#allocation4 + $0xa0] sm:$0xff] %vm928_vm2, %v4195_v22  ;;  %v4101_v2 = vpop.permute.xlu0 %4100  ;;  %5988 = vmatprep.subr.bf16.mxu0 %v6202_v40 }
 0x3d1   : > { %4143 = vst.msk [vmem:[#allocation4 + $0xa8] sm:$0xff] %vm831_vm1, %v4101_v2  ;;  %4778 = vrot.lane.b32.xlu1 %v8527_v21, %s6201_s17  ;;  %v4647_v2 = vld [vmem:[#allocation2 + $0x220] sm:$0xff] }
 0x3d2   : > { %4684 = vrot.lane.b32.xlu0 %v8529_v20, %s6200_s16 }
 0x3d3   : > { %v4575_v25 = vpop.permute.xlu1 %4574  ;;  %v4827_v39 = vld [vmem:[#allocation4 + $0x88] sm:$0xff] }
 0x3d4   : > { %4620 = vst.msk [vmem:[#allocation4 + $0x90] sm:$0xff] %vm1316_vm6, %v4575_v25  ;;  %v4481_v44 = vpop.permute.xlu0 %4480  ;;  %5793 = vmatmul.mubr.msk.f32.vlgmr.msra.gmra.mrb[34].mxu1 %vm1549_vm9, %v4827_v39 }
 0x3d5   : > { %4525 = vst.msk [vmem:[#allocation4 + $0x98] sm:$0xff] %vm1219_vm5, %v4481_v44  ;;  %4400 = vrot.lane.b32.xlu1 %v8510_v35, %s6197_s29 }
 0x3d6   : > { %4114 = vrot.lane.b32.xlu0 %v8449_v4, %s6195_s22  ;;  %v4644_v4 = vld [vmem:[#allocation2 + $0x208] sm:$0xff] }
 0x3d7   : > { %v4291_v14 = vpop.permute.xlu1 %4290 }
 0x3d8   : > { %4334 = vst.msk [vmem:[#allocation4 + $0xa0] sm:$0xff] %vm1025_vm3, %v4291_v14  ;;  %v4197_v59 = vpop.permute.xlu0 %4196 }
 0x3d9   : > { %4239 = vst.msk [vmem:[#allocation4 + $0xa8] sm:$0xff] %vm928_vm2, %v4197_v59  ;;  %4780 = vrot.lane.b32.xlu1 %v8545_v1, %s6201_s17  ;;  %v4743_v59 = vld [vmem:[#allocation2 + $0x221] sm:$0xff] }
 0x3da   : > { %4494 = vrot.lane.b32.xlu0 %v8484_v11, %s6198_s15 }
 0x3db   : > { %v4671_v42 = vpop.permute.xlu1 %4670 }
 0x3dc   : > { %4716 = vst.msk [vmem:[#allocation4 + $0x90] sm:$0xff] %vm1413_vm7, %v4671_v42  ;;  %v4577_v13 = vpop.permute.xlu0 %4576 }
 0x3dd   : > { %4621 = vst.msk [vmem:[#allocation4 + $0x98] sm:$0xff] %vm1316_vm6, %v4577_v13  ;;  %4210 = vrot.lane.b32.xlu1 %v8466_v17, %s6194_s21  ;;  %v4740_v17 = vld [vmem:[#allocation2 + $0x209] sm:$0xff] }
 0x3de   : > { %4116 = vrot.lane.b32.xlu0 %v8468_v56, %s6195_s22  ;;  %v4645_v56 = vld [vmem:[#allocation2 + $0x210] sm:$0xff] }
 0x3df   : > { %v4387_v48 = vpop.permute.xlu1 %4386  ;;  %v4553_v13 = vld [vmem:[#allocation2 + $0x22f] sm:$0xff] }
 0x3e0   : > { %4430 = vst.msk [vmem:[#allocation4 + $0xa0] sm:$0xff] %vm1122_vm4, %v4387_v48  ;;  %v4293_v31 = vpop.permute.xlu0 %4292  ;;  %v4552_v48 = vld [vmem:[#allocation2 + $0x227] sm:$0xff] }
 0x3e1   : > { %4335 = vst.msk [vmem:[#allocation4 + $0xa8] sm:$0xff] %vm1025_vm3, %v4293_v31  ;;  %4590 = vrot.lane.b32.xlu1 %v4548_v45, %s6199_s8 }
 0x3e2   : > { %4496 = vrot.lane.b32.xlu0 %v8527_v21, %s6198_s15 }
 0x3e3   : > { %v4767_v54 = vpop.permute.xlu1 %4766 }
 0x3e4   : > { %4812 = vst.msk [vmem:[#allocation4 + $0x90] sm:$0xff] %vm1510_vm8, %v4767_v54  ;;  %v4673_v63 = vpop.permute.xlu0 %4672  ;;  %v4649_v54 = vld [vmem:[#allocation2 + $0x230] sm:$0xff] }
 0x3e5   : > { %4717 = vst.msk [vmem:[#allocation4 + $0x98] sm:$0xff] %vm1413_vm7, %v4673_v63  ;;  %4306 = vrot.lane.b32.xlu1 %v8228_v26, %s6196_s23 }
 0x3e6   : > { %4212 = vrot.lane.b32.xlu0 %v8484_v11, %s6194_s21  ;;  %v8593_v11 = vld [vmem:[#allocation2 + $0x211] sm:$0xff] }
 0x3e7   : > { %v4389_v33 = vpop.permute.xlu1 %4388  ;;  %v5723_v0 = vpop.f32.mrb[22].mxu1 }
 0x3e8   : > { %4431 = vst.msk [vmem:[#allocation4 + $0xa8] sm:$0xff] %vm1122_vm4, %v4389_v33  ;;  %v4103_v18 = vpop.permute.xlu0 %4102  ;;  %v3884_v36 = vadd.f32 %v8221_v38, %v5723_v0  ;;  %v3878_v23 = vpop.f32.mrb[23].mxu1  ;;  %v4745_v0 = vld [vmem:[#allocation2 + $0x231] sm:$0xff] }
 0x3e9   : > { %4144 = vst.msk [vmem:[#allocation4 + $0xb0] sm:$0xff] %vm831_vm1, %v4103_v18  ;;  %v3879_v41 = vadd.f32 %v8221_v38, %v3878_v23  ;;  %4686 = vrot.lane.b32.xlu1 %v4644_v4, %s6200_s16  ;;  %v4744_v18 = vld [vmem:[#allocation2 + $0x229] sm:$0xff] }
 0x3ea   : > { %v3942_v26 = vmax.f32 %v3884_v36, 0.0  ;;  %4592 = vrot.lane.b32.xlu0 %v4549_v9, %s6199_s8 }
 0x3eb   : > { %v3941_v7 = vmax.f32 %v3879_v41, 0.0  ;;  %v4769_v37 = vpop.permute.xlu1 %4768  ;;  %v4828_v62 = vld [vmem:[#allocation4 + $0x90] sm:$0xff] }
 0x3ec   : > { %4813 = vst.msk [vmem:[#allocation4 + $0x98] sm:$0xff] %vm1510_vm8, %v4769_v37  ;;  %v4483_v49 = vpop.permute.xlu0 %4482  ;;  %5795 = vmatprep.mubr.msk.f32.mxu1 %vm1549_vm9, %v4828_v62 }
 0x3ed   : > { %v5989_v52 = vpack.c.bf16 %v3942_v26, %v3941_v7  ;;  %4526 = vst.msk [vmem:[#allocation4 + $0xa0] sm:$0xff] %vm1219_vm5, %v4483_v49  ;;  %4402 = vrot.lane.b32.xlu1 %v8529_v20, %s6197_s29  ;;  %v8658_v7 = vld [vmem:[%s8882_s4] ss:$0 sm:$0xff] }
 0x3ee   : > { %4308 = vrot.lane.b32.xlu0 %v4548_v45, %s6196_s23 }
 0x3ef   : > { %v4199_v5 = vpop.permute.xlu1 %4198  ;;  %5990 = vmatpush3.bf16.msra.mxu0 %v5989_v52 }
 0x3f0   : > { %4240 = vst.msk [vmem:[#allocation4 + $0xb0] sm:$0xff] %vm928_vm2, %v4199_v5  ;;  %v4105_v46 = vpop.permute.xlu0 %4104  ;;  %5991 = vmatprep.subr.bf16.mxu0 %v6202_v40 }
 0x3f1   : > { %4145 = vst.msk [vmem:[#allocation4 + $0xb8] sm:$0xff] %vm831_vm1, %v4105_v46  ;;  %4782 = vrot.lane.b32.xlu1 %v4740_v17, %s6201_s17 }
 0x3f2   : > { %4688 = vrot.lane.b32.xlu0 %v4645_v56, %s6200_s16 }
 0x3f3   : > { %v4579_v10 = vpop.permute.xlu1 %4578  ;;  %v4829_v29 = vld [vmem:[#allocation4 + $0x98] sm:$0xff] }
 0x3f4   : > { %4622 = vst.msk [vmem:[#allocation4 + $0xa0] sm:$0xff] %vm1316_vm6, %v4579_v10  ;;  %v4485_v16 = vpop.permute.xlu0 %4484  ;;  %5796 = vmatmul.mubr.msk.f32.gmra.mrb[36].mxu1 %vm1549_vm9, %v4829_v29 }
 0x3f5   : > { %4527 = vst.msk [vmem:[#allocation4 + $0xa8] sm:$0xff] %vm1219_vm5, %v4485_v16  ;;  %4404 = vrot.lane.b32.xlu1 %v4644_v4, %s6197_s29  ;;  %v4648_v4 = vld [vmem:[#allocation2 + $0x228] sm:$0xff] }
 0x3f6   : > { %4118 = vrot.lane.b32.xlu0 %v8510_v35, %s6195_s22 }
 0x3f7   : > { %v4295_v61 = vpop.permute.xlu1 %4294 }
 0x3f8   : > { %4336 = vst.msk [vmem:[#allocation4 + $0xb0] sm:$0xff] %vm1025_vm3, %v4295_v61  ;;  %v4201_v8 = vpop.permute.xlu0 %4200 }
 0x3f9   : > { %4241 = vst.msk [vmem:[#allocation4 + $0xb8] sm:$0xff] %vm928_vm2, %v4201_v8  ;;  %4784 = vrot.lane.b32.xlu1 %v8593_v11, %s6201_s17 }
 0x3fa   : > { %4498 = vrot.lane.b32.xlu0 %v8545_v1, %s6198_s15 }
 0x3fb   : > { %v4675_v51 = vpop.permute.xlu1 %4674 }
 0x3fc   : > { %4718 = vst.msk [vmem:[#allocation4 + $0xa0] sm:$0xff] %vm1413_vm7, %v4675_v51  ;;  %v4581_v32 = vpop.permute.xlu0 %4580 }
 0x3fd   : > { %4623 = vst.msk [vmem:[#allocation4 + $0xa8] sm:$0xff] %vm1316_vm6, %v4581_v32  ;;  %4214 = vrot.lane.b32.xlu1 %v8527_v21, %s6194_s21 }
 0x3fe   : > { %4120 = vrot.lane.b32.xlu0 %v8529_v20, %s6195_s22 }
 0x3ff   : > { %v4391_v27 = vpop.permute.xlu1 %4390 }
 0x400   : > { %4432 = vst.msk [vmem:[#allocation4 + $0xb0] sm:$0xff] %vm1122_vm4, %v4391_v27  ;;  %v4297_v47 = vpop.permute.xlu0 %4296 }
 0x401   : > { %4337 = vst.msk [vmem:[#allocation4 + $0xb8] sm:$0xff] %vm1025_vm3, %v4297_v47  ;;  %4594 = vrot.lane.b32.xlu1 %v4550_v43, %s6199_s8 }
 0x402   : > { %4500 = vrot.lane.b32.xlu0 %v4740_v17, %s6198_s15 }
 0x403   : > { %v4771_v15 = vpop.permute.xlu1 %4770 }
 0x404   : > { %4814 = vst.msk [vmem:[#allocation4 + $0xa0] sm:$0xff] %vm1510_vm8, %v4771_v15  ;;  %v4677_v35 = vpop.permute.xlu0 %4676 }
 0x405   : > { %4719 = vst.msk [vmem:[#allocation4 + $0xa8] sm:$0xff] %vm1413_vm7, %v4677_v35  ;;  %4310 = vrot.lane.b32.xlu1 %v4549_v9, %s6196_s23 }
 0x406   : > { %4216 = vrot.lane.b32.xlu0 %v8545_v1, %s6194_s21  ;;  %s5227_s21 = sshll.u32 %s270_s13, 4  ;;  %s8838_s21 = int_to_ptr.vmem [resolvable:$true] %s5227_s21 }
 0x407   : > { %v4393_v50 = vpop.permute.xlu1 %4392  ;;  %v5726_v6 = vpop.f32.mrb[24].mxu1 }
 0x408   : > { %4433 = vst.msk [vmem:[#allocation4 + $0xb8] sm:$0xff] %vm1122_vm4, %v4393_v50  ;;  %v4107_v3 = vpop.permute.xlu0 %4106  ;;  %v3894_v24 = vadd.f32 %v8221_v38, %v5726_v6  ;;  %v3888_v55 = vpop.f32.mrb[25].mxu1 }
 0x409   : > { %4146 = vst.msk [vmem:[#allocation4 + $0xc0] sm:$0xff] %vm831_vm1, %v4107_v3  ;;  %v3889_v58 = vadd.f32 %v8221_v38, %v3888_v55  ;;  %4690 = vrot.lane.b32.xlu1 %v4646_v60, %s6200_s16  ;;  %v4742_v38 = vld [vmem:[#allocation2 + $0x219] sm:$0xff] }
 0x40a   : > { %v3944_v57 = vmax.f32 %v3894_v24, 0.0  ;;  %4596 = vrot.lane.b32.xlu0 %v4551_v53, %s6199_s8 }
 0x40b   : > { %v3943_v12 = vmax.f32 %v3889_v58, 0.0  ;;  %v4773_v34 = vpop.permute.xlu1 %4772  ;;  %v4830_v28 = vld [vmem:[#allocation4 + $0xa0] sm:$0xff] }
 0x40c   : > { %4815 = vst.msk [vmem:[#allocation4 + $0xa8] sm:$0xff] %vm1510_vm8, %v4773_v34  ;;  %v4487_v21 = vpop.permute.xlu0 %4486  ;;  %5798 = vmatprep.mubr.msk.f32.mxu1 %vm1549_vm9, %v4830_v28 }
 0x40d   : > { %v5992_v22 = vpack.c.bf16 %v3944_v57, %v3943_v12  ;;  %4528 = vst.msk [vmem:[#allocation4 + $0xb0] sm:$0xff] %vm1219_vm5, %v4487_v21  ;;  %4406 = vrot.lane.b32.xlu1 %v4645_v56, %s6197_s29 }
 0x40e   : > { %4312 = vrot.lane.b32.xlu0 %v4550_v43, %s6196_s23 }
 0x40f   : > { %v4203_v20 = vpop.permute.xlu1 %4202  ;;  %5993 = vmatpush3.bf16.msra.mxu0 %v5992_v22 }
 0x410   : > { %4242 = vst.msk [vmem:[#allocation4 + $0xc0] sm:$0xff] %vm928_vm2, %v4203_v20  ;;  %v4109_v25 = vpop.permute.xlu0 %4108  ;;  %5994 = vmatprep.subr.bf16.mxu0 %v6202_v40 }
 0x411   : > { %4147 = vst.msk [vmem:[#allocation4 + $0xc8] sm:$0xff] %vm831_vm1, %v4109_v25  ;;  %4786 = vrot.lane.b32.xlu1 %v4742_v38, %s6201_s17 }
 0x412   : > { %4692 = vrot.lane.b32.xlu0 %v4647_v2, %s6200_s16 }
 0x413   : > { %v4583_v39 = vpop.permute.xlu1 %4582  ;;  %v4831_v44 = vld [vmem:[#allocation4 + $0xa8] sm:$0xff] }
 0x414   : > { %4624 = vst.msk [vmem:[#allocation4 + $0xb0] sm:$0xff] %vm1316_vm6, %v4583_v39  ;;  %v4489_v1 = vpop.permute.xlu0 %4488  ;;  %5799 = vmatmul.mubr.msk.f32.gmra.mrb[38].mxu1 %vm1549_vm9, %v4831_v44 }
 0x415   : > { %4529 = vst.msk [vmem:[#allocation4 + $0xb8] sm:$0xff] %vm1219_vm5, %v4489_v1  ;;  %4502 = vrot.lane.b32.xlu1 %v8593_v11, %s6198_s15 }
 0x416   : > { %4408 = vrot.lane.b32.xlu0 %v4646_v60, %s6197_s29  ;;  %s8836_s29 = scalar_lea.hbm %s8885_s7, %s5355_s19 }
 0x417   : > { %v4299_v14 = vpop.permute.xlu1 %4298 }
 0x418   : > { %4338 = vst.msk [vmem:[#allocation4 + $0xc0] sm:$0xff] %vm1025_vm3, %v4299_v14  ;;  %v4205_v42 = vpop.permute.xlu0 %4204 }
 0x419   : > { %4243 = vst.msk [vmem:[#allocation4 + $0xc8] sm:$0xff] %vm928_vm2, %v4205_v42  ;;  %4504 = vrot.lane.b32.xlu1 %v4742_v38, %s6198_s15  ;;  %s5215_s15 = scalar_lea.sflag [#allocation6], %s269_s14 }
 0x41a   : > { %4788 = vrot.lane.b32.xlu0 %v4743_v59, %s6201_s17 }
 0x41b   : > { %v4679_v45 = vpop.permute.xlu1 %4678 }
 0x41c   : > { %4720 = vst.msk [vmem:[#allocation4 + $0xb0] sm:$0xff] %vm1413_vm7, %v4679_v45  ;;  %v4585_v31 = vpop.permute.xlu0 %4584 }
 0x41d   : > { %4625 = vst.msk [vmem:[#allocation4 + $0xb8] sm:$0xff] %vm1316_vm6, %v4585_v31  ;;  %4600 = vrot.lane.b32.xlu1 %v4553_v13, %s6199_s8 }
 0x41e   : > { %4598 = vrot.lane.b32.xlu0 %v4552_v48, %s6199_s8  ;;  %s6130_s8 = scalar_lea.vmem %s8838_s21, 16 }
 0x41f   : > { %v4395_v63 = vpop.permute.xlu1 %4394  ;;  %p6131_p11 = scmp.ne.s32.totalorder %s8838_s21, %s6130_s8 }
 0x420   : > { %4434 = vst.msk [vmem:[#allocation4 + $0xc0] sm:$0xff] %vm1122_vm4, %v4395_v63  ;;  %v4301_v33 = vpop.permute.xlu0 %4300 }
 0x421   : > { %4339 = vst.msk [vmem:[#allocation4 + $0xc8] sm:$0xff] %vm1025_vm3, %v4301_v33  ;;  %4696 = vrot.lane.b32.xlu1 %v4649_v54, %s6200_s16  ;;  %p6132_p12 = pnand %p6131_p11, %p6284_p5 }
 0x422   : > { %4694 = vrot.lane.b32.xlu0 %v4648_v4, %s6200_s16  ;;  %s6134_s16 = sshll.u32 %s6205_s28, 4  ;;  %s6135_s16 = int_to_ptr.vmem [resolvable:$false] %s6134_s16 }
 0x423   : > { %v4775_v9 = vpop.permute.xlu1 %4774  ;;  %p6133_p13 = pneg %p6132_p12  ;;  %p6137_p0 = scmp.lt.s32.totalorder %s8838_s21, %s6135_s16 }
 0x424   : > { %4816 = vst.msk [vmem:[#allocation4 + $0xb0] sm:$0xff] %vm1510_vm8, %v4775_v9  ;;  %v4681_v36 = vpop.permute.xlu0 %4680 }
 0x425   : > { %4721 = vst.msk [vmem:[#allocation4 + $0xb8] sm:$0xff] %vm1413_vm7, %v4681_v36  ;;  %4792 = vrot.lane.b32.xlu1 %v4745_v0, %s6201_s17 }
 0x426   : > { %4790 = vrot.lane.b32.xlu0 %v4744_v18, %s6201_s17  ;;  %s6136_s17 = scalar_lea.vmem %s6135_s16, 32 }
 0x427   : > { %v4397_v23 = vpop.permute.xlu1 %4396  ;;  %v5729_v41 = vpop.f32.mrb[26].mxu1  ;;  %p6138_p1 = scmp.lt.s32.totalorder %s6136_s17, %s6130_s8 }
 0x428   : > { %4435 = vst.msk [vmem:[#allocation4 + $0xc8] sm:$0xff] %vm1122_vm4, %v4397_v23  ;;  %v4111_v26 = vpop.permute.xlu0 %4110  ;;  %v3904_v37 = vadd.f32 %v8658_v7, %v5729_v41  ;;  %v3898_v62 = vpop.f32.mrb[27].mxu1 }
 0x429   : > { %4148 = vst.msk [vmem:[#allocation4 + $0xd0] sm:$0xff] %vm831_vm1, %v4111_v26  ;;  %v3899_v49 = vadd.f32 %v8658_v7, %v3898_v62  ;;  %p6139_p2 = por %p6138_p1, %p6137_p0 }
 0x42a   : > { %v3946_v52 = vmax.f32 %v3904_v37, 0.0 }
 0x42b   : > { %v3945_v17 = vmax.f32 %v3899_v49, 0.0  ;;  %v4777_v5 = vpop.permute.xlu1 %4776  ;;  %v4832_v56 = vld [vmem:[#allocation4 + $0xb0] sm:$0xff]  ;;  %p6140_p3 = pnand %p6139_p2, %p6133_p13 }
 0x42c   : > { %4817 = vst.msk [vmem:[#allocation4 + $0xb8] sm:$0xff] %vm1510_vm8, %v4777_v5  ;;  %v4491_v46 = vpop.permute.xlu0 %4490  ;;  %5801 = vmatprep.mubr.msk.f32.mxu1 %vm1549_vm9, %v4832_v56 }
 0x42d   : > { %v5995_v10 = vpack.c.bf16 %v3946_v52, %v3945_v17  ;;  %4530 = vst.msk [vmem:[#allocation4 + $0xc0] sm:$0xff] %vm1219_vm5, %v4491_v46 }
 0x42f   : > { %v4207_v29 = vpop.permute.xlu1 %4206  ;;  %5996 = vmatpush3.bf16.msra.mxu0 %v5995_v10 }
 0x430   : > { %4244 = vst.msk [vmem:[#allocation4 + $0xd0] sm:$0xff] %vm928_vm2, %v4207_v29  ;;  %v4113_v16 = vpop.permute.xlu0 %4112  ;;  %5997 = vmatprep.subr.bf16.mxu0 %v6202_v40 }
 0x431   : > { %4149 = vst.msk [vmem:[#allocation4 + $0xd8] sm:$0xff] %vm831_vm1, %v4113_v16 }
 0x433   : > { %v4587_v11 = vpop.permute.xlu1 %4586  ;;  %v4833_v61 = vld [vmem:[#allocation4 + $0xb8] sm:$0xff] }
 0x434   : > { %4626 = vst.msk [vmem:[#allocation4 + $0xc0] sm:$0xff] %vm1316_vm6, %v4587_v11  ;;  %v4493_v8 = vpop.permute.xlu0 %4492  ;;  %5802 = vmatmul.mubr.msk.f32.gmra.mrb[40].mxu1 %vm1549_vm9, %v4833_v61 }
 0x435   : > { %4531 = vst.msk [vmem:[#allocation4 + $0xc8] sm:$0xff] %vm1219_vm5, %v4493_v8 }
 0x437   : > { %v4303_v51 = vpop.permute.xlu1 %4302 }
 0x438   : > { %4340 = vst.msk [vmem:[#allocation4 + $0xd0] sm:$0xff] %vm1025_vm3, %v4303_v51  ;;  %v4209_v32 = vpop.permute.xlu0 %4208 }
 0x439   : > { %4245 = vst.msk [vmem:[#allocation4 + $0xd8] sm:$0xff] %vm928_vm2, %v4209_v32 }
 0x43b   : > { %v4683_v43 = vpop.permute.xlu1 %4682 }
 0x43c   : > { %4722 = vst.msk [vmem:[#allocation4 + $0xc0] sm:$0xff] %vm1413_vm7, %v4683_v43  ;;  %v4589_v27 = vpop.permute.xlu0 %4588 }
 0x43d   : > { %4627 = vst.msk [vmem:[#allocation4 + $0xc8] sm:$0xff] %vm1316_vm6, %v4589_v27 }
 0x43f   : > { %v4399_v47 = vpop.permute.xlu1 %4398 }
 0x440   : > { %4436 = vst.msk [vmem:[#allocation4 + $0xd0] sm:$0xff] %vm1122_vm4, %v4399_v47  ;;  %v4305_v15 = vpop.permute.xlu0 %4304 }
 0x441   : > { %4341 = vst.msk [vmem:[#allocation4 + $0xd8] sm:$0xff] %vm1025_vm3, %v4305_v15 }
 0x443   : > { %v4779_v35 = vpop.permute.xlu1 %4778 }
 0x444   : > { %4818 = vst.msk [vmem:[#allocation4 + $0xc0] sm:$0xff] %vm1510_vm8, %v4779_v35  ;;  %v4685_v60 = vpop.permute.xlu0 %4684 }
 0x445   : > { %4723 = vst.msk [vmem:[#allocation4 + $0xc8] sm:$0xff] %vm1413_vm7, %v4685_v60 }
 0x447   : > { %v4401_v50 = vpop.permute.xlu1 %4400  ;;  %v5732_v6 = vpop.f32.mrb[28].mxu1 }
 0x448   : > { %4437 = vst.msk [vmem:[#allocation4 + $0xd8] sm:$0xff] %vm1122_vm4, %v4401_v50  ;;  %v4115_v53 = vpop.permute.xlu0 %4114  ;;  %v3914_v3 = vadd.f32 %v8658_v7, %v5732_v6  ;;  %v3908_v24 = vpop.f32.mrb[29].mxu1 }
 0x449   : > { %4150 = vst.msk [vmem:[#allocation4 + $0xe0] sm:$0xff] %vm831_vm1, %v4115_v53  ;;  %v3909_v55 = vadd.f32 %v8658_v7, %v3908_v24  ;;  %v5337_v53 = vld [vmem:[%s8880_s2 + $0x2] sm:$0x1] }
 0x44a   : > { %v3948_v58 = vmax.f32 %v3914_v3, 0.0 }
 0x44b   : > { %v3947_v57 = vmax.f32 %v3909_v55, 0.0  ;;  %v4781_v12 = vpop.permute.xlu1 %4780  ;;  %v4834_v34 = vld [vmem:[#allocation4 + $0xc0] sm:$0xff] }
 0x44c   : > { %4819 = vst.msk [vmem:[#allocation4 + $0xc8] sm:$0xff] %vm1510_vm8, %v4781_v12  ;;  %v4495_v28 = vpop.permute.xlu0 %4494  ;;  %5804 = vmatprep.mubr.msk.f32.mxu1 %vm1549_vm9, %v4834_v34 }
 0x44d   : > { %v5998_v21 = vpack.c.bf16 %v3948_v58, %v3947_v57  ;;  %4532 = vst.msk [vmem:[#allocation4 + $0xd0] sm:$0xff] %vm1219_vm5, %v4495_v28 }
 0x44f   : > { %v4211_v22 = vpop.permute.xlu1 %4210  ;;  %5999 = vmatpush3.bf16.msra.mxu0 %v5998_v21 }
 0x450   : > { %4246 = vst.msk [vmem:[#allocation4 + $0xe0] sm:$0xff] %vm928_vm2, %v4211_v22  ;;  %v4117_v38 = vpop.permute.xlu0 %4116  ;;  %6000 = vmatprep.subr.bf16.mxu0 %v6202_v40 }
 0x451   : > { %4151 = vst.msk [vmem:[#allocation4 + $0xe8] sm:$0xff] %vm831_vm1, %v4117_v38 }
 0x453   : > { %v4591_v20 = vpop.permute.xlu1 %4590  ;;  %v4835_v2 = vld [vmem:[#allocation4 + $0xc8] sm:$0xff] }
 0x454   : > { %4628 = vst.msk [vmem:[#allocation4 + $0xd0] sm:$0xff] %vm1316_vm6, %v4591_v20  ;;  %v4497_v25 = vpop.permute.xlu0 %4496  ;;  %5805 = vmatmul.mubr.msk.f32.gmra.mrb[42].mxu1 %vm1549_vm9, %v4835_v2 }
 0x455   : > { %4533 = vst.msk [vmem:[#allocation4 + $0xd8] sm:$0xff] %vm1219_vm5, %v4497_v25 }
 0x457   : > { %v4307_v39 = vpop.permute.xlu1 %4306 }
 0x458   : > { %4342 = vst.msk [vmem:[#allocation4 + $0xe0] sm:$0xff] %vm1025_vm3, %v4307_v39  ;;  %v4213_v44 = vpop.permute.xlu0 %4212 }
 0x459   : > { %4247 = vst.msk [vmem:[#allocation4 + $0xe8] sm:$0xff] %vm928_vm2, %v4213_v44 }
 0x45b   : > { %v4687_v1 = vpop.permute.xlu1 %4686 }
 0x45c   : > { %4724 = vst.msk [vmem:[#allocation4 + $0xd0] sm:$0xff] %vm1413_vm7, %v4687_v1  ;;  %v4593_v14 = vpop.permute.xlu0 %4592 }
 0x45d   : > { %4629 = vst.msk [vmem:[#allocation4 + $0xd8] sm:$0xff] %vm1316_vm6, %v4593_v14 }
 0x45f   : > { %v4403_v59 = vpop.permute.xlu1 %4402 }
 0x460   : > { %4438 = vst.msk [vmem:[#allocation4 + $0xe0] sm:$0xff] %vm1122_vm4, %v4403_v59  ;;  %v4309_v42 = vpop.permute.xlu0 %4308 }
 0x461   : > { %4343 = vst.msk [vmem:[#allocation4 + $0xe8] sm:$0xff] %vm1025_vm3, %v4309_v42 }
 0x463   : > { %v4783_v13 = vpop.permute.xlu1 %4782 }
 0x464   : > { %4820 = vst.msk [vmem:[#allocation4 + $0xd0] sm:$0xff] %vm1510_vm8, %v4783_v13  ;;  %v4689_v45 = vpop.permute.xlu0 %4688 }
 0x465   : > { %4725 = vst.msk [vmem:[#allocation4 + $0xd8] sm:$0xff] %vm1413_vm7, %v4689_v45 }
 0x467   : > { %v4405_v48 = vpop.permute.xlu1 %4404 }
 0x468   : > { %4439 = vst.msk [vmem:[#allocation4 + $0xe8] sm:$0xff] %vm1122_vm4, %v4405_v48  ;;  %v4119_v31 = vpop.permute.xlu0 %4118  ;;  %v5735_v54 = vpop.f32.mrb[30].mxu1 }
 0x469   : > { %4152 = vst.msk [vmem:[#allocation4 + $0xf0] sm:$0xff] %vm831_vm1, %v4119_v31  ;;  %v3924_v63 = vadd.f32 %v8658_v7, %v5735_v54  ;;  %v3918_v4 = vpop.f32.mrb[31].mxu1 }
 0x46a   : > { %v3919_v33 = vadd.f32 %v8658_v7, %v3918_v4 }
 0x46b   : > { %v3950_v0 = vmax.f32 %v3924_v63, 0.0  ;;  %v4785_v9 = vpop.permute.xlu1 %4784  ;;  %v4836_v18 = vld [vmem:[#allocation4 + $0xd0] sm:$0xff] }
 0x46c   : > { %v3949_v36 = vmax.f32 %v3919_v33, 0.0  ;;  %4821 = vst.msk [vmem:[#allocation4 + $0xd8] sm:$0xff] %vm1510_vm8, %v4785_v9  ;;  %v4499_v23 = vpop.permute.xlu0 %4498  ;;  %5807 = vmatprep.mubr.msk.f32.mxu1 %vm1549_vm9, %v4836_v18  ;;  %v5126_v9 = vld [vmem:[%s8883_s5] sm:$0xff]  ;;  %v5127_v18 = vld [vmem:[%s8883_s5 + $0x8] sm:$0xff] }
 0x46d   : > { %4534 = vst.msk [vmem:[#allocation4 + $0xe0] sm:$0xff] %vm1219_vm5, %v4499_v23  ;;  %v6047_v23 = vpack.c.bf16 %v5127_v18, %v5126_v9 }
 0x46e   : > { %v6001_v41 = vpack.c.bf16 %v3950_v0, %v3949_v36  ;;  %v5128_v36 = vld [vmem:[%s8883_s5 + $0x10] sm:$0xff] }
 0x46f   : > { %v4215_v26 = vpop.permute.xlu1 %4214  ;;  %6048 = vmatpush3.bf16.msra.mxu1 %v6047_v23 }
 0x470   : > { %v4121_v37 = vpop.permute.xlu0 %4120  ;;  %6002 = vmatpush3.bf16.msra.mxu0 %v6001_v41  ;;  %4248 = vst.msk [vmem:[#allocation4 + $0xf0] sm:$0xff] %vm928_vm2, %v4215_v26  ;;  %v5129_v41 = vld [vmem:[%s8883_s5 + $0x18] sm:$0xff]  ;;  %6049 = vmatprep.subr.bf16.mxu1 %v6202_v40 }
 0x471   : > { %4153 = vst.msk [vmem:[#allocation4 + $0xf8] sm:$0xff] %vm831_vm1, %v4121_v37  ;;  %6003 = vmatprep.subr.bf16.mxu0 %v6202_v40  ;;  %v6050_v26 = vpack.c.bf16 %v5129_v41, %v5128_v36  ;;  %v5130_v37 = vld [vmem:[%s8883_s5 + $0x20] sm:$0xff] }
 0x472   : > { %v5142_v36 = vld [vmem:[%s8884_s6] sm:$0x1] }
 0x473   : > { %v4595_v62 = vpop.permute.xlu1 %4594  ;;  %v4837_v49 = vld [vmem:[#allocation4 + $0xd8] sm:$0xff]  ;;  %6051 = vmatpush3.bf16.msra.mxu1 %v6050_v26 }
 0x474   : > { %v4501_v52 = vpop.permute.xlu0 %4500  ;;  %4630 = vst.msk [vmem:[#allocation4 + $0xe0] sm:$0xff] %vm1316_vm6, %v4595_v62  ;;  %5808 = vmatmul.mubr.msk.f32.gmra.mrb[44].mxu1 %vm1549_vm9, %v4837_v49  ;;  %v5131_v62 = vld [vmem:[%s8883_s5 + $0x28] sm:$0xff]  ;;  %6052 = vmatprep.subr.bf16.mxu1 %v6202_v40 }
 0x475   : > { %4535 = vst.msk [vmem:[#allocation4 + $0xe8] sm:$0xff] %vm1219_vm5, %v4501_v52  ;;  %v6053_v52 = vpack.c.bf16 %v5131_v62, %v5130_v37 }
 0x477   : > { %v4311_v17 = vpop.permute.xlu1 %4310  ;;  %6054 = vmatpush3.bf16.msra.mxu1 %v6053_v52 }
 0x478   : > { %v4217_v5 = vpop.permute.xlu0 %4216  ;;  %4344 = vst.msk [vmem:[#allocation4 + $0xf0] sm:$0xff] %vm1025_vm3, %v4311_v17  ;;  %6055 = vmatprep.subr.bf16.mxu1 %v6202_v40 }
 0x479   : > { %4249 = vst.msk [vmem:[#allocation4 + $0xf8] sm:$0xff] %vm928_vm2, %v4217_v5 }
 0x47b   : > { %v4691_v56 = vpop.permute.xlu1 %4690 }
 0x47c   : > { %v4597_v46 = vpop.permute.xlu0 %4596  ;;  %4726 = vst.msk [vmem:[#allocation4 + $0xe0] sm:$0xff] %vm1413_vm7, %v4691_v56  ;;  %v5132_v56 = vld [vmem:[%s8883_s5 + $0x30] sm:$0xff] }
 0x47d   : > { %4631 = vst.msk [vmem:[#allocation4 + $0xe8] sm:$0xff] %vm1316_vm6, %v4597_v46  ;;  %v5133_v46 = vld [vmem:[%s8883_s5 + $0x38] sm:$0xff] }
 0x47f   : > { %v4407_v10 = vpop.permute.xlu1 %4406 }
 0x480   : > { %v4313_v29 = vpop.permute.xlu0 %4312  ;;  %4440 = vst.msk [vmem:[#allocation4 + $0xf0] sm:$0xff] %vm1122_vm4, %v4407_v10 }
 0x481   : > { %4345 = vst.msk [vmem:[#allocation4 + $0xf8] sm:$0xff] %vm1025_vm3, %v4313_v29 }
 0x483   : > { %v4787_v16 = vpop.permute.xlu1 %4786 }
 0x484   : > { %v4693_v11 = vpop.permute.xlu0 %4692  ;;  %v5738_v61 = vpop.f32.mrb[32].mxu1  ;;  %4822 = vst.msk [vmem:[#allocation4 + $0xe0] sm:$0xff] %vm1510_vm8, %v4787_v16 }
 0x485   : > { %4727 = vst.msk [vmem:[#allocation4 + $0xe8] sm:$0xff] %vm1413_vm7, %v4693_v11  ;;  %v3934_v8 = vadd.f32 %v8658_v7, %v5738_v61  ;;  %v3928_v51 = vpop.f32.mrb[33].mxu1  ;;  %v6056_v11 = vpack.c.bf16 %v5133_v46, %v5132_v56  ;;  %v5134_v61 = vld [vmem:[%s8883_s5 + $0x40] sm:$0xff] }
 0x486   : > { %v3929_v32 = vadd.f32 %v8658_v7, %v3928_v51 }
 0x487   : > { %v3952_v43 = vmax.f32 %v3934_v8, 0.0  ;;  %v4503_v27 = vpop.permute.xlu1 %4502  ;;  %v5135_v8 = vld [vmem:[%s8883_s5 + $0x48] sm:$0xff]  ;;  %6057 = vmatpush3.bf16.msra.mxu1 %v6056_v11 }
 0x488   : > { %v3951_v47 = vmax.f32 %v3929_v32, 0.0  ;;  %v4409_v15 = vpop.permute.xlu0 %4408  ;;  %4536 = vst.msk [vmem:[#allocation4 + $0xf0] sm:$0xff] %vm1219_vm5, %v4503_v27  ;;  %v6059_v32 = vpack.c.bf16 %v5135_v8, %v5134_v61  ;;  %6058 = vmatprep.subr.bf16.mxu1 %v6202_v40  ;;  %v5137_v27 = vld [vmem:[%s8883_s5 + $0x58] sm:$0xff] }
 0x489   : > { %4441 = vst.msk [vmem:[#allocation4 + $0xf8] sm:$0xff] %vm1122_vm4, %v4409_v15 }
 0x48a   : > { %v6004_v35 = vpack.c.bf16 %v3952_v43, %v3951_v47  ;;  %v5136_v43 = vld [vmem:[%s8883_s5 + $0x50] sm:$0xff] }
 0x48b   : > { %v4505_v60 = vpop.permute.xlu1 %4504  ;;  %v4838_v50 = vld [vmem:[#allocation4 + $0xe0] sm:$0xff]  ;;  %6060 = vmatpush3.bf16.msra.mxu1 %v6059_v32  ;;  %v6062_v47 = vpack.c.bf16 %v5137_v27, %v5136_v43 }
 0x48c   : > { %v4789_v6 = vpop.permute.xlu0 %4788  ;;  %6005 = vmatpush3.bf16.msra.mxu0 %v6004_v35  ;;  %4537 = vst.msk [vmem:[#allocation4 + $0xf8] sm:$0xff] %vm1219_vm5, %v4505_v60  ;;  %5810 = vmatprep.mubr.msk.f32.mxu1 %vm1549_vm9, %v4838_v50 }
 0x48d   : > { %4823 = vst.msk [vmem:[#allocation4 + $0xe8] sm:$0xff] %vm1510_vm8, %v4789_v6  ;;  %6022 = vmatprep.subr.bf16.mxu0 %v6202_v40  ;;  %6061 = vmatprep.subr.bf16.mxu1 %v6202_v40 }
 0x48f   : > { %v4601_v3 = vpop.permute.xlu1 %4600  ;;  %5772 = vmatmul.mubr.f32.vlgmr.msra.gmra.mrb[16].mxu0 %v5337_v53  ;;  %6063 = vmatpush3.bf16.msra.mxu1 %v6062_v47 }
 0x490   : > { %v4599_v24 = vpop.permute.xlu0 %4598  ;;  %4633 = vst.msk [vmem:[#allocation4 + $0xf8] sm:$0xff] %vm1316_vm6, %v4601_v3  ;;  %5848 = vmatprep.mubr.msk.f32.mxu0 %vm6203_vm10, %v6204_v19  ;;  %6064 = vmatprep.subr.bf16.mxu1 %v6202_v40 }
 0x491   : > { %4632 = vst.msk [vmem:[#allocation4 + $0xf0] sm:$0xff] %vm1316_vm6, %v4599_v24 }
 0x493   : > { %v4697_v55 = vpop.permute.xlu1 %4696 }
 0x494   : > { %v4695_v58 = vpop.permute.xlu0 %4694  ;;  %4729 = vst.msk [vmem:[#allocation4 + $0xf8] sm:$0xff] %vm1413_vm7, %v4697_v55  ;;  %v4839_v57 = vld [vmem:[#allocation4 + $0xe8] sm:$0xff] }
 0x495   : > { %4728 = vst.msk [vmem:[#allocation4 + $0xf0] sm:$0xff] %vm1413_vm7, %v4695_v58  ;;  %5811 = vmatmul.mubr.msk.f32.gmra.mrb[46].mxu1 %vm1549_vm9, %v4839_v57 }
 0x497   : > { %v4793_v12 = vpop.permute.xlu1 %4792 }
 0x498   : > { %v4791_v34 = vpop.permute.xlu0 %4790  ;;  %4825 = vst.msk [vmem:[#allocation4 + $0xf8] sm:$0xff] %vm1510_vm8, %v4793_v12 }
 0x499   : > { %4824 = vst.msk [vmem:[#allocation4 + $0xf0] sm:$0xff] %vm1510_vm8, %v4791_v34 }
 0x49f   : > { %v4841_v28 = vld [vmem:[#allocation4 + $0xf8] sm:$0xff] }
 0x4a0   : > { %v4840_v21 = vld [vmem:[#allocation4 + $0xf0] sm:$0xff] }
 0x4a1   : > { %5813 = vmatprep.mubr.msk.f32.mxu1 %vm1549_vm9, %v4840_v21 }
 0x4a2   : > { %5814 = vmatmul.mubr.msk.f32.gmra.mrb[48].mxu1 %vm1549_vm9, %v4841_v28 }
 0x4a3   : > { %5883 = vmatprep.mubr.msk.f32.mxu1 %vm6203_vm10, %v6204_v19 }
 0x4a7   : > { %v5794_v22 = vpop.f32.mrb[34].mxu1 }
 0x4a8   : > { %v4962_v38 = vadd.f32 %v8658_v7, %v5794_v22  ;;  %v4956_v20 = vpop.f32.mrb[35].mxu1 }
 0x4a9   : > { %v4957_v2 = vadd.f32 %v8658_v7, %v4956_v20 }
 0x4aa   : > { %v5036_v25 = vmax.f32 %v4962_v38, 0.0 }
 0x4ab   : > { %v5035_v39 = vmax.f32 %v4957_v2, 0.0 }
 0x4ad   : > { %v6023_v44 = vpack.c.bf16 %v5036_v25, %v5035_v39 }
 0x4af   : > { %6024 = vmatpush3.bf16.msra.mxu0 %v6023_v44 }
 0x4b0   : > { %6025 = vmatprep.subr.bf16.mxu0 %v6202_v40 }
 0x4c7   : > { %v5797_v1 = vpop.f32.mrb[36].mxu1 }
 0x4c8   : > { %v4972_v14 = vadd.f32 %v8658_v7, %v5797_v1  ;;  %v4966_v59 = vpop.f32.mrb[37].mxu1 }
 0x4c9   : > { %v4967_v42 = vadd.f32 %v8658_v7, %v4966_v59 }
 0x4ca   : > { %v5038_v13 = vmax.f32 %v4972_v14, 0.0 }
 0x4cb   : > { %v5037_v19 = vmax.f32 %v4967_v42, 0.0 }
 0x4cd   : > { %v6026_v45 = vpack.c.bf16 %v5038_v13, %v5037_v19 }
 0x4cf   : > { %6027 = vmatpush3.bf16.msra.mxu0 %v6026_v45  ;;  %v5354_v45 = vld [vmem:[%s8880_s2 + $0x3] sm:$0x1] }
 0x4d0   : > { %6028 = vmatprep.subr.bf16.mxu0 %v6202_v40 }
 0x4e7   : > { %v5800_v48 = vpop.f32.mrb[38].mxu1 }
 0x4e8   : > { %v4982_v31 = vadd.f32 %v8658_v7, %v5800_v48  ;;  %v4976_v54 = vpop.f32.mrb[39].mxu1  ;;  %v5138_v48 = vld [vmem:[%s8883_s5 + $0x60] sm:$0xff] }
 0x4e9   : > { %v4977_v63 = vadd.f32 %v8658_v7, %v4976_v54  ;;  %v5140_v54 = vld [vmem:[%s8883_s5 + $0x70] sm:$0xff] }
 0x4ea   : > { %v5040_v4 = vmax.f32 %v4982_v31, 0.0  ;;  %v5139_v31 = vld [vmem:[%s8883_s5 + $0x68] sm:$0xff] }
 0x4eb   : > { %v5039_v33 = vmax.f32 %v4977_v63, 0.0  ;;  %v5141_v63 = vld [vmem:[%s8883_s5 + $0x78] sm:$0xff] }
 0x4ed   : > { %v6029_v0 = vpack.c.bf16 %v5040_v4, %v5039_v33  ;;  %v6068_v4 = vpack.c.bf16 %v5141_v63, %v5140_v54 }
 0x4ef   : > { %6030 = vmatpush3.bf16.msra.mxu0 %v6029_v0 }
 0x4f0   : > { %6031 = vmatprep.subr.bf16.mxu0 %v6202_v40 }
 0x507   : > { %v5803_v49 = vpop.f32.mrb[40].mxu1 }
 0x508   : > { %v4992_v17 = vadd.f32 %v8658_v7, %v5803_v49  ;;  %v4986_v5 = vpop.f32.mrb[41].mxu1 }
 0x509   : > { %v4987_v10 = vadd.f32 %v8658_v7, %v4986_v5 }
 0x50a   : > { %v5042_v29 = vmax.f32 %v4992_v17, 0.0 }
 0x50b   : > { %v5041_v16 = vmax.f32 %v4987_v10, 0.0 }
 0x50d   : > { %v6032_v51 = vpack.c.bf16 %v5042_v29, %v5041_v16 }
 0x50f   : > { %6033 = vmatpush3.bf16.msra.mxu0 %v6032_v51 }
 0x510   : > { %6034 = vmatprep.subr.bf16.mxu0 %v6202_v40 }
 0x527   : > { %v5806_v15 = vpop.f32.mrb[42].mxu1 }
 0x528   : > { %v5002_v35 = vadd.f32 %v8658_v7, %v5806_v15  ;;  %v4996_v60 = vpop.f32.mrb[43].mxu1 }
 0x529   : > { %v4997_v50 = vadd.f32 %v8658_v7, %v4996_v60 }
 0x52a   : > { %v5044_v6 = vmax.f32 %v5002_v35, 0.0 }
 0x52b   : > { %v5043_v53 = vmax.f32 %v4997_v50, 0.0 }
 0x52d   : > { %v6035_v3 = vpack.c.bf16 %v5044_v6, %v5043_v53 }
 0x52f   : > { %6036 = vmatpush3.bf16.msra.mxu0 %v6035_v3 }
 0x530   : > { %6037 = vmatprep.subr.bf16.mxu0 %v6202_v40 }
 0x547   : > { %v5809_v24 = vpop.f32.mrb[44].mxu1 }
 0x548   : > { %v5012_v55 = vadd.f32 %v8658_v7, %v5809_v24  ;;  %v5006_v58 = vpop.f32.mrb[45].mxu1 }
 0x549   : > { %v5007_v57 = vadd.f32 %v8658_v7, %v5006_v58 }
 0x54a   : > { %v5046_v12 = vmax.f32 %v5012_v55, 0.0 }
 0x54b   : > { %v5045_v34 = vmax.f32 %v5007_v57, 0.0 }
 0x54d   : > { %v6038_v28 = vpack.c.bf16 %v5046_v12, %v5045_v34 }
 0x54f   : > { %6039 = vmatpush3.bf16.msra.mxu0 %v6038_v28 }
 0x550   : > { %6040 = vmatprep.subr.bf16.mxu0 %v6202_v40 }
 0x568   : > { %v5812_v21 = vpop.f32.mrb[46].mxu1 }
 0x569   : > { %v5022_v22 = vadd.f32 %v8658_v7, %v5812_v21  ;;  %v5016_v38 = vpop.f32.mrb[47].mxu1 }
 0x56a   : > { %v5017_v20 = vadd.f32 %v8658_v7, %v5016_v38 }
 0x56b   : > { %v5048_v2 = vmax.f32 %v5022_v22, 0.0 }
 0x56c   : > { %v5047_v25 = vmax.f32 %v5017_v20, 0.0 }
 0x56e   : > { %v6041_v39 = vpack.c.bf16 %v5048_v2, %v5047_v25 }
 0x570   : > { %6042 = vmatpush3.bf16.msra.mxu0 %v6041_v39 }
 0x571   : > { %6043 = vmatprep.subr.bf16.mxu0 %v6202_v40 }
 0x575   : > { %v5815_v44 = vpop.f32.mrb[48].mxu1 }
 0x576   : > { %v5032_v1 = vadd.f32 %v8658_v7, %v5815_v44  ;;  %v5026_v14 = vpop.f32.mrb[49].mxu1 }
 0x577   : > { %v5027_v59 = vadd.f32 %v8658_v7, %v5026_v14  ;;  %v6065_v7 = vpack.c.bf16 %v5139_v31, %v5138_v48 }
 0x578   : > { %v5050_v42 = vmax.f32 %v5032_v1, 0.0 }
 0x579   : > { %v5049_v13 = vmax.f32 %v5027_v59, 0.0  ;;  %6066 = vmatpush3.bf16.msra.mxu1 %v6065_v7 }
 0x57a   : > { %6067 = vmatprep.subr.bf16.mxu1 %v6202_v40 }
 0x57b   : > { %v6044_v19 = vpack.c.bf16 %v5050_v42, %v5049_v13 }
 0x57d   : > { %6045 = vmatpush3.bf16.msra.mxu0 %v6044_v19  ;;  %6069 = vmatpush3.bf16.msra.mxu1 %v6068_v4 }
 0x580   : > { %5849 = vmatmul.mubr.f32.vlgmr.msra.gmra.mrb[16].mxu0 %v5354_v45 }
 0x653   : > { %v5119_v33 = vpop.f32.mrb[16].mxu0 }
 0x654   : > { %v6070_v0 = vadd.f32 %v5119_v33, %v8256_v30  ;;  %v5850_v9 = vpop.f32.mrb[17].mxu0 }
 0x656   : > { %5124 = vst [vmem:[#allocation3] sm:$0x1] %v6070_v0 }
 0x65d   : > { %v5125_v18 = vld [vmem:[#allocation3] sm:$0x1] }
 0x65e   : > { %5884 = vmatmul.mubr.f32.vlgmr.msra.gmra.mrb[50].mxu1 %v5125_v18 }
 0x731   : > { %v5209_v23 = vpop.f32.mrb[50].mxu1 }
 0x732   : > { %v5210_v41 = vadd.f32 %v5209_v23, %v5142_v36  ;;  %v5885_v40 = vpop.f32.mrb[51].mxu1 }
 0x734   : > { %5213 = vst [vmem:[%s270_s13] sm:$0x1] %v5210_v41 }
 0x735   : > { %6143 = shalt.err (!%p6140_p3)
}
 0x736   : > { %s6144_s20 = scalar_lea.hbm %s8836_s29, 16  ;;  %s6148_s18 = scalar_lea.hbm %s8885_s7, 32 }
 0x737   : > { %p6145_p4 = scmp.ne.s32.totalorder %s8836_s29, %s6144_s20  ;;  %p6149_p9 = scmp.lt.u32.totalorder %s8836_s29, %s8885_s7 }
 0x738   : > { %p6150_p10 = scmp.lt.u32.totalorder %s6148_s18, %s6144_s20  ;;  %p6152_p12 = scmp.lt.u32.totalorder %s6144_s20, %s8836_s29 }
 0x739   : > { %p6146_p7 = pnand %p6145_p4, %p6284_p5 }
 0x73a   : > { %p6151_p11 = por %p6150_p10, %p6149_p9 }
 0x73b   : > { %p6147_p8 = pneg %p6146_p7 }
 0x73c   : > { %p6153_p13 = por %p6152_p12, %p6151_p11 }
 0x73e   : > { %p6154_p0 = pnand %p6153_p13, %p6147_p8 }
 0x740   : > { %6157 = shalt.err (!%p6154_p0)
}
 0x741   : > { %6076 = dma.vmem_to_hbm [thread:$0]  (%p6284_p5), %s8838_s21, 16, %s8836_s29, %s5215_s15  }
 0x742 PF: > { %p6082_p1 = scmp.ge.s32.totalorder %s6192_s27, 2  ;;  %s5239_s22 = sand.u32 1, %s6180_s24  }
 0x743   : > { %s5240_s23 = scalar_lea.sflag [#allocation6], %s5239_s22 }
 0x744   : > { %p6079_p2 = pnand %p6082_p1, %p6288_p6 }
 0x746   : > { %6175 = dma.done.wait (!%p6079_p2), %s5240_s23, 16  }
 0x747   : > { %6177 = vsyncadd (!%p6079_p2), %s5240_s23, 4294967280  ;;  %p17_p3 = scmp.ge.s32.totalorder %s6271_s30, 4   ;;  %s8888_s24 = smov %s6184_s25 }
 0x748   : > { %s8889_s25 = smov %s6188_s26  ;;  %s8890_s26 = smov %s6282_s10 }
 0x749   : > { %s8891_s27 = smov %s6271_s30  ;;  %19 = sbr.rel (!%p17_p3) target bundleno = 3 (0x3), region = 87 }
 0x750   :  { %5244 = vsyncpa [#allocation6], 1 }
 0x751   :  { %5246 = vsyncpa [#allocation6 + $0x1], 1 }

</bundles_post_ra>
